<compile_context>
chip_gen: v7x
topology: tpu7x:2x2x1
jax: 0.10.0
libtpu: 0.0.40
codegen_flags: <defaults>
</compile_context>

<pallas_src>
import math
import functools

import jax
import jax.numpy as jnp
from jax import lax
from jax.experimental import pallas as pl
from jax.experimental.pallas import tpu as pltpu


# -----------------------------------------------------------------------------
# In-kernel helpers (traced inside Pallas kernel bodies)
# -----------------------------------------------------------------------------

def _ln(x, g, b):
    """Row-wise LayerNorm over the last (feature) axis.  x:(T,E) g,b:(1,E)."""
    mu = jnp.mean(x, axis=-1, keepdims=True)
    xc = x - mu
    var = jnp.mean(xc * xc, axis=-1, keepdims=True)
    return xc * lax.rsqrt(var + 1e-5) * g + b


def _key_pad_mask(valid_len, tq, tk):
    """Additive (0 / -1e9) key-padding mask of shape (tq, tk)."""
    col = lax.broadcasted_iota(jnp.int32, (tq, tk), 1)
    return jnp.where(col < valid_len, 0.0, -1e9).astype(jnp.float32)


def _causal_pad_mask(valid_len, t):
    """Additive causal + key-padding mask of shape (t, t)."""
    col = lax.broadcasted_iota(jnp.int32, (t, t), 1)
    row = lax.broadcasted_iota(jnp.int32, (t, t), 0)
    ok = (col < valid_len) & (col <= row)
    return jnp.where(ok, 0.0, -1e9).astype(jnp.float32)


def _mha_block(q, k, v, mask, wo, n_head, h_size, scale):
    """All-head attention + output projection.

    q:(Tq, H*Dh) k,v:(Tk, H*Dh) mask:(Tq, Tk) wo:(H*Dh, E)
    returns sum_h softmax(q_h k_h^T * scale + mask) v_h @ wo[h]  -> (Tq, E)
    """
    out = None
    for h in range(n_head):
        sl = slice(h * h_size, (h + 1) * h_size)
        # contract on Dh directly (no explicit transpose of k)
        s = lax.dot_general(q[:, sl], k[:, sl], (((1,), (1,)), ((), ())),
                            preferred_element_type=jnp.float32) * scale + mask
        s = s - jnp.max(s, axis=-1, keepdims=True)
        p = jnp.exp(s)
        p = p * pl.reciprocal(jnp.sum(p, axis=-1, keepdims=True), approx=False)
        oh = jnp.dot(p, v[:, sl], preferred_element_type=jnp.float32)
        ph = jnp.dot(oh, wo[sl, :], preferred_element_type=jnp.float32)
        out = ph if out is None else out + ph
    return out


# -----------------------------------------------------------------------------
# Fused Pallas kernels
# -----------------------------------------------------------------------------

def _enc_block_kernel(seq_ref,                      # scalar prefetch (SMEM)
                      x_ref,
                      ln1g_ref, ln1b_ref, wqkv_ref, bqkv_ref, wo_ref, bo_ref,
                      ln2g_ref, ln2b_ref, w1_ref, b1_ref, w2_ref, b2_ref,
                      o_ref, *, n_head, h_size):
    """One fused pre-LN encoder block for a single batch element."""
    b = pl.program_id(0)
    T = x_ref.shape[1]
    HD = n_head * h_size
    scale = 1.0 / math.sqrt(h_size)

    x = x_ref[0]                                        # (T, E)
    mask = _key_pad_mask(seq_ref[b], T, T)              # built from SMEM scalar

    # --- self attention ---
    h = _ln(x, ln1g_ref[...], ln1b_ref[...])
    qkv = jnp.dot(h, wqkv_ref[...],
                  preferred_element_type=jnp.float32) + bqkv_ref[...]
    q, k, v = qkv[:, :HD], qkv[:, HD:2 * HD], qkv[:, 2 * HD:]
    att = _mha_block(q, k, v, mask, wo_ref[...], n_head, h_size, scale)
    x = x + att + bo_ref[...]

    # --- feed forward ---
    h = _ln(x, ln2g_ref[...], ln2b_ref[...])
    f = jnp.maximum(jnp.dot(h, w1_ref[...],
                            preferred_element_type=jnp.float32) + b1_ref[...], 0.0)
    x = x + jnp.dot(f, w2_ref[...],
                    preferred_element_type=jnp.float32) + b2_ref[...]

    o_ref[0] = x


def _dec_block_kernel(dseq_ref, eseq_ref,             # scalar prefetch (SMEM)
                      x_ref, ex_ref,
                      ln1g_ref, ln1b_ref, sa_wqkv_ref, sa_bqkv_ref,
                      sa_wo_ref, sa_bo_ref,
                      ln2g_ref, ln2b_ref, ca_wq_ref, ca_bq_ref,
                      ca_wkv_ref, ca_bkv_ref, ca_wo_ref, ca_bo_ref,
                      ln3g_ref, ln3b_ref, w1_ref, b1_ref, w2_ref, b2_ref,
                      o_ref, *, n_head, h_size):
    """One fused pre-LN decoder block (self-attn + cross-attn + FFN)."""
    b = pl.program_id(0)
    T = x_ref.shape[1]
    Te = ex_ref.shape[1]
    HD = n_head * h_size
    scale = 1.0 / math.sqrt(h_size)

    x = x_ref[0]                                        # (T,  E)
    ex = ex_ref[0]                                      # (Te, E)
    smask = _causal_pad_mask(dseq_ref[b], T)            # (T, T)
    cmask = _key_pad_mask(eseq_ref[b], T, Te)           # (T, Te)

    # --- masked self attention ---
    h = _ln(x, ln1g_ref[...], ln1b_ref[...])
    qkv = jnp.dot(h, sa_wqkv_ref[...],
                  preferred_element_type=jnp.float32) + sa_bqkv_ref[...]
    q, k, v = qkv[:, :HD], qkv[:, HD:2 * HD], qkv[:, 2 * HD:]
    att = _mha_block(q, k, v, smask, sa_wo_ref[...], n_head, h_size, scale)
    x = x + att + sa_bo_ref[...]

    # --- cross attention (keys/values from encoder output) ---
    h = _ln(x, ln2g_ref[...], ln2b_ref[...])
    q = jnp.dot(h, ca_wq_ref[...],
                preferred_element_type=jnp.float32) + ca_bq_ref[...]
    kv = jnp.dot(ex, ca_wkv_ref[...],
                 preferred_element_type=jnp.float32) + ca_bkv_ref[...]
    k, v = kv[:, :HD], kv[:, HD:]
    att = _mha_block(q, k, v, cmask, ca_wo_ref[...], n_head, h_size, scale)
    x = x + att + ca_bo_ref[...]

    # --- feed forward ---
    h = _ln(x, ln3g_ref[...], ln3b_ref[...])
    f = jnp.maximum(jnp.dot(h, w1_ref[...],
                            preferred_element_type=jnp.float32) + b1_ref[...], 0.0)
    x = x + jnp.dot(f, w2_ref[...],
                    preferred_element_type=jnp.float32) + b2_ref[...]

    o_ref[0] = x


def _layernorm_kernel(x_ref, g_ref, b_ref, o_ref):
    """Stand-alone LayerNorm (encoder final norm)."""
    o_ref[0] = _ln(x_ref[0], g_ref[...], b_ref[...])


def _dec_final_kernel(x_ref, g_ref, b_ref, emb_ref, fcb_ref, o_ref):
    """Decoder final LN + tied output projection (contract over E, no emb.T copy)."""
    h = _ln(x_ref[0], g_ref[...], b_ref[...])                       # (T, E)
    o_ref[0] = lax.dot_general(h, emb_ref[...], (((1,), (1,)), ((), ())),
                               preferred_element_type=jnp.float32) + fcb_ref[...]


# -----------------------------------------------------------------------------
# pallas_call wrappers
# -----------------------------------------------------------------------------

def _wspec(shape):
    """Full-array weight block, constant across the batch grid."""
    return pl.BlockSpec(shape, lambda *_: (0,) * len(shape))


def encoder_block(x, seq_len, blk, n_head, h_size):
    B, T, E = x.shape
    HD = n_head * h_size
    F = blk["ffn"]["w1"].shape[1]
    at, ff = blk["attn"], blk["ffn"]
    kernel = functools.partial(_enc_block_kernel, n_head=n_head, h_size=h_size)

    grid_spec = pltpu.PrefetchScalarGridSpec(
        num_scalar_prefetch=1,
        grid=(B,),
        in_specs=[
            pl.BlockSpec((1, T, E), lambda b, *_: (b, 0, 0)),
            _wspec((1, E)), _wspec((1, E)),
            _wspec((E, 3 * HD)), _wspec((1, 3 * HD)),
            _wspec((HD, E)), _wspec((1, E)),
            _wspec((1, E)), _wspec((1, E)),
            _wspec((E, F)), _wspec((1, F)),
            _wspec((F, E)), _wspec((1, E)),
        ],
        out_specs=pl.BlockSpec((1, T, E), lambda b, *_: (b, 0, 0)),
    )
    return pl.pallas_call(
        kernel,
        out_shape=jax.ShapeDtypeStruct((B, T, E), jnp.float32),
        grid_spec=grid_spec,
        compiler_params=pltpu.CompilerParams(dimension_semantics=("parallel",)),
    )(seq_len, x,
      blk["ln1_g"].reshape(1, E), blk["ln1_b"].reshape(1, E),
      at["wqkv"], at["bqkv"].reshape(1, 3 * HD),
      at["wo"], at["bo"].reshape(1, E),
      blk["ln2_g"].reshape(1, E), blk["ln2_b"].reshape(1, E),
      ff["w1"], ff["b1"].reshape(1, F),
      ff["w2"], ff["b2"].reshape(1, E))


def decoder_block(x, e_x, d_seq_len, e_seq_len, blk, n_head, h_size):
    B, T, E = x.shape
    Te = e_x.shape[1]
    HD = n_head * h_size
    F = blk["ffn"]["w1"].shape[1]
    sa, ca, ff = blk["self_attn"], blk["cross_attn"], blk["ffn"]
    kernel = functools.partial(_dec_block_kernel, n_head=n_head, h_size=h_size)

    grid_spec = pltpu.PrefetchScalarGridSpec(
        num_scalar_prefetch=2,
        grid=(B,),
        in_specs=[
            pl.BlockSpec((1, T, E), lambda b, *_: (b, 0, 0)),
            pl.BlockSpec((1, Te, E), lambda b, *_: (b, 0, 0)),
            _wspec((1, E)), _wspec((1, E)),
            _wspec((E, 3 * HD)), _wspec((1, 3 * HD)), _wspec((HD, E)), _wspec((1, E)),
            _wspec((1, E)), _wspec((1, E)),
            _wspec((E, HD)), _wspec((1, HD)), _wspec((E, 2 * HD)), _wspec((1, 2 * HD)),
            _wspec((HD, E)), _wspec((1, E)),
            _wspec((1, E)), _wspec((1, E)),
            _wspec((E, F)), _wspec((1, F)), _wspec((F, E)), _wspec((1, E)),
        ],
        out_specs=pl.BlockSpec((1, T, E), lambda b, *_: (b, 0, 0)),
    )
    return pl.pallas_call(
        kernel,
        out_shape=jax.ShapeDtypeStruct((B, T, E), jnp.float32),
        grid_spec=grid_spec,
        compiler_params=pltpu.CompilerParams(dimension_semantics=("parallel",)),
    )(d_seq_len, e_seq_len, x, e_x,
      blk["ln1_g"].reshape(1, E), blk["ln1_b"].reshape(1, E),
      sa["wqkv"], sa["bqkv"].reshape(1, 3 * HD), sa["wo"], sa["bo"].reshape(1, E),
      blk["ln2_g"].reshape(1, E), blk["ln2_b"].reshape(1, E),
      ca["wq"], ca["bq"].reshape(1, HD), ca["wkv"], ca["bkv"].reshape(1, 2 * HD),
      ca["wo"], ca["bo"].reshape(1, E),
      blk["ln3_g"].reshape(1, E), blk["ln3_b"].reshape(1, E),
      ff["w1"], ff["b1"].reshape(1, F), ff["w2"], ff["b2"].reshape(1, E))


def layernorm(x, g, b):
    B, T, E = x.shape
    return pl.pallas_call(
        _layernorm_kernel,
        out_shape=jax.ShapeDtypeStruct((B, T, E), jnp.float32),
        grid=(B,),
        in_specs=[pl.BlockSpec((1, T, E), lambda i: (i, 0, 0)),
                  pl.BlockSpec((1, E), lambda i: (0, 0)),
                  pl.BlockSpec((1, E), lambda i: (0, 0))],
        out_specs=pl.BlockSpec((1, T, E), lambda i: (i, 0, 0)),
        compiler_params=pltpu.CompilerParams(dimension_semantics=("parallel",)),
    )(x, g.reshape(1, E), b.reshape(1, E))


def decoder_final(x, g, b, emb, fc_b):
    B, T, E = x.shape
    V = emb.shape[0]
    return pl.pallas_call(
        _dec_final_kernel,
        out_shape=jax.ShapeDtypeStruct((B, T, V), jnp.float32),
        grid=(B,),
        in_specs=[pl.BlockSpec((1, T, E), lambda i: (i, 0, 0)),
                  pl.BlockSpec((1, E), lambda i: (0, 0)),
                  pl.BlockSpec((1, E), lambda i: (0, 0)),
                  pl.BlockSpec((V, E), lambda i: (0, 0)),
                  pl.BlockSpec((1, V), lambda i: (0, 0))],
        out_specs=pl.BlockSpec((1, T, V), lambda i: (i, 0, 0)),
        compiler_params=pltpu.CompilerParams(dimension_semantics=("parallel",)),
    )(x, g.reshape(1, E), b.reshape(1, E), emb, fc_b.reshape(1, V))


# -----------------------------------------------------------------------------
# Model glue (embedding gather + positional add in plain JAX)
# -----------------------------------------------------------------------------

def encoder_fwd(params, cfg, idx, seq_len):
    B, T = idx.shape
    E = cfg["n_emb"]
    # TODO(synk): random-index embedding gather is done with jnp.take in XLA;
    # at this scale there is no benefit to a Pallas DMA-gather kernel.
    x = jnp.take(params["tok_emb"], idx, axis=0) * math.sqrt(E)
    x = x + params["enc_pos"][:T][None, :, :]
    for blk in params["enc_blocks"]:
        x = encoder_block(x, seq_len, blk, cfg["n_head"], cfg["h_size"])
    return layernorm(x, params["enc_lnf_g"], params["enc_lnf_b"])


def decoder_fwd(params, cfg, d_idx, d_seq_len, e_x, e_seq_len):
    B, T = d_idx.shape
    E = cfg["n_emb"]
    x = jnp.take(params["tok_emb"], d_idx, axis=0) * math.sqrt(E)
    x = x + params["dec_pos"][:T][None, :, :]
    for blk in params["dec_blocks"]:
        x = decoder_block(x, e_x, d_seq_len, e_seq_len, blk,
                          cfg["n_head"], cfg["h_size"])
    # Tied output projection (decoder.fc.weight = tok_emb.weight), as in the
    # reference model -- logits width is the (shared) embedding vocab size.
    return decoder_final(x, params["dec_lnf_g"], params["dec_lnf_b"],
                         params["tok_emb"], params["fc_b"])


def bialinguanet_forward(params, cfg, e_idx, d_idx, e_seq_len, d_seq_len):
    e_x = encoder_fwd(params, cfg, e_idx, e_seq_len)
    return decoder_fwd(params, cfg, d_idx, d_seq_len, e_x, e_seq_len)


# -----------------------------------------------------------------------------
# Deterministic parameter init (xavier for matrices, normal(0, n_emb^-0.5)
# for the tied token embedding; biases zero).
# -----------------------------------------------------------------------------

def _xavier(key, shape):
    bound = math.sqrt(6.0 / (shape[0] + shape[1]))
    return jax.random.uniform(key, shape, jnp.float32, -bound, bound)


def init_params(key, cfg):
    E = cfg["n_emb"]
    H = cfg["n_head"]
    Dh = cfg["h_size"]
    HD = H * Dh
    F = cfg["exp_fac"] * E
    V = cfg["ev_size"]       # tied embedding vocab (shared with decoder)
    L = cfg["max_seq_len"]

    keys = iter(jax.random.split(key, 512))

    def fused_self_attn():
        wq = _xavier(next(keys), (E, HD))
        wk = _xavier(next(keys), (E, HD))
        wv = _xavier(next(keys), (E, HD))
        return {"wqkv": jnp.concatenate([wq, wk, wv], axis=1),
                "bqkv": jnp.zeros((3 * HD,), jnp.float32),
                "wo": _xavier(next(keys), (HD, E)),
                "bo": jnp.zeros((E,), jnp.float32)}

    def fused_cross_attn():
        wq = _xavier(next(keys), (E, HD))
        wk = _xavier(next(keys), (E, HD))
        wv = _xavier(next(keys), (E, HD))
        return {"wq": wq, "bq": jnp.zeros((HD,), jnp.float32),
                "wkv": jnp.concatenate([wk, wv], axis=1),
                "bkv": jnp.zeros((2 * HD,), jnp.float32),
                "wo": _xavier(next(keys), (HD, E)),
                "bo": jnp.zeros((E,), jnp.float32)}

    def ffn_params():
        return {"w1": _xavier(next(keys), (E, F)), "b1": jnp.zeros((F,), jnp.float32),
                "w2": _xavier(next(keys), (F, E)), "b2": jnp.zeros((E,), jnp.float32)}

    params = {
        "tok_emb": jax.random.normal(next(keys), (V, E), jnp.float32) * (E ** -0.5),
        "enc_pos": _xavier(next(keys), (L, E)),
        "dec_pos": _xavier(next(keys), (L, E)),
        "enc_blocks": [],
        "dec_blocks": [],
        "enc_lnf_g": jnp.ones((E,), jnp.float32),
        "enc_lnf_b": jnp.zeros((E,), jnp.float32),
        "dec_lnf_g": jnp.ones((E,), jnp.float32),
        "dec_lnf_b": jnp.zeros((E,), jnp.float32),
        "fc_b": jnp.zeros((V,), jnp.float32),
    }
    for _ in range(cfg["n_block"]):
        params["enc_blocks"].append({
            "ln1_g": jnp.ones((E,), jnp.float32), "ln1_b": jnp.zeros((E,), jnp.float32),
            "ln2_g": jnp.ones((E,), jnp.float32), "ln2_b": jnp.zeros((E,), jnp.float32),
            "attn": fused_self_attn(),
            "ffn": ffn_params(),
        })
    for _ in range(cfg["n_block"]):
        params["dec_blocks"].append({
            "ln1_g": jnp.ones((E,), jnp.float32), "ln1_b": jnp.zeros((E,), jnp.float32),
            "ln2_g": jnp.ones((E,), jnp.float32), "ln2_b": jnp.zeros((E,), jnp.float32),
            "ln3_g": jnp.ones((E,), jnp.float32), "ln3_b": jnp.zeros((E,), jnp.float32),
            "self_attn": fused_self_attn(),
            "cross_attn": fused_cross_attn(),
            "ffn": ffn_params(),
        })
    return params


# -----------------------------------------------------------------------------
# main
# -----------------------------------------------------------------------------

if __name__ == "__main__":
    cfg = dict(ev_size=64, dv_size=64, n_emb=32, n_head=4, h_size=8,
               n_block=2, exp_fac=4, max_seq_len=64, d_rate=0.0)

    root = jax.random.PRNGKey(0)
    k_params, k_e, k_d = jax.random.split(root, 3)
    params = init_params(k_params, cfg)

    B, T = 2, 8
    e_idx = jax.random.randint(k_e, (B, T), 0, cfg["ev_size"], dtype=jnp.int32)
    d_idx = jax.random.randint(k_d, (B, T), 0, cfg["dv_size"], dtype=jnp.int32)
    e_seq_len = jnp.array([8, 5], dtype=jnp.int32)
    d_seq_len = jnp.array([8, 6], dtype=jnp.int32)

    fwd = jax.jit(functools.partial(bialinguanet_forward, params, cfg))
    logits = fwd(e_idx, d_idx, e_seq_len, d_seq_len)
    jax.block_until_ready(logits)

    assert logits.shape == (B, T, cfg["dv_size"])
    assert bool(jnp.all(jnp.isfinite(logits)))
    # TODO(synk): beam-search `translate()` / top-k-top-p filtering are inference
    # utilities outside the forward pass and are not implemented as kernels.
    print("KERNEL_OK")
</pallas_src>

<mosaic_0001>
module attributes {stable_mosaic.version = 11 : i64} {
  func.func @_layernorm_kernel(%arg0: i32, %arg1: memref<1x8x32xf32, #tpu.memory_space<vmem>>, %arg2: memref<1x32xf32, #tpu.memory_space<vmem>>, %arg3: memref<1x32xf32, #tpu.memory_space<vmem>>, %arg4: memref<1x8x32xf32, #tpu.memory_space<vmem>>) attributes {dimension_semantics = [#tpu.dimension_semantics<parallel>], iteration_bounds = array<i64: 2>, scalar_prefetch = 0 : i64, scratch_operands = 0 : i64, tpu.core_type = #tpu.core_type<tc>, window_params = [{transform_indices = @transform_0, window_bounds = array<i64: 1, 8, 32>}, {pipeline_mode = #tpu.pipeline_mode<synchronous>, transform_indices = @transform_1, window_bounds = array<i64: 1, 32>}, {pipeline_mode = #tpu.pipeline_mode<synchronous>, transform_indices = @transform_2, window_bounds = array<i64: 1, 32>}, {transform_indices = @transform_3, window_bounds = array<i64: 1, 8, 32>}]} {
    %c0 = arith.constant 0 : index
    %c0_0 = arith.constant 0 : index
    %c0_1 = arith.constant 0 : index
    %0 = vector.load %arg1[%c0, %c0_0, %c0_1] : memref<1x8x32xf32, #tpu.memory_space<vmem>>, vector<1x8x32xf32>
    %1 = vector.shape_cast %0 : vector<1x8x32xf32> to vector<8x32xf32>
    %c0_2 = arith.constant 0 : index
    %c0_3 = arith.constant 0 : index
    %2 = vector.load %arg2[%c0_2, %c0_3] : memref<1x32xf32, #tpu.memory_space<vmem>>, vector<1x32xf32>
    %c0_4 = arith.constant 0 : index
    %c0_5 = arith.constant 0 : index
    %3 = vector.load %arg3[%c0_4, %c0_5] : memref<1x32xf32, #tpu.memory_space<vmem>>, vector<1x32xf32>
    %cst = arith.constant dense<0.000000e+00> : vector<8xf32>
    %4 = vector.multi_reduction <add>, %1, %cst [1] : vector<8x32xf32> to vector<8xf32>
    %5 = vector.shape_cast %4 : vector<8xf32> to vector<8x1xf32>
    %cst_6 = arith.constant 3.200000e+01 : f32
    %6 = vector.broadcast %cst_6 : f32 to vector<8x1xf32>
    %7 = arith.divf %5, %6 : vector<8x1xf32>
    %8 = vector.broadcast %7 : vector<8x1xf32> to vector<8x32xf32>
    %9 = arith.subf %1, %8 : vector<8x32xf32>
    %10 = arith.mulf %9, %9 : vector<8x32xf32>
    %cst_7 = arith.constant dense<0.000000e+00> : vector<8xf32>
    %11 = vector.multi_reduction <add>, %10, %cst_7 [1] : vector<8x32xf32> to vector<8xf32>
    %12 = vector.shape_cast %11 : vector<8xf32> to vector<8x1xf32>
    %cst_8 = arith.constant 3.200000e+01 : f32
    %13 = vector.broadcast %cst_8 : f32 to vector<8x1xf32>
    %14 = arith.divf %12, %13 : vector<8x1xf32>
    %cst_9 = arith.constant 9.99999974E-6 : f32
    %15 = vector.broadcast %cst_9 : f32 to vector<8x1xf32>
    %16 = arith.addf %14, %15 : vector<8x1xf32>
    %17 = math.rsqrt %16 : vector<8x1xf32>
    %18 = vector.broadcast %17 : vector<8x1xf32> to vector<8x32xf32>
    %19 = arith.mulf %9, %18 : vector<8x32xf32>
    %20 = vector.broadcast %2 : vector<1x32xf32> to vector<8x32xf32>
    %21 = arith.mulf %19, %20 : vector<8x32xf32>
    %22 = vector.broadcast %3 : vector<1x32xf32> to vector<8x32xf32>
    %23 = arith.addf %21, %22 : vector<8x32xf32>
    %c0_10 = arith.constant 0 : index
    %c0_11 = arith.constant 0 : index
    %c0_12 = arith.constant 0 : index
    %24 = vector.load %arg4[%c0_10, %c0_11, %c0_12] : memref<1x8x32xf32, #tpu.memory_space<vmem>>, vector<1x8x32xf32>
    %25 = vector.shape_cast %24 : vector<1x8x32xf32> to vector<8x32xf32>
    %26 = vector.shape_cast %23 : vector<8x32xf32> to vector<1x8x32xf32>
    tpu.vector_store %arg4[%c0_10, %c0_11, %c0_12], %26 {strides = array<i32>} : memref<1x8x32xf32, #tpu.memory_space<vmem>>, vector<1x8x32xf32>,
    return
  }
  func.func @transform_0(%arg0: i32) -> (i32, i32, i32) {
    %c0_i32 = arith.constant 0 : i32
    %c0_i32_0 = arith.constant 0 : i32
    %c0_i32_1 = arith.constant 0 : i32
    return %arg0, %c0_i32, %c0_i32_0 : i32, i32, i32
  }
  func.func @transform_1(%arg0: i32) -> (i32, i32) {
    %c0_i32 = arith.constant 0 : i32
    %c0_i32_0 = arith.constant 0 : i32
    %c0_i32_1 = arith.constant 0 : i32
    return %c0_i32, %c0_i32_0 : i32, i32
  }
  func.func @transform_2(%arg0: i32) -> (i32, i32) {
    %c0_i32 = arith.constant 0 : i32
    %c0_i32_0 = arith.constant 0 : i32
    %c0_i32_1 = arith.constant 0 : i32
    return %c0_i32, %c0_i32_0 : i32, i32
  }
  func.func @transform_3(%arg0: i32) -> (i32, i32, i32) {
    %c0_i32 = arith.constant 0 : i32
    %c0_i32_0 = arith.constant 0 : i32
    %c0_i32_1 = arith.constant 0 : i32
    return %arg0, %c0_i32, %c0_i32_0 : i32, i32, i32
  }
}

module attributes {stable_mosaic.version = 11 : i64} {
  func.func @_enc_block_kernel(%arg0: i32, %arg1: memref<2xi32, #tpu.memory_space<smem>>, %arg2: memref<1x8x32xf32, #tpu.memory_space<vmem>>, %arg3: memref<1x32xf32, #tpu.memory_space<vmem>>, %arg4: memref<1x32xf32, #tpu.memory_space<vmem>>, %arg5: memref<32x96xf32, #tpu.memory_space<vmem>>, %arg6: memref<1x96xf32, #tpu.memory_space<vmem>>, %arg7: memref<32x32xf32, #tpu.memory_space<vmem>>, %arg8: memref<1x32xf32, #tpu.memory_space<vmem>>, %arg9: memref<1x32xf32, #tpu.memory_space<vmem>>, %arg10: memref<1x32xf32, #tpu.memory_space<vmem>>, %arg11: memref<32x128xf32, #tpu.memory_space<vmem>>, %arg12: memref<1x128xf32, #tpu.memory_space<vmem>>, %arg13: memref<128x32xf32, #tpu.memory_space<vmem>>, %arg14: memref<1x32xf32, #tpu.memory_space<vmem>>, %arg15: memref<1x8x32xf32, #tpu.memory_space<vmem>>) attributes {dimension_semantics = [#tpu.dimension_semantics<parallel>], iteration_bounds = array<i64: 2>, scalar_prefetch = 1 : i64, scratch_operands = 0 : i64, tpu.core_type = #tpu.core_type<tc>, window_params = [{transform_indices = @transform_0, window_bounds = array<i64: 1, 8, 32>}, {pipeline_mode = #tpu.pipeline_mode<synchronous>, transform_indices = @transform_1, window_bounds = array<i64: 1, 32>}, {pipeline_mode = #tpu.pipeline_mode<synchronous>, transform_indices = @transform_2, window_bounds = array<i64: 1, 32>}, {pipeline_mode = #tpu.pipeline_mode<synchronous>, transform_indices = @transform_3, window_bounds = array<i64: 32, 96>}, {pipeline_mode = #tpu.pipeline_mode<synchronous>, transform_indices = @transform_4, window_bounds = array<i64: 1, 96>}, {pipeline_mode = #tpu.pipeline_mode<synchronous>, transform_indices = @transform_5, window_bounds = array<i64: 32, 32>}, {pipeline_mode = #tpu.pipeline_mode<synchronous>, transform_indices = @transform_6, window_bounds = array<i64: 1, 32>}, {pipeline_mode = #tpu.pipeline_mode<synchronous>, transform_indices = @transform_7, window_bounds = array<i64: 1, 32>}, {pipeline_mode = #tpu.pipeline_mode<synchronous>, transform_indices = @transform_8, window_bounds = array<i64: 1, 32>}, {pipeline_mode = #tpu.pipeline_mode<synchronous>, transform_indices = @transform_9, window_bounds = array<i64: 32, 128>}, {pipeline_mode = #tpu.pipeline_mode<synchronous>, transform_indices = @transform_10, window_bounds = array<i64: 1, 128>}, {pipeline_mode = #tpu.pipeline_mode<synchronous>, transform_indices = @transform_11, window_bounds = array<i64: 128, 32>}, {pipeline_mode = #tpu.pipeline_mode<synchronous>, transform_indices = @transform_12, window_bounds = array<i64: 1, 32>}, {transform_indices = @transform_13, window_bounds = array<i64: 1, 8, 32>}]} {
    %c0 = arith.constant 0 : index
    %c0_0 = arith.constant 0 : index
    %c0_1 = arith.constant 0 : index
    %0 = vector.load %arg2[%c0, %c0_0, %c0_1] : memref<1x8x32xf32, #tpu.memory_space<vmem>>, vector<1x8x32xf32>
    %1 = vector.shape_cast %0 : vector<1x8x32xf32> to vector<8x32xf32>
    %2 = arith.index_cast %arg0 : i32 to index
    %3 = memref.load %arg1[%2] : memref<2xi32, #tpu.memory_space<smem>>
    %4 = tpu.iota {dimensions = array<i32: 1>} : vector<8x8xi32>
    %5 = vector.broadcast %3 : i32 to vector<8x8xi32>
    %6 = arith.cmpi slt, %4, %5 : vector<8x8xi32>
    %cst = arith.constant 0.000000e+00 : f32
    %cst_2 = arith.constant -1.000000e+09 : f32
    %7 = vector.broadcast %cst : f32 to vector<8x8xf32>
    %8 = vector.broadcast %cst_2 : f32 to vector<8x8xf32>
    %9 = arith.select %6, %7, %8 : vector<8x8xi1>, vector<8x8xf32>
    %c0_3 = arith.constant 0 : index
    %c0_4 = arith.constant 0 : index
    %10 = vector.load %arg3[%c0_3, %c0_4] : memref<1x32xf32, #tpu.memory_space<vmem>>, vector<1x32xf32>
    %c0_5 = arith.constant 0 : index
    %c0_6 = arith.constant 0 : index
    %11 = vector.load %arg4[%c0_5, %c0_6] : memref<1x32xf32, #tpu.memory_space<vmem>>, vector<1x32xf32>
    %cst_7 = arith.constant dense<0.000000e+00> : vector<8xf32>
    %12 = vector.multi_reduction <add>, %1, %cst_7 [1] : vector<8x32xf32> to vector<8xf32>
    %13 = vector.shape_cast %12 : vector<8xf32> to vector<8x1xf32>
    %cst_8 = arith.constant 3.200000e+01 : f32
    %14 = vector.broadcast %cst_8 : f32 to vector<8x1xf32>
    %15 = arith.divf %13, %14 : vector<8x1xf32>
    %16 = vector.broadcast %15 : vector<8x1xf32> to vector<8x32xf32>
    %17 = arith.subf %1, %16 : vector<8x32xf32>
    %18 = arith.mulf %17, %17 : vector<8x32xf32>
    %cst_9 = arith.constant dense<0.000000e+00> : vector<8xf32>
    %19 = vector.multi_reduction <add>, %18, %cst_9 [1] : vector<8x32xf32> to vector<8xf32>
    %20 = vector.shape_cast %19 : vector<8xf32> to vector<8x1xf32>
    %cst_10 = arith.constant 3.200000e+01 : f32
    %21 = vector.broadcast %cst_10 : f32 to vector<8x1xf32>
    %22 = arith.divf %20, %21 : vector<8x1xf32>
    %cst_11 = arith.constant 9.99999974E-6 : f32
    %23 = vector.broadcast %cst_11 : f32 to vector<8x1xf32>
    %24 = arith.addf %22, %23 : vector<8x1xf32>
    %25 = math.rsqrt %24 : vector<8x1xf32>
    %26 = vector.broadcast %25 : vector<8x1xf32> to vector<8x32xf32>
    %27 = arith.mulf %17, %26 : vector<8x32xf32>
    %28 = vector.broadcast %10 : vector<1x32xf32> to vector<8x32xf32>
    %29 = arith.mulf %27, %28 : vector<8x32xf32>
    %30 = vector.broadcast %11 : vector<1x32xf32> to vector<8x32xf32>
    %31 = arith.addf %29, %30 : vector<8x32xf32>
    %c0_12 = arith.constant 0 : index
    %c0_13 = arith.constant 0 : index
    %32 = vector.load %arg5[%c0_12, %c0_13] : memref<32x96xf32, #tpu.memory_space<vmem>>, vector<32x96xf32>
    %cst_14 = arith.constant dense<0.000000e+00> : vector<8x96xf32>
    %33 = tpu.matmul %31, %32, %cst_14 {dimension_numbers = #tpu.dot_dimension_numbers<[1], [0], [0], [1], [0, 0, 1, 1], [], []>} : vector<8x32xf32>, vector<32x96xf32>, vector<8x96xf32> -> vector<8x96xf32>
    %c0_15 = arith.constant 0 : index
    %c0_16 = arith.constant 0 : index
    %34 = vector.load %arg6[%c0_15, %c0_16] : memref<1x96xf32, #tpu.memory_space<vmem>>, vector<1x96xf32>
    %35 = vector.broadcast %34 : vector<1x96xf32> to vector<8x96xf32>
    %36 = arith.addf %33, %35 : vector<8x96xf32>
    %37 = vector.extract_strided_slice %36 {offsets = [0, 0], sizes = [8, 32], strides = [1, 1]} : vector<8x96xf32> to vector<8x32xf32>
    %38 = vector.extract_strided_slice %36 {offsets = [0, 32], sizes = [8, 32], strides = [1, 1]} : vector<8x96xf32> to vector<8x32xf32>
    %39 = vector.extract_strided_slice %36 {offsets = [0, 64], sizes = [8, 32], strides = [1, 1]} : vector<8x96xf32> to vector<8x32xf32>
    %c0_17 = arith.constant 0 : index
    %c0_18 = arith.constant 0 : index
    %40 = vector.load %arg7[%c0_17, %c0_18] : memref<32x32xf32, #tpu.memory_space<vmem>>, vector<32x32xf32>
    %41 = vector.extract_strided_slice %37 {offsets = [0, 0], sizes = [8, 8], strides = [1, 1]} : vector<8x32xf32> to vector<8x8xf32>
    %42 = vector.extract_strided_slice %38 {offsets = [0, 0], sizes = [8, 8], strides = [1, 1]} : vector<8x32xf32> to vector<8x8xf32>
    %cst_19 = arith.constant dense<0.000000e+00> : vector<8x8xf32>
    %43 = tpu.matmul %41, %42, %cst_19 {dimension_numbers = #tpu.dot_dimension_numbers<[1], [1], [0], [0], [0, 0, 1, 0], [], []>} : vector<8x8xf32>, vector<8x8xf32>, vector<8x8xf32> -> vector<8x8xf32>
    %cst_20 = arith.constant 0.353553385 : f32
    %44 = vector.broadcast %cst_20 : f32 to vector<8x8xf32>
    %45 = arith.mulf %43, %44 : vector<8x8xf32>
    %46 = arith.addf %45, %9 : vector<8x8xf32>
    %cst_21 = arith.constant dense<0xFF800000> : vector<8xf32>
    %47 = vector.multi_reduction <maximumf>, %46, %cst_21 [1] : vector<8x8xf32> to vector<8xf32>
    %48 = vector.shape_cast %47 : vector<8xf32> to vector<8x1xf32>
    %49 = vector.broadcast %48 : vector<8x1xf32> to vector<8x8xf32>
    %50 = arith.subf %46, %49 : vector<8x8xf32>
    %51 = math.exp %50 : vector<8x8xf32>
    %cst_22 = arith.constant dense<0.000000e+00> : vector<8xf32>
    %52 = vector.multi_reduction <add>, %51, %cst_22 [1] : vector<8x8xf32> to vector<8xf32>
    %53 = vector.shape_cast %52 : vector<8xf32> to vector<8x1xf32>
    %54 = tpu.reciprocal %53 : vector<8x1xf32> -> vector<8x1xf32>
    %55 = vector.broadcast %54 : vector<8x1xf32> to vector<8x8xf32>
    %56 = arith.mulf %51, %55 : vector<8x8xf32>
    %57 = vector.extract_strided_slice %39 {offsets = [0, 0], sizes = [8, 8], strides = [1, 1]} : vector<8x32xf32> to vector<8x8xf32>
    %cst_23 = arith.constant dense<0.000000e+00> : vector<8x8xf32>
    %58 = tpu.matmul %56, %57, %cst_23 {dimension_numbers = #tpu.dot_dimension_numbers<[1], [0], [0], [1], [0, 0, 1, 1], [], []>} : vector<8x8xf32>, vector<8x8xf32>, vector<8x8xf32> -> vector<8x8xf32>
    %59 = vector.extract_strided_slice %40 {offsets = [0, 0], sizes = [8, 32], strides = [1, 1]} : vector<32x32xf32> to vector<8x32xf32>
    %cst_24 = arith.constant dense<0.000000e+00> : vector<8x32xf32>
    %60 = tpu.matmul %58, %59, %cst_24 {dimension_numbers = #tpu.dot_dimension_numbers<[1], [0], [0], [1], [0, 0, 1, 1], [], []>} : vector<8x8xf32>, vector<8x32xf32>, vector<8x32xf32> -> vector<8x32xf32>
    %61 = vector.extract_strided_slice %37 {offsets = [0, 8], sizes = [8, 8], strides = [1, 1]} : vector<8x32xf32> to vector<8x8xf32>
    %62 = vector.extract_strided_slice %38 {offsets = [0, 8], sizes = [8, 8], strides = [1, 1]} : vector<8x32xf32> to vector<8x8xf32>
    %cst_25 = arith.constant dense<0.000000e+00> : vector<8x8xf32>
    %63 = tpu.matmul %61, %62, %cst_25 {dimension_numbers = #tpu.dot_dimension_numbers<[1], [1], [0], [0], [0, 0, 1, 0], [], []>} : vector<8x8xf32>, vector<8x8xf32>, vector<8x8xf32> -> vector<8x8xf32>
    %cst_26 = arith.constant 0.353553385 : f32
    %64 = vector.broadcast %cst_26 : f32 to vector<8x8xf32>
    %65 = arith.mulf %63, %64 : vector<8x8xf32>
    %66 = arith.addf %65, %9 : vector<8x8xf32>
    %cst_27 = arith.constant dense<0xFF800000> : vector<8xf32>
    %67 = vector.multi_reduction <maximumf>, %66, %cst_27 [1] : vector<8x8xf32> to vector<8xf32>
    %68 = vector.shape_cast %67 : vector<8xf32> to vector<8x1xf32>
    %69 = vector.broadcast %68 : vector<8x1xf32> to vector<8x8xf32>
    %70 = arith.subf %66, %69 : vector<8x8xf32>
    %71 = math.exp %70 : vector<8x8xf32>
    %cst_28 = arith.constant dense<0.000000e+00> : vector<8xf32>
    %72 = vector.multi_reduction <add>, %71, %cst_28 [1] : vector<8x8xf32> to vector<8xf32>
    %73 = vector.shape_cast %72 : vector<8xf32> to vector<8x1xf32>
    %74 = tpu.reciprocal %73 : vector<8x1xf32> -> vector<8x1xf32>
    %75 = vector.broadcast %74 : vector<8x1xf32> to vector<8x8xf32>
    %76 = arith.mulf %71, %75 : vector<8x8xf32>
    %77 = vector.extract_strided_slice %39 {offsets = [0, 8], sizes = [8, 8], strides = [1, 1]} : vector<8x32xf32> to vector<8x8xf32>
    %cst_29 = arith.constant dense<0.000000e+00> : vector<8x8xf32>
    %78 = tpu.matmul %76, %77, %cst_29 {dimension_numbers = #tpu.dot_dimension_numbers<[1], [0], [0], [1], [0, 0, 1, 1], [], []>} : vector<8x8xf32>, vector<8x8xf32>, vector<8x8xf32> -> vector<8x8xf32>
    %79 = vector.extract_strided_slice %40 {offsets = [8, 0], sizes = [8, 32], strides = [1, 1]} : vector<32x32xf32> to vector<8x32xf32>
    %cst_30 = arith.constant dense<0.000000e+00> : vector<8x32xf32>
    %80 = tpu.matmul %78, %79, %cst_30 {dimension_numbers = #tpu.dot_dimension_numbers<[1], [0], [0], [1], [0, 0, 1, 1], [], []>} : vector<8x8xf32>, vector<8x32xf32>, vector<8x32xf32> -> vector<8x32xf32>
    %81 = arith.addf %60, %80 : vector<8x32xf32>
    %82 = vector.extract_strided_slice %37 {offsets = [0, 16], sizes = [8, 8], strides = [1, 1]} : vector<8x32xf32> to vector<8x8xf32>
    %83 = vector.extract_strided_slice %38 {offsets = [0, 16], sizes = [8, 8], strides = [1, 1]} : vector<8x32xf32> to vector<8x8xf32>
    %cst_31 = arith.constant dense<0.000000e+00> : vector<8x8xf32>
    %84 = tpu.matmul %82, %83, %cst_31 {dimension_numbers = #tpu.dot_dimension_numbers<[1], [1], [0], [0], [0, 0, 1, 0], [], []>} : vector<8x8xf32>, vector<8x8xf32>, vector<8x8xf32> -> vector<8x8xf32>
    %cst_32 = arith.constant 0.353553385 : f32
    %85 = vector.broadcast %cst_32 : f32 to vector<8x8xf32>
    %86 = arith.mulf %84, %85 : vector<8x8xf32>
    %87 = arith.addf %86, %9 : vector<8x8xf32>
    %cst_33 = arith.constant dense<0xFF800000> : vector<8xf32>
    %88 = vector.multi_reduction <maximumf>, %87, %cst_33 [1] : vector<8x8xf32> to vector<8xf32>
    %89 = vector.shape_cast %88 : vector<8xf32> to vector<8x1xf32>
    %90 = vector.broadcast %89 : vector<8x1xf32> to vector<8x8xf32>
    %91 = arith.subf %87, %90 : vector<8x8xf32>
    %92 = math.exp %91 : vector<8x8xf32>
    %cst_34 = arith.constant dense<0.000000e+00> : vector<8xf32>
    %93 = vector.multi_reduction <add>, %92, %cst_34 [1] : vector<8x8xf32> to vector<8xf32>
    %94 = vector.shape_cast %93 : vector<8xf32> to vector<8x1xf32>
    %95 = tpu.reciprocal %94 : vector<8x1xf32> -> vector<8x1xf32>
    %96 = vector.broadcast %95 : vector<8x1xf32> to vector<8x8xf32>
    %97 = arith.mulf %92, %96 : vector<8x8xf32>
    %98 = vector.extract_strided_slice %39 {offsets = [0, 16], sizes = [8, 8], strides = [1, 1]} : vector<8x32xf32> to vector<8x8xf32>
    %cst_35 = arith.constant dense<0.000000e+00> : vector<8x8xf32>
    %99 = tpu.matmul %97, %98, %cst_35 {dimension_numbers = #tpu.dot_dimension_numbers<[1], [0], [0], [1], [0, 0, 1, 1], [], []>} : vector<8x8xf32>, vector<8x8xf32>, vector<8x8xf32> -> vector<8x8xf32>
    %100 = vector.extract_strided_slice %40 {offsets = [16, 0], sizes = [8, 32], strides = [1, 1]} : vector<32x32xf32> to vector<8x32xf32>
    %cst_36 = arith.constant dense<0.000000e+00> : vector<8x32xf32>
    %101 = tpu.matmul %99, %100, %cst_36 {dimension_numbers = #tpu.dot_dimension_numbers<[1], [0], [0], [1], [0, 0, 1, 1], [], []>} : vector<8x8xf32>, vector<8x32xf32>, vector<8x32xf32> -> vector<8x32xf32>
    %102 = arith.addf %81, %101 : vector<8x32xf32>
    %103 = vector.extract_strided_slice %37 {offsets = [0, 24], sizes = [8, 8], strides = [1, 1]} : vector<8x32xf32> to vector<8x8xf32>
    %104 = vector.extract_strided_slice %38 {offsets = [0, 24], sizes = [8, 8], strides = [1, 1]} : vector<8x32xf32> to vector<8x8xf32>
    %cst_37 = arith.constant dense<0.000000e+00> : vector<8x8xf32>
    %105 = tpu.matmul %103, %104, %cst_37 {dimension_numbers = #tpu.dot_dimension_numbers<[1], [1], [0], [0], [0, 0, 1, 0], [], []>} : vector<8x8xf32>, vector<8x8xf32>, vector<8x8xf32> -> vector<8x8xf32>
    %cst_38 = arith.constant 0.353553385 : f32
    %106 = vector.broadcast %cst_38 : f32 to vector<8x8xf32>
    %107 = arith.mulf %105, %106 : vector<8x8xf32>
    %108 = arith.addf %107, %9 : vector<8x8xf32>
    %cst_39 = arith.constant dense<0xFF800000> : vector<8xf32>
    %109 = vector.multi_reduction <maximumf>, %108, %cst_39 [1] : vector<8x8xf32> to vector<8xf32>
    %110 = vector.shape_cast %109 : vector<8xf32> to vector<8x1xf32>
    %111 = vector.broadcast %110 : vector<8x1xf32> to vector<8x8xf32>
    %112 = arith.subf %108, %111 : vector<8x8xf32>
    %113 = math.exp %112 : vector<8x8xf32>
    %cst_40 = arith.constant dense<0.000000e+00> : vector<8xf32>
    %114 = vector.multi_reduction <add>, %113, %cst_40 [1] : vector<8x8xf32> to vector<8xf32>
    %115 = vector.shape_cast %114 : vector<8xf32> to vector<8x1xf32>
    %116 = tpu.reciprocal %115 : vector<8x1xf32> -> vector<8x1xf32>
    %117 = vector.broadcast %116 : vector<8x1xf32> to vector<8x8xf32>
    %118 = arith.mulf %113, %117 : vector<8x8xf32>
    %119 = vector.extract_strided_slice %39 {offsets = [0, 24], sizes = [8, 8], strides = [1, 1]} : vector<8x32xf32> to vector<8x8xf32>
    %cst_41 = arith.constant dense<0.000000e+00> : vector<8x8xf32>
    %120 = tpu.matmul %118, %119, %cst_41 {dimension_numbers = #tpu.dot_dimension_numbers<[1], [0], [0], [1], [0, 0, 1, 1], [], []>} : vector<8x8xf32>, vector<8x8xf32>, vector<8x8xf32> -> vector<8x8xf32>
    %121 = vector.extract_strided_slice %40 {offsets = [24, 0], sizes = [8, 32], strides = [1, 1]} : vector<32x32xf32> to vector<8x32xf32>
    %cst_42 = arith.constant dense<0.000000e+00> : vector<8x32xf32>
    %122 = tpu.matmul %120, %121, %cst_42 {dimension_numbers = #tpu.dot_dimension_numbers<[1], [0], [0], [1], [0, 0, 1, 1], [], []>} : vector<8x8xf32>, vector<8x32xf32>, vector<8x32xf32> -> vector<8x32xf32>
    %123 = arith.addf %102, %122 : vector<8x32xf32>
    %124 = arith.addf %1, %123 : vector<8x32xf32>
    %c0_43 = arith.constant 0 : index
    %c0_44 = arith.constant 0 : index
    %125 = vector.load %arg8[%c0_43, %c0_44] : memref<1x32xf32, #tpu.memory_space<vmem>>, vector<1x32xf32>
    %126 = vector.broadcast %125 : vector<1x32xf32> to vector<8x32xf32>
    %127 = arith.addf %124, %126 : vector<8x32xf32>
    %c0_45 = arith.constant 0 : index
    %c0_46 = arith.constant 0 : index
    %128 = vector.load %arg9[%c0_45, %c0_46] : memref<1x32xf32, #tpu.memory_space<vmem>>, vector<1x32xf32>
    %c0_47 = arith.constant 0 : index
    %c0_48 = arith.constant 0 : index
    %129 = vector.load %arg10[%c0_47, %c0_48] : memref<1x32xf32, #tpu.memory_space<vmem>>, vector<1x32xf32>
    %cst_49 = arith.constant dense<0.000000e+00> : vector<8xf32>
    %130 = vector.multi_reduction <add>, %127, %cst_49 [1] : vector<8x32xf32> to vector<8xf32>
    %131 = vector.shape_cast %130 : vector<8xf32> to vector<8x1xf32>
    %cst_50 = arith.constant 3.200000e+01 : f32
    %132 = vector.broadcast %cst_50 : f32 to vector<8x1xf32>
    %133 = arith.divf %131, %132 : vector<8x1xf32>
    %134 = vector.broadcast %133 : vector<8x1xf32> to vector<8x32xf32>
    %135 = arith.subf %127, %134 : vector<8x32xf32>
    %136 = arith.mulf %135, %135 : vector<8x32xf32>
    %cst_51 = arith.constant dense<0.000000e+00> : vector<8xf32>
    %137 = vector.multi_reduction <add>, %136, %cst_51 [1] : vector<8x32xf32> to vector<8xf32>
    %138 = vector.shape_cast %137 : vector<8xf32> to vector<8x1xf32>
    %cst_52 = arith.constant 3.200000e+01 : f32
    %139 = vector.broadcast %cst_52 : f32 to vector<8x1xf32>
    %140 = arith.divf %138, %139 : vector<8x1xf32>
    %cst_53 = arith.constant 9.99999974E-6 : f32
    %141 = vector.broadcast %cst_53 : f32 to vector<8x1xf32>
    %142 = arith.addf %140, %141 : vector<8x1xf32>
    %143 = math.rsqrt %142 : vector<8x1xf32>
    %144 = vector.broadcast %143 : vector<8x1xf32> to vector<8x32xf32>
    %145 = arith.mulf %135, %144 : vector<8x32xf32>
    %146 = vector.broadcast %128 : vector<1x32xf32> to vector<8x32xf32>
    %147 = arith.mulf %145, %146 : vector<8x32xf32>
    %148 = vector.broadcast %129 : vector<1x32xf32> to vector<8x32xf32>
    %149 = arith.addf %147, %148 : vector<8x32xf32>
    %c0_54 = arith.constant 0 : index
    %c0_55 = arith.constant 0 : index
    %150 = vector.load %arg11[%c0_54, %c0_55] : memref<32x128xf32, #tpu.memory_space<vmem>>, vector<32x128xf32>
    %cst_56 = arith.constant dense<0.000000e+00> : vector<8x128xf32>
    %151 = tpu.matmul %149, %150, %cst_56 {dimension_numbers = #tpu.dot_dimension_numbers<[1], [0], [0], [1], [0, 0, 1, 1], [], []>} : vector<8x32xf32>, vector<32x128xf32>, vector<8x128xf32> -> vector<8x128xf32>
    %c0_57 = arith.constant 0 : index
    %c0_58 = arith.constant 0 : index
    %152 = vector.load %arg12[%c0_57, %c0_58] : memref<1x128xf32, #tpu.memory_space<vmem>>, vector<1x128xf32>
    %153 = vector.broadcast %152 : vector<1x128xf32> to vector<8x128xf32>
    %154 = arith.addf %151, %153 : vector<8x128xf32>
    %cst_59 = arith.constant 0.000000e+00 : f32
    %155 = vector.broadcast %cst_59 : f32 to vector<8x128xf32>
    %156 = arith.maximumf %154, %155 : vector<8x128xf32>
    %c0_60 = arith.constant 0 : index
    %c0_61 = arith.constant 0 : index
    %157 = vector.load %arg13[%c0_60, %c0_61] : memref<128x32xf32, #tpu.memory_space<vmem>>, vector<128x32xf32>
    %cst_62 = arith.constant dense<0.000000e+00> : vector<8x32xf32>
    %158 = tpu.matmul %156, %157, %cst_62 {dimension_numbers = #tpu.dot_dimension_numbers<[1], [0], [0], [1], [0, 0, 1, 1], [], []>} : vector<8x128xf32>, vector<128x32xf32>, vector<8x32xf32> -> vector<8x32xf32>
    %159 = arith.addf %127, %158 : vector<8x32xf32>
    %c0_63 = arith.constant 0 : index
    %c0_64 = arith.constant 0 : index
    %160 = vector.load %arg14[%c0_63, %c0_64] : memref<1x32xf32, #tpu.memory_space<vmem>>, vector<1x32xf32>
    %161 = vector.broadcast %160 : vector<1x32xf32> to vector<8x32xf32>
    %162 = arith.addf %159, %161 : vector<8x32xf32>
    %c0_65 = arith.constant 0 : index
    %c0_66 = arith.constant 0 : index
    %c0_67 = arith.constant 0 : index
    %163 = vector.load %arg15[%c0_65, %c0_66, %c0_67] : memref<1x8x32xf32, #tpu.memory_space<vmem>>, vector<1x8x32xf32>
    %164 = vector.shape_cast %163 : vector<1x8x32xf32> to vector<8x32xf32>
    %165 = vector.shape_cast %162 : vector<8x32xf32> to vector<1x8x32xf32>
    tpu.vector_store %arg15[%c0_65, %c0_66, %c0_67], %165 {strides = array<i32>} : memref<1x8x32xf32, #tpu.memory_space<vmem>>, vector<1x8x32xf32>,
    return
  }
  func.func @transform_0(%arg0: i32, %arg1: memref<2xi32, #tpu.memory_space<smem>>) -> (i32, i32, i32) {
    %c0_i32 = arith.constant 0 : i32
    %c0_i32_0 = arith.constant 0 : i32
    %c0_i32_1 = arith.constant 0 : i32
    return %arg0, %c0_i32, %c0_i32_0 : i32, i32, i32
  }
  func.func @transform_1(%arg0: i32, %arg1: memref<2xi32, #tpu.memory_space<smem>>) -> (i32, i32) {
    %c0_i32 = arith.constant 0 : i32
    %c0_i32_0 = arith.constant 0 : i32
    %c0_i32_1 = arith.constant 0 : i32
    return %c0_i32, %c0_i32_0 : i32, i32
  }
  func.func @transform_2(%arg0: i32, %arg1: memref<2xi32, #tpu.memory_space<smem>>) -> (i32, i32) {
    %c0_i32 = arith.constant 0 : i32
    %c0_i32_0 = arith.constant 0 : i32
    %c0_i32_1 = arith.constant 0 : i32
    return %c0_i32, %c0_i32_0 : i32, i32
  }
  func.func @transform_3(%arg0: i32, %arg1: memref<2xi32, #tpu.memory_space<smem>>) -> (i32, i32) {
    %c0_i32 = arith.constant 0 : i32
    %c0_i32_0 = arith.constant 0 : i32
    %c0_i32_1 = arith.constant 0 : i32
    return %c0_i32, %c0_i32_0 : i32, i32
  }
  func.func @transform_4(%arg0: i32, %arg1: memref<2xi32, #tpu.memory_space<smem>>) -> (i32, i32) {
    %c0_i32 = arith.constant 0 : i32
    %c0_i32_0 = arith.constant 0 : i32
    %c0_i32_1 = arith.constant 0 : i32
    return %c0_i32, %c0_i32_0 : i32, i32
  }
  func.func @transform_5(%arg0: i32, %arg1: memref<2xi32, #tpu.memory_space<smem>>) -> (i32, i32) {
    %c0_i32 = arith.constant 0 : i32
    %c0_i32_0 = arith.constant 0 : i32
    %c0_i32_1 = arith.constant 0 : i32
    return %c0_i32, %c0_i32_0 : i32, i32
  }
  func.func @transform_6(%arg0: i32, %arg1: memref<2xi32, #tpu.memory_space<smem>>) -> (i32, i32) {
    %c0_i32 = arith.constant 0 : i32
    %c0_i32_0 = arith.constant 0 : i32
    %c0_i32_1 = arith.constant 0 : i32
    return %c0_i32, %c0_i32_0 : i32, i32
  }
  func.func @transform_7(%arg0: i32, %arg1: memref<2xi32, #tpu.memory_space<smem>>) -> (i32, i32) {
    %c0_i32 = arith.constant 0 : i32
    %c0_i32_0 = arith.constant 0 : i32
    %c0_i32_1 = arith.constant 0 : i32
    return %c0_i32, %c0_i32_0 : i32, i32
  }
  func.func @transform_8(%arg0: i32, %arg1: memref<2xi32, #tpu.memory_space<smem>>) -> (i32, i32) {
    %c0_i32 = arith.constant 0 : i32
    %c0_i32_0 = arith.constant 0 : i32
    %c0_i32_1 = arith.constant 0 : i32
    return %c0_i32, %c0_i32_0 : i32, i32
  }
  func.func @transform_9(%arg0: i32, %arg1: memref<2xi32, #tpu.memory_space<smem>>) -> (i32, i32) {
    %c0_i32 = arith.constant 0 : i32
    %c0_i32_0 = arith.constant 0 : i32
    %c0_i32_1 = arith.constant 0 : i32
    return %c0_i32, %c0_i32_0 : i32, i32
  }
  func.func @transform_10(%arg0: i32, %arg1: memref<2xi32, #tpu.memory_space<smem>>) -> (i32, i32) {
    %c0_i32 = arith.constant 0 : i32
    %c0_i32_0 = arith.constant 0 : i32
    %c0_i32_1 = arith.constant 0 : i32
    return %c0_i32, %c0_i32_0 : i32, i32
  }
  func.func @transform_11(%arg0: i32, %arg1: memref<2xi32, #tpu.memory_space<smem>>) -> (i32, i32) {
    %c0_i32 = arith.constant 0 : i32
    %c0_i32_0 = arith.constant 0 : i32
    %c0_i32_1 = arith.constant 0 : i32
    return %c0_i32, %c0_i32_0 : i32, i32
  }
  func.func @transform_12(%arg0: i32, %arg1: memref<2xi32, #tpu.memory_space<smem>>) -> (i32, i32) {
    %c0_i32 = arith.constant 0 : i32
    %c0_i32_0 = arith.constant 0 : i32
    %c0_i32_1 = arith.constant 0 : i32
    return %c0_i32, %c0_i32_0 : i32, i32
  }
  func.func @transform_13(%arg0: i32, %arg1: memref<2xi32, #tpu.memory_space<smem>>) -> (i32, i32, i32) {
    %c0_i32 = arith.constant 0 : i32
    %c0_i32_0 = arith.constant 0 : i32
    %c0_i32_1 = arith.constant 0 : i32
    return %arg0, %c0_i32, %c0_i32_0 : i32, i32, i32
  }
}

module attributes {stable_mosaic.version = 11 : i64} {
  func.func @_dec_final_kernel(%arg0: i32, %arg1: memref<1x8x32xf32, #tpu.memory_space<vmem>>, %arg2: memref<1x32xf32, #tpu.memory_space<vmem>>, %arg3: memref<1x32xf32, #tpu.memory_space<vmem>>, %arg4: memref<64x32xf32, #tpu.memory_space<vmem>>, %arg5: memref<1x64xf32, #tpu.memory_space<vmem>>, %arg6: memref<1x8x64xf32, #tpu.memory_space<vmem>>) attributes {dimension_semantics = [#tpu.dimension_semantics<parallel>], iteration_bounds = array<i64: 2>, scalar_prefetch = 0 : i64, scratch_operands = 0 : i64, tpu.core_type = #tpu.core_type<tc>, window_params = [{transform_indices = @transform_0, window_bounds = array<i64: 1, 8, 32>}, {pipeline_mode = #tpu.pipeline_mode<synchronous>, transform_indices = @transform_1, window_bounds = array<i64: 1, 32>}, {pipeline_mode = #tpu.pipeline_mode<synchronous>, transform_indices = @transform_2, window_bounds = array<i64: 1, 32>}, {pipeline_mode = #tpu.pipeline_mode<synchronous>, transform_indices = @transform_3, window_bounds = array<i64: 64, 32>}, {pipeline_mode = #tpu.pipeline_mode<synchronous>, transform_indices = @transform_4, window_bounds = array<i64: 1, 64>}, {transform_indices = @transform_5, window_bounds = array<i64: 1, 8, 64>}]} {
    %c0 = arith.constant 0 : index
    %c0_0 = arith.constant 0 : index
    %c0_1 = arith.constant 0 : index
    %0 = vector.load %arg1[%c0, %c0_0, %c0_1] : memref<1x8x32xf32, #tpu.memory_space<vmem>>, vector<1x8x32xf32>
    %1 = vector.shape_cast %0 : vector<1x8x32xf32> to vector<8x32xf32>
    %c0_2 = arith.constant 0 : index
    %c0_3 = arith.constant 0 : index
    %2 = vector.load %arg2[%c0_2, %c0_3] : memref<1x32xf32, #tpu.memory_space<vmem>>, vector<1x32xf32>
    %c0_4 = arith.constant 0 : index
    %c0_5 = arith.constant 0 : index
    %3 = vector.load %arg3[%c0_4, %c0_5] : memref<1x32xf32, #tpu.memory_space<vmem>>, vector<1x32xf32>
    %cst = arith.constant dense<0.000000e+00> : vector<8xf32>
    %4 = vector.multi_reduction <add>, %1, %cst [1] : vector<8x32xf32> to vector<8xf32>
    %5 = vector.shape_cast %4 : vector<8xf32> to vector<8x1xf32>
    %cst_6 = arith.constant 3.200000e+01 : f32
    %6 = vector.broadcast %cst_6 : f32 to vector<8x1xf32>
    %7 = arith.divf %5, %6 : vector<8x1xf32>
    %8 = vector.broadcast %7 : vector<8x1xf32> to vector<8x32xf32>
    %9 = arith.subf %1, %8 : vector<8x32xf32>
    %10 = arith.mulf %9, %9 : vector<8x32xf32>
    %cst_7 = arith.constant dense<0.000000e+00> : vector<8xf32>
    %11 = vector.multi_reduction <add>, %10, %cst_7 [1] : vector<8x32xf32> to vector<8xf32>
    %12 = vector.shape_cast %11 : vector<8xf32> to vector<8x1xf32>
    %cst_8 = arith.constant 3.200000e+01 : f32
    %13 = vector.broadcast %cst_8 : f32 to vector<8x1xf32>
    %14 = arith.divf %12, %13 : vector<8x1xf32>
    %cst_9 = arith.constant 9.99999974E-6 : f32
    %15 = vector.broadcast %cst_9 : f32 to vector<8x1xf32>
    %16 = arith.addf %14, %15 : vector<8x1xf32>
    %17 = math.rsqrt %16 : vector<8x1xf32>
    %18 = vector.broadcast %17 : vector<8x1xf32> to vector<8x32xf32>
    %19 = arith.mulf %9, %18 : vector<8x32xf32>
    %20 = vector.broadcast %2 : vector<1x32xf32> to vector<8x32xf32>
    %21 = arith.mulf %19, %20 : vector<8x32xf32>
    %22 = vector.broadcast %3 : vector<1x32xf32> to vector<8x32xf32>
    %23 = arith.addf %21, %22 : vector<8x32xf32>
    %c0_10 = arith.constant 0 : index
    %c0_11 = arith.constant 0 : index
    %24 = vector.load %arg4[%c0_10, %c0_11] : memref<64x32xf32, #tpu.memory_space<vmem>>, vector<64x32xf32>
    %cst_12 = arith.constant dense<0.000000e+00> : vector<8x64xf32>
    %25 = tpu.matmul %23, %24, %cst_12 {dimension_numbers = #tpu.dot_dimension_numbers<[1], [1], [0], [0], [0, 0, 1, 0], [], []>} : vector<8x32xf32>, vector<64x32xf32>, vector<8x64xf32> -> vector<8x64xf32>
    %c0_13 = arith.constant 0 : index
    %c0_14 = arith.constant 0 : index
    %26 = vector.load %arg5[%c0_13, %c0_14] : memref<1x64xf32, #tpu.memory_space<vmem>>, vector<1x64xf32>
    %27 = vector.broadcast %26 : vector<1x64xf32> to vector<8x64xf32>
    %28 = arith.addf %25, %27 : vector<8x64xf32>
    %c0_15 = arith.constant 0 : index
    %c0_16 = arith.constant 0 : index
    %c0_17 = arith.constant 0 : index
    %29 = vector.load %arg6[%c0_15, %c0_16, %c0_17] : memref<1x8x64xf32, #tpu.memory_space<vmem>>, vector<1x8x64xf32>
    %30 = vector.shape_cast %29 : vector<1x8x64xf32> to vector<8x64xf32>
    %31 = vector.shape_cast %28 : vector<8x64xf32> to vector<1x8x64xf32>
    tpu.vector_store %arg6[%c0_15, %c0_16, %c0_17], %31 {strides = array<i32>} : memref<1x8x64xf32, #tpu.memory_space<vmem>>, vector<1x8x64xf32>,
    return
  }
  func.func @transform_0(%arg0: i32) -> (i32, i32, i32) {
    %c0_i32 = arith.constant 0 : i32
    %c0_i32_0 = arith.constant 0 : i32
    %c0_i32_1 = arith.constant 0 : i32
    return %arg0, %c0_i32, %c0_i32_0 : i32, i32, i32
  }
  func.func @transform_1(%arg0: i32) -> (i32, i32) {
    %c0_i32 = arith.constant 0 : i32
    %c0_i32_0 = arith.constant 0 : i32
    %c0_i32_1 = arith.constant 0 : i32
    return %c0_i32, %c0_i32_0 : i32, i32
  }
  func.func @transform_2(%arg0: i32) -> (i32, i32) {
    %c0_i32 = arith.constant 0 : i32
    %c0_i32_0 = arith.constant 0 : i32
    %c0_i32_1 = arith.constant 0 : i32
    return %c0_i32, %c0_i32_0 : i32, i32
  }
  func.func @transform_3(%arg0: i32) -> (i32, i32) {
    %c0_i32 = arith.constant 0 : i32
    %c0_i32_0 = arith.constant 0 : i32
    %c0_i32_1 = arith.constant 0 : i32
    return %c0_i32, %c0_i32_0 : i32, i32
  }
  func.func @transform_4(%arg0: i32) -> (i32, i32) {
    %c0_i32 = arith.constant 0 : i32
    %c0_i32_0 = arith.constant 0 : i32
    %c0_i32_1 = arith.constant 0 : i32
    return %c0_i32, %c0_i32_0 : i32, i32
  }
  func.func @transform_5(%arg0: i32) -> (i32, i32, i32) {
    %c0_i32 = arith.constant 0 : i32
    %c0_i32_0 = arith.constant 0 : i32
    %c0_i32_1 = arith.constant 0 : i32
    return %arg0, %c0_i32, %c0_i32_0 : i32, i32, i32
  }
}

module attributes {stable_mosaic.version = 11 : i64} {
  func.func @_dec_block_kernel(%arg0: i32, %arg1: memref<2xi32, #tpu.memory_space<smem>>, %arg2: memref<2xi32, #tpu.memory_space<smem>>, %arg3: memref<1x8x32xf32, #tpu.memory_space<vmem>>, %arg4: memref<1x8x32xf32, #tpu.memory_space<vmem>>, %arg5: memref<1x32xf32, #tpu.memory_space<vmem>>, %arg6: memref<1x32xf32, #tpu.memory_space<vmem>>, %arg7: memref<32x96xf32, #tpu.memory_space<vmem>>, %arg8: memref<1x96xf32, #tpu.memory_space<vmem>>, %arg9: memref<32x32xf32, #tpu.memory_space<vmem>>, %arg10: memref<1x32xf32, #tpu.memory_space<vmem>>, %arg11: memref<1x32xf32, #tpu.memory_space<vmem>>, %arg12: memref<1x32xf32, #tpu.memory_space<vmem>>, %arg13: memref<32x32xf32, #tpu.memory_space<vmem>>, %arg14: memref<1x32xf32, #tpu.memory_space<vmem>>, %arg15: memref<32x64xf32, #tpu.memory_space<vmem>>, %arg16: memref<1x64xf32, #tpu.memory_space<vmem>>, %arg17: memref<32x32xf32, #tpu.memory_space<vmem>>, %arg18: memref<1x32xf32, #tpu.memory_space<vmem>>, %arg19: memref<1x32xf32, #tpu.memory_space<vmem>>, %arg20: memref<1x32xf32, #tpu.memory_space<vmem>>, %arg21: memref<32x128xf32, #tpu.memory_space<vmem>>, %arg22: memref<1x128xf32, #tpu.memory_space<vmem>>, %arg23: memref<128x32xf32, #tpu.memory_space<vmem>>, %arg24: memref<1x32xf32, #tpu.memory_space<vmem>>, %arg25: memref<1x8x32xf32, #tpu.memory_space<vmem>>) attributes {dimension_semantics = [#tpu.dimension_semantics<parallel>], iteration_bounds = array<i64: 2>, scalar_prefetch = 2 : i64, scratch_operands = 0 : i64, tpu.core_type = #tpu.core_type<tc>, window_params = [{transform_indices = @transform_0, window_bounds = array<i64: 1, 8, 32>}, {transform_indices = @transform_1, window_bounds = array<i64: 1, 8, 32>}, {pipeline_mode = #tpu.pipeline_mode<synchronous>, transform_indices = @transform_2, window_bounds = array<i64: 1, 32>}, {pipeline_mode = #tpu.pipeline_mode<synchronous>, transform_indices = @transform_3, window_bounds = array<i64: 1, 32>}, {pipeline_mode = #tpu.pipeline_mode<synchronous>, transform_indices = @transform_4, window_bounds = array<i64: 32, 96>}, {pipeline_mode = #tpu.pipeline_mode<synchronous>, transform_indices = @transform_5, window_bounds = array<i64: 1, 96>}, {pipeline_mode = #tpu.pipeline_mode<synchronous>, transform_indices = @transform_6, window_bounds = array<i64: 32, 32>}, {pipeline_mode = #tpu.pipeline_mode<synchronous>, transform_indices = @transform_7, window_bounds = array<i64: 1, 32>}, {pipeline_mode = #tpu.pipeline_mode<synchronous>, transform_indices = @transform_8, window_bounds = array<i64: 1, 32>}, {pipeline_mode = #tpu.pipeline_mode<synchronous>, transform_indices = @transform_9, window_bounds = array<i64: 1, 32>}, {pipeline_mode = #tpu.pipeline_mode<synchronous>, transform_indices = @transform_10, window_bounds = array<i64: 32, 32>}, {pipeline_mode = #tpu.pipeline_mode<synchronous>, transform_indices = @transform_11, window_bounds = array<i64: 1, 32>}, {pipeline_mode = #tpu.pipeline_mode<synchronous>, transform_indices = @transform_12, window_bounds = array<i64: 32, 64>}, {pipeline_mode = #tpu.pipeline_mode<synchronous>, transform_indices = @transform_13, window_bounds = array<i64: 1, 64>}, {pipeline_mode = #tpu.pipeline_mode<synchronous>, transform_indices = @transform_14, window_bounds = array<i64: 32, 32>}, {pipeline_mode = #tpu.pipeline_mode<synchronous>, transform_indices = @transform_15, window_bounds = array<i64: 1, 32>}, {pipeline_mode = #tpu.pipeline_mode<synchronous>, transform_indices = @transform_16, window_bounds = array<i64: 1, 32>}, {pipeline_mode = #tpu.pipeline_mode<synchronous>, transform_indices = @transform_17, window_bounds = array<i64: 1, 32>}, {pipeline_mode = #tpu.pipeline_mode<synchronous>, transform_indices = @transform_18, window_bounds = array<i64: 32, 128>}, {pipeline_mode = #tpu.pipeline_mode<synchronous>, transform_indices = @transform_19, window_bounds = array<i64: 1, 128>}, {pipeline_mode = #tpu.pipeline_mode<synchronous>, transform_indices = @transform_20, window_bounds = array<i64: 128, 32>}, {pipeline_mode = #tpu.pipeline_mode<synchronous>, transform_indices = @transform_21, window_bounds = array<i64: 1, 32>}, {transform_indices = @transform_22, window_bounds = array<i64: 1, 8, 32>}]} {
    %c0 = arith.constant 0 : index
    %c0_0 = arith.constant 0 : index
    %c0_1 = arith.constant 0 : index
    %0 = vector.load %arg3[%c0, %c0_0, %c0_1] : memref<1x8x32xf32, #tpu.memory_space<vmem>>, vector<1x8x32xf32>
    %1 = vector.shape_cast %0 : vector<1x8x32xf32> to vector<8x32xf32>
    %c0_2 = arith.constant 0 : index
    %c0_3 = arith.constant 0 : index
    %c0_4 = arith.constant 0 : index
    %2 = vector.load %arg4[%c0_2, %c0_3, %c0_4] : memref<1x8x32xf32, #tpu.memory_space<vmem>>, vector<1x8x32xf32>
    %3 = vector.shape_cast %2 : vector<1x8x32xf32> to vector<8x32xf32>
    %4 = arith.index_cast %arg0 : i32 to index
    %5 = memref.load %arg1[%4] : memref<2xi32, #tpu.memory_space<smem>>
    %6 = tpu.iota {dimensions = array<i32: 1>} : vector<8x8xi32>
    %7 = tpu.iota {dimensions = array<i32: 0>} : vector<8x8xi32>
    %8 = vector.broadcast %5 : i32 to vector<8x8xi32>
    %9 = arith.cmpi slt, %6, %8 : vector<8x8xi32>
    %10 = arith.cmpi sle, %6, %7 : vector<8x8xi32>
    %11 = arith.andi %9, %10 : vector<8x8xi1>
    %cst = arith.constant 0.000000e+00 : f32
    %cst_5 = arith.constant -1.000000e+09 : f32
    %12 = vector.broadcast %cst : f32 to vector<8x8xf32>
    %13 = vector.broadcast %cst_5 : f32 to vector<8x8xf32>
    %14 = arith.select %11, %12, %13 : vector<8x8xi1>, vector<8x8xf32>
    %15 = arith.index_cast %arg0 : i32 to index
    %16 = memref.load %arg2[%15] : memref<2xi32, #tpu.memory_space<smem>>
    %17 = tpu.iota {dimensions = array<i32: 1>} : vector<8x8xi32>
    %18 = vector.broadcast %16 : i32 to vector<8x8xi32>
    %19 = arith.cmpi slt, %17, %18 : vector<8x8xi32>
    %cst_6 = arith.constant 0.000000e+00 : f32
    %cst_7 = arith.constant -1.000000e+09 : f32
    %20 = vector.broadcast %cst_6 : f32 to vector<8x8xf32>
    %21 = vector.broadcast %cst_7 : f32 to vector<8x8xf32>
    %22 = arith.select %19, %20, %21 : vector<8x8xi1>, vector<8x8xf32>
    %c0_8 = arith.constant 0 : index
    %c0_9 = arith.constant 0 : index
    %23 = vector.load %arg5[%c0_8, %c0_9] : memref<1x32xf32, #tpu.memory_space<vmem>>, vector<1x32xf32>
    %c0_10 = arith.constant 0 : index
    %c0_11 = arith.constant 0 : index
    %24 = vector.load %arg6[%c0_10, %c0_11] : memref<1x32xf32, #tpu.memory_space<vmem>>, vector<1x32xf32>
    %cst_12 = arith.constant dense<0.000000e+00> : vector<8xf32>
    %25 = vector.multi_reduction <add>, %1, %cst_12 [1] : vector<8x32xf32> to vector<8xf32>
    %26 = vector.shape_cast %25 : vector<8xf32> to vector<8x1xf32>
    %cst_13 = arith.constant 3.200000e+01 : f32
    %27 = vector.broadcast %cst_13 : f32 to vector<8x1xf32>
    %28 = arith.divf %26, %27 : vector<8x1xf32>
    %29 = vector.broadcast %28 : vector<8x1xf32> to vector<8x32xf32>
    %30 = arith.subf %1, %29 : vector<8x32xf32>
    %31 = arith.mulf %30, %30 : vector<8x32xf32>
    %cst_14 = arith.constant dense<0.000000e+00> : vector<8xf32>
    %32 = vector.multi_reduction <add>, %31, %cst_14 [1] : vector<8x32xf32> to vector<8xf32>
    %33 = vector.shape_cast %32 : vector<8xf32> to vector<8x1xf32>
    %cst_15 = arith.constant 3.200000e+01 : f32
    %34 = vector.broadcast %cst_15 : f32 to vector<8x1xf32>
    %35 = arith.divf %33, %34 : vector<8x1xf32>
    %cst_16 = arith.constant 9.99999974E-6 : f32
    %36 = vector.broadcast %cst_16 : f32 to vector<8x1xf32>
    %37 = arith.addf %35, %36 : vector<8x1xf32>
    %38 = math.rsqrt %37 : vector<8x1xf32>
    %39 = vector.broadcast %38 : vector<8x1xf32> to vector<8x32xf32>
    %40 = arith.mulf %30, %39 : vector<8x32xf32>
    %41 = vector.broadcast %23 : vector<1x32xf32> to vector<8x32xf32>
    %42 = arith.mulf %40, %41 : vector<8x32xf32>
    %43 = vector.broadcast %24 : vector<1x32xf32> to vector<8x32xf32>
    %44 = arith.addf %42, %43 : vector<8x32xf32>
    %c0_17 = arith.constant 0 : index
    %c0_18 = arith.constant 0 : index
    %45 = vector.load %arg7[%c0_17, %c0_18] : memref<32x96xf32, #tpu.memory_space<vmem>>, vector<32x96xf32>
    %cst_19 = arith.constant dense<0.000000e+00> : vector<8x96xf32>
    %46 = tpu.matmul %44, %45, %cst_19 {dimension_numbers = #tpu.dot_dimension_numbers<[1], [0], [0], [1], [0, 0, 1, 1], [], []>} : vector<8x32xf32>, vector<32x96xf32>, vector<8x96xf32> -> vector<8x96xf32>
    %c0_20 = arith.constant 0 : index
    %c0_21 = arith.constant 0 : index
    %47 = vector.load %arg8[%c0_20, %c0_21] : memref<1x96xf32, #tpu.memory_space<vmem>>, vector<1x96xf32>
    %48 = vector.broadcast %47 : vector<1x96xf32> to vector<8x96xf32>
    %49 = arith.addf %46, %48 : vector<8x96xf32>
    %50 = vector.extract_strided_slice %49 {offsets = [0, 0], sizes = [8, 32], strides = [1, 1]} : vector<8x96xf32> to vector<8x32xf32>
    %51 = vector.extract_strided_slice %49 {offsets = [0, 32], sizes = [8, 32], strides = [1, 1]} : vector<8x96xf32> to vector<8x32xf32>
    %52 = vector.extract_strided_slice %49 {offsets = [0, 64], sizes = [8, 32], strides = [1, 1]} : vector<8x96xf32> to vector<8x32xf32>
    %c0_22 = arith.constant 0 : index
    %c0_23 = arith.constant 0 : index
    %53 = vector.load %arg9[%c0_22, %c0_23] : memref<32x32xf32, #tpu.memory_space<vmem>>, vector<32x32xf32>
    %54 = vector.extract_strided_slice %50 {offsets = [0, 0], sizes = [8, 8], strides = [1, 1]} : vector<8x32xf32> to vector<8x8xf32>
    %55 = vector.extract_strided_slice %51 {offsets = [0, 0], sizes = [8, 8], strides = [1, 1]} : vector<8x32xf32> to vector<8x8xf32>
    %cst_24 = arith.constant dense<0.000000e+00> : vector<8x8xf32>
    %56 = tpu.matmul %54, %55, %cst_24 {dimension_numbers = #tpu.dot_dimension_numbers<[1], [1], [0], [0], [0, 0, 1, 0], [], []>} : vector<8x8xf32>, vector<8x8xf32>, vector<8x8xf32> -> vector<8x8xf32>
    %cst_25 = arith.constant 0.353553385 : f32
    %57 = vector.broadcast %cst_25 : f32 to vector<8x8xf32>
    %58 = arith.mulf %56, %57 : vector<8x8xf32>
    %59 = arith.addf %58, %14 : vector<8x8xf32>
    %cst_26 = arith.constant dense<0xFF800000> : vector<8xf32>
    %60 = vector.multi_reduction <maximumf>, %59, %cst_26 [1] : vector<8x8xf32> to vector<8xf32>
    %61 = vector.shape_cast %60 : vector<8xf32> to vector<8x1xf32>
    %62 = vector.broadcast %61 : vector<8x1xf32> to vector<8x8xf32>
    %63 = arith.subf %59, %62 : vector<8x8xf32>
    %64 = math.exp %63 : vector<8x8xf32>
    %cst_27 = arith.constant dense<0.000000e+00> : vector<8xf32>
    %65 = vector.multi_reduction <add>, %64, %cst_27 [1] : vector<8x8xf32> to vector<8xf32>
    %66 = vector.shape_cast %65 : vector<8xf32> to vector<8x1xf32>
    %67 = tpu.reciprocal %66 : vector<8x1xf32> -> vector<8x1xf32>
    %68 = vector.broadcast %67 : vector<8x1xf32> to vector<8x8xf32>
    %69 = arith.mulf %64, %68 : vector<8x8xf32>
    %70 = vector.extract_strided_slice %52 {offsets = [0, 0], sizes = [8, 8], strides = [1, 1]} : vector<8x32xf32> to vector<8x8xf32>
    %cst_28 = arith.constant dense<0.000000e+00> : vector<8x8xf32>
    %71 = tpu.matmul %69, %70, %cst_28 {dimension_numbers = #tpu.dot_dimension_numbers<[1], [0], [0], [1], [0, 0, 1, 1], [], []>} : vector<8x8xf32>, vector<8x8xf32>, vector<8x8xf32> -> vector<8x8xf32>
    %72 = vector.extract_strided_slice %53 {offsets = [0, 0], sizes = [8, 32], strides = [1, 1]} : vector<32x32xf32> to vector<8x32xf32>
    %cst_29 = arith.constant dense<0.000000e+00> : vector<8x32xf32>
    %73 = tpu.matmul %71, %72, %cst_29 {dimension_numbers = #tpu.dot_dimension_numbers<[1], [0], [0], [1], [0, 0, 1, 1], [], []>} : vector<8x8xf32>, vector<8x32xf32>, vector<8x32xf32> -> vector<8x32xf32>
    %74 = vector.extract_strided_slice %50 {offsets = [0, 8], sizes = [8, 8], strides = [1, 1]} : vector<8x32xf32> to vector<8x8xf32>
    %75 = vector.extract_strided_slice %51 {offsets = [0, 8], sizes = [8, 8], strides = [1, 1]} : vector<8x32xf32> to vector<8x8xf32>
    %cst_30 = arith.constant dense<0.000000e+00> : vector<8x8xf32>
    %76 = tpu.matmul %74, %75, %cst_30 {dimension_numbers = #tpu.dot_dimension_numbers<[1], [1], [0], [0], [0, 0, 1, 0], [], []>} : vector<8x8xf32>, vector<8x8xf32>, vector<8x8xf32> -> vector<8x8xf32>
    %cst_31 = arith.constant 0.353553385 : f32
    %77 = vector.broadcast %cst_31 : f32 to vector<8x8xf32>
    %78 = arith.mulf %76, %77 : vector<8x8xf32>
    %79 = arith.addf %78, %14 : vector<8x8xf32>
    %cst_32 = arith.constant dense<0xFF800000> : vector<8xf32>
    %80 = vector.multi_reduction <maximumf>, %79, %cst_32 [1] : vector<8x8xf32> to vector<8xf32>
    %81 = vector.shape_cast %80 : vector<8xf32> to vector<8x1xf32>
    %82 = vector.broadcast %81 : vector<8x1xf32> to vector<8x8xf32>
    %83 = arith.subf %79, %82 : vector<8x8xf32>
    %84 = math.exp %83 : vector<8x8xf32>
    %cst_33 = arith.constant dense<0.000000e+00> : vector<8xf32>
    %85 = vector.multi_reduction <add>, %84, %cst_33 [1] : vector<8x8xf32> to vector<8xf32>
    %86 = vector.shape_cast %85 : vector<8xf32> to vector<8x1xf32>
    %87 = tpu.reciprocal %86 : vector<8x1xf32> -> vector<8x1xf32>
    %88 = vector.broadcast %87 : vector<8x1xf32> to vector<8x8xf32>
    %89 = arith.mulf %84, %88 : vector<8x8xf32>
    %90 = vector.extract_strided_slice %52 {offsets = [0, 8], sizes = [8, 8], strides = [1, 1]} : vector<8x32xf32> to vector<8x8xf32>
    %cst_34 = arith.constant dense<0.000000e+00> : vector<8x8xf32>
    %91 = tpu.matmul %89, %90, %cst_34 {dimension_numbers = #tpu.dot_dimension_numbers<[1], [0], [0], [1], [0, 0, 1, 1], [], []>} : vector<8x8xf32>, vector<8x8xf32>, vector<8x8xf32> -> vector<8x8xf32>
    %92 = vector.extract_strided_slice %53 {offsets = [8, 0], sizes = [8, 32], strides = [1, 1]} : vector<32x32xf32> to vector<8x32xf32>
    %cst_35 = arith.constant dense<0.000000e+00> : vector<8x32xf32>
    %93 = tpu.matmul %91, %92, %cst_35 {dimension_numbers = #tpu.dot_dimension_numbers<[1], [0], [0], [1], [0, 0, 1, 1], [], []>} : vector<8x8xf32>, vector<8x32xf32>, vector<8x32xf32> -> vector<8x32xf32>
    %94 = arith.addf %73, %93 : vector<8x32xf32>
    %95 = vector.extract_strided_slice %50 {offsets = [0, 16], sizes = [8, 8], strides = [1, 1]} : vector<8x32xf32> to vector<8x8xf32>
    %96 = vector.extract_strided_slice %51 {offsets = [0, 16], sizes = [8, 8], strides = [1, 1]} : vector<8x32xf32> to vector<8x8xf32>
    %cst_36 = arith.constant dense<0.000000e+00> : vector<8x8xf32>
    %97 = tpu.matmul %95, %96, %cst_36 {dimension_numbers = #tpu.dot_dimension_numbers<[1], [1], [0], [0], [0, 0, 1, 0], [], []>} : vector<8x8xf32>, vector<8x8xf32>, vector<8x8xf32> -> vector<8x8xf32>
    %cst_37 = arith.constant 0.353553385 : f32
    %98 = vector.broadcast %cst_37 : f32 to vector<8x8xf32>
    %99 = arith.mulf %97, %98 : vector<8x8xf32>
    %100 = arith.addf %99, %14 : vector<8x8xf32>
    %cst_38 = arith.constant dense<0xFF800000> : vector<8xf32>
    %101 = vector.multi_reduction <maximumf>, %100, %cst_38 [1] : vector<8x8xf32> to vector<8xf32>
    %102 = vector.shape_cast %101 : vector<8xf32> to vector<8x1xf32>
    %103 = vector.broadcast %102 : vector<8x1xf32> to vector<8x8xf32>
    %104 = arith.subf %100, %103 : vector<8x8xf32>
    %105 = math.exp %104 : vector<8x8xf32>
    %cst_39 = arith.constant dense<0.000000e+00> : vector<8xf32>
    %106 = vector.multi_reduction <add>, %105, %cst_39 [1] : vector<8x8xf32> to vector<8xf32>
    %107 = vector.shape_cast %106 : vector<8xf32> to vector<8x1xf32>
    %108 = tpu.reciprocal %107 : vector<8x1xf32> -> vector<8x1xf32>
    %109 = vector.broadcast %108 : vector<8x1xf32> to vector<8x8xf32>
    %110 = arith.mulf %105, %109 : vector<8x8xf32>
    %111 = vector.extract_strided_slice %52 {offsets = [0, 16], sizes = [8, 8], strides = [1, 1]} : vector<8x32xf32> to vector<8x8xf32>
    %cst_40 = arith.constant dense<0.000000e+00> : vector<8x8xf32>
    %112 = tpu.matmul %110, %111, %cst_40 {dimension_numbers = #tpu.dot_dimension_numbers<[1], [0], [0], [1], [0, 0, 1, 1], [], []>} : vector<8x8xf32>, vector<8x8xf32>, vector<8x8xf32> -> vector<8x8xf32>
    %113 = vector.extract_strided_slice %53 {offsets = [16, 0], sizes = [8, 32], strides = [1, 1]} : vector<32x32xf32> to vector<8x32xf32>
    %cst_41 = arith.constant dense<0.000000e+00> : vector<8x32xf32>
    %114 = tpu.matmul %112, %113, %cst_41 {dimension_numbers = #tpu.dot_dimension_numbers<[1], [0], [0], [1], [0, 0, 1, 1], [], []>} : vector<8x8xf32>, vector<8x32xf32>, vector<8x32xf32> -> vector<8x32xf32>
    %115 = arith.addf %94, %114 : vector<8x32xf32>
    %116 = vector.extract_strided_slice %50 {offsets = [0, 24], sizes = [8, 8], strides = [1, 1]} : vector<8x32xf32> to vector<8x8xf32>
    %117 = vector.extract_strided_slice %51 {offsets = [0, 24], sizes = [8, 8], strides = [1, 1]} : vector<8x32xf32> to vector<8x8xf32>
    %cst_42 = arith.constant dense<0.000000e+00> : vector<8x8xf32>
    %118 = tpu.matmul %116, %117, %cst_42 {dimension_numbers = #tpu.dot_dimension_numbers<[1], [1], [0], [0], [0, 0, 1, 0], [], []>} : vector<8x8xf32>, vector<8x8xf32>, vector<8x8xf32> -> vector<8x8xf32>
    %cst_43 = arith.constant 0.353553385 : f32
    %119 = vector.broadcast %cst_43 : f32 to vector<8x8xf32>
    %120 = arith.mulf %118, %119 : vector<8x8xf32>
    %121 = arith.addf %120, %14 : vector<8x8xf32>
    %cst_44 = arith.constant dense<0xFF800000> : vector<8xf32>
    %122 = vector.multi_reduction <maximumf>, %121, %cst_44 [1] : vector<8x8xf32> to vector<8xf32>
    %123 = vector.shape_cast %122 : vector<8xf32> to vector<8x1xf32>
    %124 = vector.broadcast %123 : vector<8x1xf32> to vector<8x8xf32>
    %125 = arith.subf %121, %124 : vector<8x8xf32>
    %126 = math.exp %125 : vector<8x8xf32>
    %cst_45 = arith.constant dense<0.000000e+00> : vector<8xf32>
    %127 = vector.multi_reduction <add>, %126, %cst_45 [1] : vector<8x8xf32> to vector<8xf32>
    %128 = vector.shape_cast %127 : vector<8xf32> to vector<8x1xf32>
    %129 = tpu.reciprocal %128 : vector<8x1xf32> -> vector<8x1xf32>
    %130 = vector.broadcast %129 : vector<8x1xf32> to vector<8x8xf32>
    %131 = arith.mulf %126, %130 : vector<8x8xf32>
    %132 = vector.extract_strided_slice %52 {offsets = [0, 24], sizes = [8, 8], strides = [1, 1]} : vector<8x32xf32> to vector<8x8xf32>
    %cst_46 = arith.constant dense<0.000000e+00> : vector<8x8xf32>
    %133 = tpu.matmul %131, %132, %cst_46 {dimension_numbers = #tpu.dot_dimension_numbers<[1], [0], [0], [1], [0, 0, 1, 1], [], []>} : vector<8x8xf32>, vector<8x8xf32>, vector<8x8xf32> -> vector<8x8xf32>
    %134 = vector.extract_strided_slice %53 {offsets = [24, 0], sizes = [8, 32], strides = [1, 1]} : vector<32x32xf32> to vector<8x32xf32>
    %cst_47 = arith.constant dense<0.000000e+00> : vector<8x32xf32>
    %135 = tpu.matmul %133, %134, %cst_47 {dimension_numbers = #tpu.dot_dimension_numbers<[1], [0], [0], [1], [0, 0, 1, 1], [], []>} : vector<8x8xf32>, vector<8x32xf32>, vector<8x32xf32> -> vector<8x32xf32>
    %136 = arith.addf %115, %135 : vector<8x32xf32>
    %137 = arith.addf %1, %136 : vector<8x32xf32>
    %c0_48 = arith.constant 0 : index
    %c0_49 = arith.constant 0 : index
    %138 = vector.load %arg10[%c0_48, %c0_49] : memref<1x32xf32, #tpu.memory_space<vmem>>, vector<1x32xf32>
    %139 = vector.broadcast %138 : vector<1x32xf32> to vector<8x32xf32>
    %140 = arith.addf %137, %139 : vector<8x32xf32>
    %c0_50 = arith.constant 0 : index
    %c0_51 = arith.constant 0 : index
    %141 = vector.load %arg11[%c0_50, %c0_51] : memref<1x32xf32, #tpu.memory_space<vmem>>, vector<1x32xf32>
    %c0_52 = arith.constant 0 : index
    %c0_53 = arith.constant 0 : index
    %142 = vector.load %arg12[%c0_52, %c0_53] : memref<1x32xf32, #tpu.memory_space<vmem>>, vector<1x32xf32>
    %cst_54 = arith.constant dense<0.000000e+00> : vector<8xf32>
    %143 = vector.multi_reduction <add>, %140, %cst_54 [1] : vector<8x32xf32> to vector<8xf32>
    %144 = vector.shape_cast %143 : vector<8xf32> to vector<8x1xf32>
    %cst_55 = arith.constant 3.200000e+01 : f32
    %145 = vector.broadcast %cst_55 : f32 to vector<8x1xf32>
    %146 = arith.divf %144, %145 : vector<8x1xf32>
    %147 = vector.broadcast %146 : vector<8x1xf32> to vector<8x32xf32>
    %148 = arith.subf %140, %147 : vector<8x32xf32>
    %149 = arith.mulf %148, %148 : vector<8x32xf32>
    %cst_56 = arith.constant dense<0.000000e+00> : vector<8xf32>
    %150 = vector.multi_reduction <add>, %149, %cst_56 [1] : vector<8x32xf32> to vector<8xf32>
    %151 = vector.shape_cast %150 : vector<8xf32> to vector<8x1xf32>
    %cst_57 = arith.constant 3.200000e+01 : f32
    %152 = vector.broadcast %cst_57 : f32 to vector<8x1xf32>
    %153 = arith.divf %151, %152 : vector<8x1xf32>
    %cst_58 = arith.constant 9.99999974E-6 : f32
    %154 = vector.broadcast %cst_58 : f32 to vector<8x1xf32>
    %155 = arith.addf %153, %154 : vector<8x1xf32>
    %156 = math.rsqrt %155 : vector<8x1xf32>
    %157 = vector.broadcast %156 : vector<8x1xf32> to vector<8x32xf32>
    %158 = arith.mulf %148, %157 : vector<8x32xf32>
    %159 = vector.broadcast %141 : vector<1x32xf32> to vector<8x32xf32>
    %160 = arith.mulf %158, %159 : vector<8x32xf32>
    %161 = vector.broadcast %142 : vector<1x32xf32> to vector<8x32xf32>
    %162 = arith.addf %160, %161 : vector<8x32xf32>
    %c0_59 = arith.constant 0 : index
    %c0_60 = arith.constant 0 : index
    %163 = vector.load %arg13[%c0_59, %c0_60] : memref<32x32xf32, #tpu.memory_space<vmem>>, vector<32x32xf32>
    %cst_61 = arith.constant dense<0.000000e+00> : vector<8x32xf32>
    %164 = tpu.matmul %162, %163, %cst_61 {dimension_numbers = #tpu.dot_dimension_numbers<[1], [0], [0], [1], [0, 0, 1, 1], [], []>} : vector<8x32xf32>, vector<32x32xf32>, vector<8x32xf32> -> vector<8x32xf32>
    %c0_62 = arith.constant 0 : index
    %c0_63 = arith.constant 0 : index
    %165 = vector.load %arg14[%c0_62, %c0_63] : memref<1x32xf32, #tpu.memory_space<vmem>>, vector<1x32xf32>
    %166 = vector.broadcast %165 : vector<1x32xf32> to vector<8x32xf32>
    %167 = arith.addf %164, %166 : vector<8x32xf32>
    %c0_64 = arith.constant 0 : index
    %c0_65 = arith.constant 0 : index
    %168 = vector.load %arg15[%c0_64, %c0_65] : memref<32x64xf32, #tpu.memory_space<vmem>>, vector<32x64xf32>
    %cst_66 = arith.constant dense<0.000000e+00> : vector<8x64xf32>
    %169 = tpu.matmul %3, %168, %cst_66 {dimension_numbers = #tpu.dot_dimension_numbers<[1], [0], [0], [1], [0, 0, 1, 1], [], []>} : vector<8x32xf32>, vector<32x64xf32>, vector<8x64xf32> -> vector<8x64xf32>
    %c0_67 = arith.constant 0 : index
    %c0_68 = arith.constant 0 : index
    %170 = vector.load %arg16[%c0_67, %c0_68] : memref<1x64xf32, #tpu.memory_space<vmem>>, vector<1x64xf32>
    %171 = vector.broadcast %170 : vector<1x64xf32> to vector<8x64xf32>
    %172 = arith.addf %169, %171 : vector<8x64xf32>
    %173 = vector.extract_strided_slice %172 {offsets = [0, 0], sizes = [8, 32], strides = [1, 1]} : vector<8x64xf32> to vector<8x32xf32>
    %174 = vector.extract_strided_slice %172 {offsets = [0, 32], sizes = [8, 32], strides = [1, 1]} : vector<8x64xf32> to vector<8x32xf32>
    %c0_69 = arith.constant 0 : index
    %c0_70 = arith.constant 0 : index
    %175 = vector.load %arg17[%c0_69, %c0_70] : memref<32x32xf32, #tpu.memory_space<vmem>>, vector<32x32xf32>
    %176 = vector.extract_strided_slice %167 {offsets = [0, 0], sizes = [8, 8], strides = [1, 1]} : vector<8x32xf32> to vector<8x8xf32>
    %177 = vector.extract_strided_slice %173 {offsets = [0, 0], sizes = [8, 8], strides = [1, 1]} : vector<8x32xf32> to vector<8x8xf32>
    %cst_71 = arith.constant dense<0.000000e+00> : vector<8x8xf32>
    %178 = tpu.matmul %176, %177, %cst_71 {dimension_numbers = #tpu.dot_dimension_numbers<[1], [1], [0], [0], [0, 0, 1, 0], [], []>} : vector<8x8xf32>, vector<8x8xf32>, vector<8x8xf32> -> vector<8x8xf32>
    %cst_72 = arith.constant 0.353553385 : f32
    %179 = vector.broadcast %cst_72 : f32 to vector<8x8xf32>
    %180 = arith.mulf %178, %179 : vector<8x8xf32>
    %181 = arith.addf %180, %22 : vector<8x8xf32>
    %cst_73 = arith.constant dense<0xFF800000> : vector<8xf32>
    %182 = vector.multi_reduction <maximumf>, %181, %cst_73 [1] : vector<8x8xf32> to vector<8xf32>
    %183 = vector.shape_cast %182 : vector<8xf32> to vector<8x1xf32>
    %184 = vector.broadcast %183 : vector<8x1xf32> to vector<8x8xf32>
    %185 = arith.subf %181, %184 : vector<8x8xf32>
    %186 = math.exp %185 : vector<8x8xf32>
    %cst_74 = arith.constant dense<0.000000e+00> : vector<8xf32>
    %187 = vector.multi_reduction <add>, %186, %cst_74 [1] : vector<8x8xf32> to vector<8xf32>
    %188 = vector.shape_cast %187 : vector<8xf32> to vector<8x1xf32>
    %189 = tpu.reciprocal %188 : vector<8x1xf32> -> vector<8x1xf32>
    %190 = vector.broadcast %189 : vector<8x1xf32> to vector<8x8xf32>
    %191 = arith.mulf %186, %190 : vector<8x8xf32>
    %192 = vector.extract_strided_slice %174 {offsets = [0, 0], sizes = [8, 8], strides = [1, 1]} : vector<8x32xf32> to vector<8x8xf32>
    %cst_75 = arith.constant dense<0.000000e+00> : vector<8x8xf32>
    %193 = tpu.matmul %191, %192, %cst_75 {dimension_numbers = #tpu.dot_dimension_numbers<[1], [0], [0], [1], [0, 0, 1, 1], [], []>} : vector<8x8xf32>, vector<8x8xf32>, vector<8x8xf32> -> vector<8x8xf32>
    %194 = vector.extract_strided_slice %175 {offsets = [0, 0], sizes = [8, 32], strides = [1, 1]} : vector<32x32xf32> to vector<8x32xf32>
    %cst_76 = arith.constant dense<0.000000e+00> : vector<8x32xf32>
    %195 = tpu.matmul %193, %194, %cst_76 {dimension_numbers = #tpu.dot_dimension_numbers<[1], [0], [0], [1], [0, 0, 1, 1], [], []>} : vector<8x8xf32>, vector<8x32xf32>, vector<8x32xf32> -> vector<8x32xf32>
    %196 = vector.extract_strided_slice %167 {offsets = [0, 8], sizes = [8, 8], strides = [1, 1]} : vector<8x32xf32> to vector<8x8xf32>
    %197 = vector.extract_strided_slice %173 {offsets = [0, 8], sizes = [8, 8], strides = [1, 1]} : vector<8x32xf32> to vector<8x8xf32>
    %cst_77 = arith.constant dense<0.000000e+00> : vector<8x8xf32>
    %198 = tpu.matmul %196, %197, %cst_77 {dimension_numbers = #tpu.dot_dimension_numbers<[1], [1], [0], [0], [0, 0, 1, 0], [], []>} : vector<8x8xf32>, vector<8x8xf32>, vector<8x8xf32> -> vector<8x8xf32>
    %cst_78 = arith.constant 0.353553385 : f32
    %199 = vector.broadcast %cst_78 : f32 to vector<8x8xf32>
    %200 = arith.mulf %198, %199 : vector<8x8xf32>
    %201 = arith.addf %200, %22 : vector<8x8xf32>
    %cst_79 = arith.constant dense<0xFF800000> : vector<8xf32>
    %202 = vector.multi_reduction <maximumf>, %201, %cst_79 [1] : vector<8x8xf32> to vector<8xf32>
    %203 = vector.shape_cast %202 : vector<8xf32> to vector<8x1xf32>
    %204 = vector.broadcast %203 : vector<8x1xf32> to vector<8x8xf32>
    %205 = arith.subf %201, %204 : vector<8x8xf32>
    %206 = math.exp %205 : vector<8x8xf32>
    %cst_80 = arith.constant dense<0.000000e+00> : vector<8xf32>
    %207 = vector.multi_reduction <add>, %206, %cst_80 [1] : vector<8x8xf32> to vector<8xf32>
    %208 = vector.shape_cast %207 : vector<8xf32> to vector<8x1xf32>
    %209 = tpu.reciprocal %208 : vector<8x1xf32> -> vector<8x1xf32>
    %210 = vector.broadcast %209 : vector<8x1xf32> to vector<8x8xf32>
    %211 = arith.mulf %206, %210 : vector<8x8xf32>
    %212 = vector.extract_strided_slice %174 {offsets = [0, 8], sizes = [8, 8], strides = [1, 1]} : vector<8x32xf32> to vector<8x8xf32>
    %cst_81 = arith.constant dense<0.000000e+00> : vector<8x8xf32>
    %213 = tpu.matmul %211, %212, %cst_81 {dimension_numbers = #tpu.dot_dimension_numbers<[1], [0], [0], [1], [0, 0, 1, 1], [], []>} : vector<8x8xf32>, vector<8x8xf32>, vector<8x8xf32> -> vector<8x8xf32>
    %214 = vector.extract_strided_slice %175 {offsets = [8, 0], sizes = [8, 32], strides = [1, 1]} : vector<32x32xf32> to vector<8x32xf32>
    %cst_82 = arith.constant dense<0.000000e+00> : vector<8x32xf32>
    %215 = tpu.matmul %213, %214, %cst_82 {dimension_numbers = #tpu.dot_dimension_numbers<[1], [0], [0], [1], [0, 0, 1, 1], [], []>} : vector<8x8xf32>, vector<8x32xf32>, vector<8x32xf32> -> vector<8x32xf32>
    %216 = arith.addf %195, %215 : vector<8x32xf32>
    %217 = vector.extract_strided_slice %167 {offsets = [0, 16], sizes = [8, 8], strides = [1, 1]} : vector<8x32xf32> to vector<8x8xf32>
    %218 = vector.extract_strided_slice %173 {offsets = [0, 16], sizes = [8, 8], strides = [1, 1]} : vector<8x32xf32> to vector<8x8xf32>
    %cst_83 = arith.constant dense<0.000000e+00> : vector<8x8xf32>
    %219 = tpu.matmul %217, %218, %cst_83 {dimension_numbers = #tpu.dot_dimension_numbers<[1], [1], [0], [0], [0, 0, 1, 0], [], []>} : vector<8x8xf32>, vector<8x8xf32>, vector<8x8xf32> -> vector<8x8xf32>
    %cst_84 = arith.constant 0.353553385 : f32
    %220 = vector.broadcast %cst_84 : f32 to vector<8x8xf32>
    %221 = arith.mulf %219, %220 : vector<8x8xf32>
    %222 = arith.addf %221, %22 : vector<8x8xf32>
    %cst_85 = arith.constant dense<0xFF800000> : vector<8xf32>
    %223 = vector.multi_reduction <maximumf>, %222, %cst_85 [1] : vector<8x8xf32> to vector<8xf32>
    %224 = vector.shape_cast %223 : vector<8xf32> to vector<8x1xf32>
    %225 = vector.broadcast %224 : vector<8x1xf32> to vector<8x8xf32>
    %226 = arith.subf %222, %225 : vector<8x8xf32>
    %227 = math.exp %226 : vector<8x8xf32>
    %cst_86 = arith.constant dense<0.000000e+00> : vector<8xf32>
    %228 = vector.multi_reduction <add>, %227, %cst_86 [1] : vector<8x8xf32> to vector<8xf32>
    %229 = vector.shape_cast %228 : vector<8xf32> to vector<8x1xf32>
    %230 = tpu.reciprocal %229 : vector<8x1xf32> -> vector<8x1xf32>
    %231 = vector.broadcast %230 : vector<8x1xf32> to vector<8x8xf32>
    %232 = arith.mulf %227, %231 : vector<8x8xf32>
    %233 = vector.extract_strided_slice %174 {offsets = [0, 16], sizes = [8, 8], strides = [1, 1]} : vector<8x32xf32> to vector<8x8xf32>
    %cst_87 = arith.constant dense<0.000000e+00> : vector<8x8xf32>
    %234 = tpu.matmul %232, %233, %cst_87 {dimension_numbers = #tpu.dot_dimension_numbers<[1], [0], [0], [1], [0, 0, 1, 1], [], []>} : vector<8x8xf32>, vector<8x8xf32>, vector<8x8xf32> -> vector<8x8xf32>
    %235 = vector.extract_strided_slice %175 {offsets = [16, 0], sizes = [8, 32], strides = [1, 1]} : vector<32x32xf32> to vector<8x32xf32>
    %cst_88 = arith.constant dense<0.000000e+00> : vector<8x32xf32>
    %236 = tpu.matmul %234, %235, %cst_88 {dimension_numbers = #tpu.dot_dimension_numbers<[1], [0], [0], [1], [0, 0, 1, 1], [], []>} : vector<8x8xf32>, vector<8x32xf32>, vector<8x32xf32> -> vector<8x32xf32>
    %237 = arith.addf %216, %236 : vector<8x32xf32>
    %238 = vector.extract_strided_slice %167 {offsets = [0, 24], sizes = [8, 8], strides = [1, 1]} : vector<8x32xf32> to vector<8x8xf32>
    %239 = vector.extract_strided_slice %173 {offsets = [0, 24], sizes = [8, 8], strides = [1, 1]} : vector<8x32xf32> to vector<8x8xf32>
    %cst_89 = arith.constant dense<0.000000e+00> : vector<8x8xf32>
    %240 = tpu.matmul %238, %239, %cst_89 {dimension_numbers = #tpu.dot_dimension_numbers<[1], [1], [0], [0], [0, 0, 1, 0], [], []>} : vector<8x8xf32>, vector<8x8xf32>, vector<8x8xf32> -> vector<8x8xf32>
    %cst_90 = arith.constant 0.353553385 : f32
    %241 = vector.broadcast %cst_90 : f32 to vector<8x8xf32>
    %242 = arith.mulf %240, %241 : vector<8x8xf32>
    %243 = arith.addf %242, %22 : vector<8x8xf32>
    %cst_91 = arith.constant dense<0xFF800000> : vector<8xf32>
    %244 = vector.multi_reduction <maximumf>, %243, %cst_91 [1] : vector<8x8xf32> to vector<8xf32>
    %245 = vector.shape_cast %244 : vector<8xf32> to vector<8x1xf32>
    %246 = vector.broadcast %245 : vector<8x1xf32> to vector<8x8xf32>
    %247 = arith.subf %243, %246 : vector<8x8xf32>
    %248 = math.exp %247 : vector<8x8xf32>
    %cst_92 = arith.constant dense<0.000000e+00> : vector<8xf32>
    %249 = vector.multi_reduction <add>, %248, %cst_92 [1] : vector<8x8xf32> to vector<8xf32>
    %250 = vector.shape_cast %249 : vector<8xf32> to vector<8x1xf32>
    %251 = tpu.reciprocal %250 : vector<8x1xf32> -> vector<8x1xf32>
    %252 = vector.broadcast %251 : vector<8x1xf32> to vector<8x8xf32>
    %253 = arith.mulf %248, %252 : vector<8x8xf32>
    %254 = vector.extract_strided_slice %174 {offsets = [0, 24], sizes = [8, 8], strides = [1, 1]} : vector<8x32xf32> to vector<8x8xf32>
    %cst_93 = arith.constant dense<0.000000e+00> : vector<8x8xf32>
    %255 = tpu.matmul %253, %254, %cst_93 {dimension_numbers = #tpu.dot_dimension_numbers<[1], [0], [0], [1], [0, 0, 1, 1], [], []>} : vector<8x8xf32>, vector<8x8xf32>, vector<8x8xf32> -> vector<8x8xf32>
    %256 = vector.extract_strided_slice %175 {offsets = [24, 0], sizes = [8, 32], strides = [1, 1]} : vector<32x32xf32> to vector<8x32xf32>
    %cst_94 = arith.constant dense<0.000000e+00> : vector<8x32xf32>
    %257 = tpu.matmul %255, %256, %cst_94 {dimension_numbers = #tpu.dot_dimension_numbers<[1], [0], [0], [1], [0, 0, 1, 1], [], []>} : vector<8x8xf32>, vector<8x32xf32>, vector<8x32xf32> -> vector<8x32xf32>
    %258 = arith.addf %237, %257 : vector<8x32xf32>
    %259 = arith.addf %140, %258 : vector<8x32xf32>
    %c0_95 = arith.constant 0 : index
    %c0_96 = arith.constant 0 : index
    %260 = vector.load %arg18[%c0_95, %c0_96] : memref<1x32xf32, #tpu.memory_space<vmem>>, vector<1x32xf32>
    %261 = vector.broadcast %260 : vector<1x32xf32> to vector<8x32xf32>
    %262 = arith.addf %259, %261 : vector<8x32xf32>
    %c0_97 = arith.constant 0 : index
    %c0_98 = arith.constant 0 : index
    %263 = vector.load %arg19[%c0_97, %c0_98] : memref<1x32xf32, #tpu.memory_space<vmem>>, vector<1x32xf32>
    %c0_99 = arith.constant 0 : index
    %c0_100 = arith.constant 0 : index
    %264 = vector.load %arg20[%c0_99, %c0_100] : memref<1x32xf32, #tpu.memory_space<vmem>>, vector<1x32xf32>
    %cst_101 = arith.constant dense<0.000000e+00> : vector<8xf32>
    %265 = vector.multi_reduction <add>, %262, %cst_101 [1] : vector<8x32xf32> to vector<8xf32>
    %266 = vector.shape_cast %265 : vector<8xf32> to vector<8x1xf32>
    %cst_102 = arith.constant 3.200000e+01 : f32
    %267 = vector.broadcast %cst_102 : f32 to vector<8x1xf32>
    %268 = arith.divf %266, %267 : vector<8x1xf32>
    %269 = vector.broadcast %268 : vector<8x1xf32> to vector<8x32xf32>
    %270 = arith.subf %262, %269 : vector<8x32xf32>
    %271 = arith.mulf %270, %270 : vector<8x32xf32>
    %cst_103 = arith.constant dense<0.000000e+00> : vector<8xf32>
    %272 = vector.multi_reduction <add>, %271, %cst_103 [1] : vector<8x32xf32> to vector<8xf32>
    %273 = vector.shape_cast %272 : vector<8xf32> to vector<8x1xf32>
    %cst_104 = arith.constant 3.200000e+01 : f32
    %274 = vector.broadcast %cst_104 : f32 to vector<8x1xf32>
    %275 = arith.divf %273, %274 : vector<8x1xf32>
    %cst_105 = arith.constant 9.99999974E-6 : f32
    %276 = vector.broadcast %cst_105 : f32 to vector<8x1xf32>
    %277 = arith.addf %275, %276 : vector<8x1xf32>
    %278 = math.rsqrt %277 : vector<8x1xf32>
    %279 = vector.broadcast %278 : vector<8x1xf32> to vector<8x32xf32>
    %280 = arith.mulf %270, %279 : vector<8x32xf32>
    %281 = vector.broadcast %263 : vector<1x32xf32> to vector<8x32xf32>
    %282 = arith.mulf %280, %281 : vector<8x32xf32>
    %283 = vector.broadcast %264 : vector<1x32xf32> to vector<8x32xf32>
    %284 = arith.addf %282, %283 : vector<8x32xf32>
    %c0_106 = arith.constant 0 : index
    %c0_107 = arith.constant 0 : index
    %285 = vector.load %arg21[%c0_106, %c0_107] : memref<32x128xf32, #tpu.memory_space<vmem>>, vector<32x128xf32>
    %cst_108 = arith.constant dense<0.000000e+00> : vector<8x128xf32>
    %286 = tpu.matmul %284, %285, %cst_108 {dimension_numbers = #tpu.dot_dimension_numbers<[1], [0], [0], [1], [0, 0, 1, 1], [], []>} : vector<8x32xf32>, vector<32x128xf32>, vector<8x128xf32> -> vector<8x128xf32>
    %c0_109 = arith.constant 0 : index
    %c0_110 = arith.constant 0 : index
    %287 = vector.load %arg22[%c0_109, %c0_110] : memref<1x128xf32, #tpu.memory_space<vmem>>, vector<1x128xf32>
    %288 = vector.broadcast %287 : vector<1x128xf32> to vector<8x128xf32>
    %289 = arith.addf %286, %288 : vector<8x128xf32>
    %cst_111 = arith.constant 0.000000e+00 : f32
    %290 = vector.broadcast %cst_111 : f32 to vector<8x128xf32>
    %291 = arith.maximumf %289, %290 : vector<8x128xf32>
    %c0_112 = arith.constant 0 : index
    %c0_113 = arith.constant 0 : index
    %292 = vector.load %arg23[%c0_112, %c0_113] : memref<128x32xf32, #tpu.memory_space<vmem>>, vector<128x32xf32>
    %cst_114 = arith.constant dense<0.000000e+00> : vector<8x32xf32>
    %293 = tpu.matmul %291, %292, %cst_114 {dimension_numbers = #tpu.dot_dimension_numbers<[1], [0], [0], [1], [0, 0, 1, 1], [], []>} : vector<8x128xf32>, vector<128x32xf32>, vector<8x32xf32> -> vector<8x32xf32>
    %294 = arith.addf %262, %293 : vector<8x32xf32>
    %c0_115 = arith.constant 0 : index
    %c0_116 = arith.constant 0 : index
    %295 = vector.load %arg24[%c0_115, %c0_116] : memref<1x32xf32, #tpu.memory_space<vmem>>, vector<1x32xf32>
    %296 = vector.broadcast %295 : vector<1x32xf32> to vector<8x32xf32>
    %297 = arith.addf %294, %296 : vector<8x32xf32>
    %c0_117 = arith.constant 0 : index
    %c0_118 = arith.constant 0 : index
    %c0_119 = arith.constant 0 : index
    %298 = vector.load %arg25[%c0_117, %c0_118, %c0_119] : memref<1x8x32xf32, #tpu.memory_space<vmem>>, vector<1x8x32xf32>
    %299 = vector.shape_cast %298 : vector<1x8x32xf32> to vector<8x32xf32>
    %300 = vector.shape_cast %297 : vector<8x32xf32> to vector<1x8x32xf32>
    tpu.vector_store %arg25[%c0_117, %c0_118, %c0_119], %300 {strides = array<i32>} : memref<1x8x32xf32, #tpu.memory_space<vmem>>, vector<1x8x32xf32>,
    return
  }
  func.func @transform_0(%arg0: i32, %arg1: memref<2xi32, #tpu.memory_space<smem>>, %arg2: memref<2xi32, #tpu.memory_space<smem>>) -> (i32, i32, i32) {
    %c0_i32 = arith.constant 0 : i32
    %c0_i32_0 = arith.constant 0 : i32
    %c0_i32_1 = arith.constant 0 : i32
    return %arg0, %c0_i32, %c0_i32_0 : i32, i32, i32
  }
  func.func @transform_1(%arg0: i32, %arg1: memref<2xi32, #tpu.memory_space<smem>>, %arg2: memref<2xi32, #tpu.memory_space<smem>>) -> (i32, i32, i32) {
    %c0_i32 = arith.constant 0 : i32
    %c0_i32_0 = arith.constant 0 : i32
    %c0_i32_1 = arith.constant 0 : i32
    return %arg0, %c0_i32, %c0_i32_0 : i32, i32, i32
  }
  func.func @transform_2(%arg0: i32, %arg1: memref<2xi32, #tpu.memory_space<smem>>, %arg2: memref<2xi32, #tpu.memory_space<smem>>) -> (i32, i32) {
    %c0_i32 = arith.constant 0 : i32
    %c0_i32_0 = arith.constant 0 : i32
    %c0_i32_1 = arith.constant 0 : i32
    return %c0_i32, %c0_i32_0 : i32, i32
  }
  func.func @transform_3(%arg0: i32, %arg1: memref<2xi32, #tpu.memory_space<smem>>, %arg2: memref<2xi32, #tpu.memory_space<smem>>) -> (i32, i32) {
    %c0_i32 = arith.constant 0 : i32
    %c0_i32_0 = arith.constant 0 : i32
    %c0_i32_1 = arith.constant 0 : i32
    return %c0_i32, %c0_i32_0 : i32, i32
  }
  func.func @transform_4(%arg0: i32, %arg1: memref<2xi32, #tpu.memory_space<smem>>, %arg2: memref<2xi32, #tpu.memory_space<smem>>) -> (i32, i32) {
    %c0_i32 = arith.constant 0 : i32
    %c0_i32_0 = arith.constant 0 : i32
    %c0_i32_1 = arith.constant 0 : i32
    return %c0_i32, %c0_i32_0 : i32, i32
  }
  func.func @transform_5(%arg0: i32, %arg1: memref<2xi32, #tpu.memory_space<smem>>, %arg2: memref<2xi32, #tpu.memory_space<smem>>) -> (i32, i32) {
    %c0_i32 = arith.constant 0 : i32
    %c0_i32_0 = arith.constant 0 : i32
    %c0_i32_1 = arith.constant 0 : i32
    return %c0_i32, %c0_i32_0 : i32, i32
  }
  func.func @transform_6(%arg0: i32, %arg1: memref<2xi32, #tpu.memory_space<smem>>, %arg2: memref<2xi32, #tpu.memory_space<smem>>) -> (i32, i32) {
    %c0_i32 = arith.constant 0 : i32
    %c0_i32_0 = arith.constant 0 : i32
    %c0_i32_1 = arith.constant 0 : i32
    return %c0_i32, %c0_i32_0 : i32, i32
  }
  func.func @transform_7(%arg0: i32, %arg1: memref<2xi32, #tpu.memory_space<smem>>, %arg2: memref<2xi32, #tpu.memory_space<smem>>) -> (i32, i32) {
    %c0_i32 = arith.constant 0 : i32
    %c0_i32_0 = arith.constant 0 : i32
    %c0_i32_1 = arith.constant 0 : i32
    return %c0_i32, %c0_i32_0 : i32, i32
  }
  func.func @transform_8(%arg0: i32, %arg1: memref<2xi32, #tpu.memory_space<smem>>, %arg2: memref<2xi32, #tpu.memory_space<smem>>) -> (i32, i32) {
    %c0_i32 = arith.constant 0 : i32
    %c0_i32_0 = arith.constant 0 : i32
    %c0_i32_1 = arith.constant 0 : i32
    return %c0_i32, %c0_i32_0 : i32, i32
  }
  func.func @transform_9(%arg0: i32, %arg1: memref<2xi32, #tpu.memory_space<smem>>, %arg2: memref<2xi32, #tpu.memory_space<smem>>) -> (i32, i32) {
    %c0_i32 = arith.constant 0 : i32
    %c0_i32_0 = arith.constant 0 : i32
    %c0_i32_1 = arith.constant 0 : i32
    return %c0_i32, %c0_i32_0 : i32, i32
  }
  func.func @transform_10(%arg0: i32, %arg1: memref<2xi32, #tpu.memory_space<smem>>, %arg2: memref<2xi32, #tpu.memory_space<smem>>) -> (i32, i32) {
    %c0_i32 = arith.constant 0 : i32
    %c0_i32_0 = arith.constant 0 : i32
    %c0_i32_1 = arith.constant 0 : i32
    return %c0_i32, %c0_i32_0 : i32, i32
  }
  func.func @transform_11(%arg0: i32, %arg1: memref<2xi32, #tpu.memory_space<smem>>, %arg2: memref<2xi32, #tpu.memory_space<smem>>) -> (i32, i32) {
    %c0_i32 = arith.constant 0 : i32
    %c0_i32_0 = arith.constant 0 : i32
    %c0_i32_1 = arith.constant 0 : i32
    return %c0_i32, %c0_i32_0 : i32, i32
  }
  func.func @transform_12(%arg0: i32, %arg1: memref<2xi32, #tpu.memory_space<smem>>, %arg2: memref<2xi32, #tpu.memory_space<smem>>) -> (i32, i32) {
    %c0_i32 = arith.constant 0 : i32
    %c0_i32_0 = arith.constant 0 : i32
    %c0_i32_1 = arith.constant 0 : i32
    return %c0_i32, %c0_i32_0 : i32, i32
  }
  func.func @transform_13(%arg0: i32, %arg1: memref<2xi32, #tpu.memory_space<smem>>, %arg2: memref<2xi32, #tpu.memory_space<smem>>) -> (i32, i32) {
    %c0_i32 = arith.constant 0 : i32
    %c0_i32_0 = arith.constant 0 : i32
    %c0_i32_1 = arith.constant 0 : i32
    return %c0_i32, %c0_i32_0 : i32, i32
  }
  func.func @transform_14(%arg0: i32, %arg1: memref<2xi32, #tpu.memory_space<smem>>, %arg2: memref<2xi32, #tpu.memory_space<smem>>) -> (i32, i32) {
    %c0_i32 = arith.constant 0 : i32
    %c0_i32_0 = arith.constant 0 : i32
    %c0_i32_1 = arith.constant 0 : i32
    return %c0_i32, %c0_i32_0 : i32, i32
  }
  func.func @transform_15(%arg0: i32, %arg1: memref<2xi32, #tpu.memory_space<smem>>, %arg2: memref<2xi32, #tpu.memory_space<smem>>) -> (i32, i32) {
    %c0_i32 = arith.constant 0 : i32
    %c0_i32_0 = arith.constant 0 : i32
    %c0_i32_1 = arith.constant 0 : i32
    return %c0_i32, %c0_i32_0 : i32, i32
  }
  func.func @transform_16(%arg0: i32, %arg1: memref<2xi32, #tpu.memory_space<smem>>, %arg2: memref<2xi32, #tpu.memory_space<smem>>) -> (i32, i32) {
    %c0_i32 = arith.constant 0 : i32
    %c0_i32_0 = arith.constant 0 : i32
    %c0_i32_1 = arith.constant 0 : i32
    return %c0_i32, %c0_i32_0 : i32, i32
  }
  func.func @transform_17(%arg0: i32, %arg1: memref<2xi32, #tpu.memory_space<smem>>, %arg2: memref<2xi32, #tpu.memory_space<smem>>) -> (i32, i32) {
    %c0_i32 = arith.constant 0 : i32
    %c0_i32_0 = arith.constant 0 : i32
    %c0_i32_1 = arith.constant 0 : i32
    return %c0_i32, %c0_i32_0 : i32, i32
  }
  func.func @transform_18(%arg0: i32, %arg1: memref<2xi32, #tpu.memory_space<smem>>, %arg2: memref<2xi32, #tpu.memory_space<smem>>) -> (i32, i32) {
    %c0_i32 = arith.constant 0 : i32
    %c0_i32_0 = arith.constant 0 : i32
    %c0_i32_1 = arith.constant 0 : i32
    return %c0_i32, %c0_i32_0 : i32, i32
  }
  func.func @transform_19(%arg0: i32, %arg1: memref<2xi32, #tpu.memory_space<smem>>, %arg2: memref<2xi32, #tpu.memory_space<smem>>) -> (i32, i32) {
    %c0_i32 = arith.constant 0 : i32
    %c0_i32_0 = arith.constant 0 : i32
    %c0_i32_1 = arith.constant 0 : i32
    return %c0_i32, %c0_i32_0 : i32, i32
  }
  func.func @transform_20(%arg0: i32, %arg1: memref<2xi32, #tpu.memory_space<smem>>, %arg2: memref<2xi32, #tpu.memory_space<smem>>) -> (i32, i32) {
    %c0_i32 = arith.constant 0 : i32
    %c0_i32_0 = arith.constant 0 : i32
    %c0_i32_1 = arith.constant 0 : i32
    return %c0_i32, %c0_i32_0 : i32, i32
  }
  func.func @transform_21(%arg0: i32, %arg1: memref<2xi32, #tpu.memory_space<smem>>, %arg2: memref<2xi32, #tpu.memory_space<smem>>) -> (i32, i32) {
    %c0_i32 = arith.constant 0 : i32
    %c0_i32_0 = arith.constant 0 : i32
    %c0_i32_1 = arith.constant 0 : i32
    return %c0_i32, %c0_i32_0 : i32, i32
  }
  func.func @transform_22(%arg0: i32, %arg1: memref<2xi32, #tpu.memory_space<smem>>, %arg2: memref<2xi32, #tpu.memory_space<smem>>) -> (i32, i32, i32) {
    %c0_i32 = arith.constant 0 : i32
    %c0_i32_0 = arith.constant 0 : i32
    %c0_i32_1 = arith.constant 0 : i32
    return %arg0, %c0_i32, %c0_i32_0 : i32, i32, i32
  }
}

</mosaic_0001>

<bundles_post_ra>
// kernel: bialinguanet_forward.8
= control target key start
LH: loop header
LB: loop body
LE: loop exit
PB: predicated region body
PF: predicated region fallthrough
CT: control target
= control target key end

     0   :  { %s301_s12 = smov 0   ;;  %s327_s0 = inlined_call_operand.vmem [shape: f32[2,8,32], index: 0, kind: input, shape index: {}]   ;;  %s328_s1 = inlined_call_operand.vmem [shape: f32[1,32], index: 1, kind: input, shape index: {}]   ;;  %s329_s2 = inlined_call_operand.vmem [shape: f32[1,32], index: 2, kind: input, shape index: {}]   ;;  %s330_s3 = inlined_call_operand.vmem [shape: f32[2,8,32], index: 3, kind: output, shape index: {}]  }
   0x1 LB: > { %s252_s13 = sadd.s32 4294967295, %s279_s12   ;;  %p256_p0 = scmp.ge.s32.totalorder %s279_s12, 1  ;;  %s279_s12 = sphi %s301_s12, %s13_s12  }
   0x2   : > { %p136_p1 = scmp.lt.s32.totalorder %s279_s12, 3 }
   0x4   : > { %p137_p2 = pnand %p256_p0, %p136_p1 }
   0x5   : > { %p158_p3 = scmp.lt.s32.totalorder (!%p137_p2), %s252_s13, 1  ;;  %vm169_vm0 = vcmask (!%p137_p2), 261120   ;;  %v259_v11 = vld [vmem:[%s328_s1] ss:$0 sm:$0xff] (!%p137_p2) }
   0x6   : > { %140 = sbr.rel (%p137_p2) target bundleno = 331 (0x14b), region = 32  ;;  %v260_v13 = vld [vmem:[%s329_s2] ss:$0 sm:$0xff] (!%p137_p2) }
   0xd   : > { %s332_s13 = smov (!%p158_p3, %s252_s13), 1 }
   0xe   : > { %s257_s14 = sshll.u32 %s332_s13, 3 }
   0xf   : > { %s161_s17 = scalar_lea.vmem %s327_s0, %s257_s14  ;;  %s165_s24 = scalar_lea.vmem %s330_s3, %s257_s14 }
  0x10   : > { %v166_v0 = vld [vmem:[%s161_s17] sm:$0xff] }
  0x11   : > { %v170_v1 = vsel %vm169_vm0, %v166_v0, 0.0 }
  0x12   : > { %171 = vadd.xlane.f32.xlu0 %v170_v1 }
  0x9f   : > { %v172_v2 = vpop.xlane.xlu0 %171 }
  0xa0   : > { %v174_v3 = vmul.f32 0.03125, %v172_v2 }
  0xa2   : > { %v175_v4 = vsub.f32 %v166_v0, %v174_v3 }
  0xa4   : > { %v176_v5 = vmul.f32 %v175_v4, %v175_v4 }
  0xa6   : > { %v177_v6 = vsel %vm169_vm0, %v176_v5, 0.0 }
  0xa7   : > { %178 = vadd.xlane.f32.xlu0 %v177_v6 }
 0x134   : > { %v179_v7 = vpop.xlane.xlu0 %178 }
 0x135   : > { %v180_v8 = vmul.f32 0.03125, %v179_v7 }
 0x137   : > { %v181_v9 = vadd.f32 1e-05, %v180_v8 }
 0x139   : > { %271 = vrsqrt.f32 %v181_v9 }
 0x143   : > { %v272_v10 = vpop.eup %271 }
 0x144   : > { %v183_v12 = vmul.f32 %v272_v10, %v175_v4 }
 0x146   : > { %v190_v14 = vmul.f32 %v259_v11, %v183_v12 }
 0x148   : > { %v197_v15 = vadd.f32 %v260_v13, %v190_v14 }
 0x14a   : > { %198 = vst.msk [vmem:[%s165_s24] sm:$0xff] %vm169_vm0, %v197_v15 }
 0x14b PF: > { %s13_s12 = sadd.s32 1, %s279_s12  }
 0x14c   : > { %p10_p4 = scmp.ge.s32.totalorder %s13_s12, 4  }
 0x14e   :  { %12 = sbr.rel (!%p10_p4) target bundleno = 1 (0x1), region = 62 }

// kernel: bialinguanet_forward.11
= control target key start
LH: loop header
LB: loop body
LE: loop exit
PB: predicated region body
PF: predicated region fallthrough
CT: control target
= control target key end

     0   :  { %10 = vsyncpa [#allocation3], 0  ;;  %s797_s0 = inlined_call_operand.vmem [shape: f32[2,8,32], index: 0, kind: input, shape index: {}]   ;;  %s798_s1 = inlined_call_operand.vmem [shape: f32[1,32], index: 1, kind: input, shape index: {}]   ;;  %s799_s2 = inlined_call_operand.vmem [shape: f32[1,32], index: 2, kind: input, shape index: {}]   ;;  %s800_s3 = inlined_call_operand.vmem [shape: f32[64,32], index: 3, kind: input, shape index: {}]   ;;  %s801_s4 = inlined_call_operand.vmem [shape: f32[1,64], index: 4, kind: input, shape index: {}]   ;;  %s802_s5 = inlined_call_operand.hbm [shape: f32[2,8,64], index: 5, kind: output, shape index: {}]  }
   0x1   :  { %12 = vsyncpa [#allocation3 + $0x1], 0  ;;  %s647_s18 = smov 0   ;;  %s649_s19 = smov 0  }
   0x2   :  { %s651_s20 = smov 0   ;;  %s653_s21 = smov 0  }
   0x3 LB: > { %s668_s22 = sadd.s32 4294967295, %s611_s21   ;;  %s439_s23 = sadd.s32 4294967294, %s611_s21   ;;  %s611_s21 = sphi %s653_s21, %s810_s21   ;;  %s607_s20 = sphi %s651_s20, %s809_s20   ;;  %s603_s19 = sphi %s649_s19, %s808_s19   ;;  %s599_s18 = sphi %s647_s18, %s807_s18  }
   0x4   : > { %s672_s24 = sadd.s32 1, %s611_s21   ;;  %s135_s25 = sadd.s32 1, %s607_s20 }
   0x5   : > { %s132_s26 = ssub.s32 %s611_s21, %s672_s24  ;;  %p145_p0 = scmp.ne.s32.totalorder %s607_s20, %s603_s19 }
   0x6   : > { %p133_p1 = scmp.eq.s32.totalorder %s132_s26, 0  ;;  %p146_p2 = scmp.eq.s32.totalorder %s668_s22, 1 }
   0x7   : > { %p151_p3 = scmp.ne.s32.totalorder %s603_s19, %s599_s18  ;;  %p152_p4 = scmp.eq.s32.totalorder %s439_s23, 1 }
   0x8   : > { %s683_s27 = scalar_select %p133_p1, %s607_s20, %s135_s25  }
   0x9   : > { %p685_p5 = por %p146_p2, %p145_p0  ;;  %p689_p6 = por %p152_p4, %p151_p3 }
   0xa   : > { %p442_p7 = scmp.ge.s32.totalorder %s611_s21, 1  ;;  %p189_p8 = scmp.lt.s32.totalorder %s611_s21, 3 }
   0xc   : > { %p190_p9 = pnand %p442_p7, %p189_p8 }
   0xd   : > { %p216_p10 = scmp.lt.s32.totalorder (!%p190_p9), %s668_s22, 1  ;;  %vm223_vm0 = vcmask (!%p190_p9), 261120   ;;  %v252_v2 = vld [vmem:[%s800_s3] sm:$0xff] (!%p190_p9)  ;;  %v253_v3 = vld [vmem:[%s800_s3 + $0x8] sm:$0xff] (!%p190_p9)  ;;  %v613_v5 = vmov (!%p190_p9), 0.0|0.0   ;;  %v254_v7 = vld [vmem:[%s800_s3 + $0x10] sm:$0xff] (!%p190_p9) }
   0xe   : > { %193 = sbr.rel (%p190_p9) target bundleno = 567 (0x237), region = 40  ;;  %vm709_vm1 = vmpackc.low (!%p190_p9), %vm223_vm0, %vm223_vm0  ;;  %489 = vmatprep.subr.bf16.mxu0 (!%p190_p9), %v613_v5  ;;  %v490_v6 = vpack.c.bf16 (!%p190_p9), %v253_v3, %v252_v2  ;;  %v255_v8 = vld [vmem:[%s800_s3 + $0x18] sm:$0xff] (!%p190_p9)  ;;  %v256_v15 = vld [vmem:[%s800_s3 + $0x20] sm:$0xff] (!%p190_p9)  ;;  %vm614_vm2 = vmmov (!%p190_p9), 0   ;;  %v615_v18 = vmov (!%p190_p9), 0.0   ;;  %s213_s14 = sand.u32 (!%p190_p9), 1, %s603_s19  }
   0xf   : > { %v494_v9 = vpack.c.bf16 (!%p190_p9), %v255_v8, %v254_v7  ;;  %v257_v16 = vld [vmem:[%s800_s3 + $0x28] sm:$0xff] (!%p190_p9)  ;;  %486 = vmatprep.mubr.msk.f32.mxu0 (!%p190_p9), %vm614_vm2, %v615_v18  ;;  %v258_v19 = vld [vmem:[%s800_s3 + $0x30] sm:$0xff] (!%p190_p9)  ;;  %v259_v20 = vld [vmem:[%s800_s3 + $0x38] sm:$0xff] (!%p190_p9)  ;;  %s443_s15 = sshll.u32 (!%p190_p9), %s213_s14, 3  ;;  %s458_s23 = sshll.u32 (!%p190_p9), %s668_s22, 7  ;;  %vm364_vm3 = vcmask (!%p190_p9), 523264  }
  0x10   : > { %492 = vmatpush3.bf16.xpose.msk.msra.mxu0 (!%p190_p9), %vm709_vm1, %v490_v6  ;;  %v498_v17 = vpack.c.bf16 (!%p190_p9), %v257_v16, %v256_v15  ;;  %v502_v21 = vpack.c.bf16 (!%p190_p9), %v259_v20, %v258_v19  ;;  %v445_v26 = vld [vmem:[%s798_s1] ss:$0 sm:$0xff] (!%p190_p9)  ;;  %s215_s25 = scalar_lea.vmem (!%p190_p9), [#allocation2], %s443_s15  ;;  %s755_s7 = scalar_lea.hbm (!%p190_p9), %s802_s5, %s458_s23 }
  0x11   : > { %493 = vmatprep.subr.bf16.mxu0 (!%p190_p9), %v613_v5  ;;  %v446_v28 = vld [vmem:[%s799_s2] ss:$0 sm:$0xff] (!%p190_p9)  ;;  %s380_s26 = sshll.u32 (!%p190_p9), %s215_s25, 4  ;;  %s367_s8 = scalar_lea.sflag (!%p190_p9), [#allocation3], %s213_s14  ;;  %s757_s26 = int_to_ptr.vmem [resolvable:$true] %s380_s26 }
  0x12   : > { %v447_v31 = vld [vmem:[%s801_s4] ss:$0 sm:$0xff] (!%p190_p9) }
  0x15   : > { %s217_s30 = scalar_select %p216_p10, %s668_s22, 1 }
  0x16   : > { %s616_s22 = smov [#allocation2]  }
  0x17   : > { %s444_s6 = sshll.u32 %s217_s30, 3  ;;  %s553_s10 = sshll.u32 %s616_s22, 4  ;;  %s554_s10 = int_to_ptr.vmem [resolvable:$false] %s553_s10 }
  0x18   : > { %s219_s9 = scalar_lea.vmem %s797_s0, %s444_s6  ;;  %496 = vmatpush3.bf16.xpose.msk.msra.mxu0 %vm709_vm1, %v494_v9  ;;  %s555_s11 = scalar_lea.vmem %s554_s10, 256 }
  0x19   : > { %v220_v0 = vld [vmem:[%s219_s9] sm:$0xff]  ;;  %497 = vmatprep.subr.bf16.mxu0 %v613_v5  ;;  %s549_s9 = scalar_lea.vmem %s757_s26, 128  ;;  %p556_p0 = scmp.lt.s32.totalorder %s757_s26, %s554_s10 }
  0x1a   : > { %v224_v1 = vsel %vm223_vm0, %v220_v0, 0.0  ;;  %p550_p11 = scmp.ne.s32.totalorder %s757_s26, %s549_s9  ;;  %p557_p1 = scmp.lt.s32.totalorder %s555_s11, %s549_s9 }
  0x1b   : > { %225 = vadd.xlane.f32.xlu0 %v224_v1 }
  0x1c   : > { %p551_p12 = pnand %p550_p11, %p685_p5  ;;  %p558_p2 = por %p557_p1, %p556_p0 }
  0x1e   : > { %p552_p13 = pneg %p551_p12 }
  0x20   : > { %500 = vmatpush3.bf16.xpose.msk.msra.mxu0 %vm709_vm1, %v498_v17  ;;  %p559_p3 = pnand %p558_p2, %p552_p13 }
  0x21   : > { %501 = vmatprep.subr.bf16.mxu0 %v613_v5 }
  0x28   : > { %504 = vmatpush3.bf16.xpose.msk.msra.mxu0 %vm709_vm1, %v502_v21 }
  0xa8   : > { %v226_v10 = vpop.xlane.xlu0 %225 }
  0xa9   : > { %v228_v11 = vmul.f32 0.03125, %v226_v10 }
  0xab   : > { %v229_v12 = vsub.f32 %v220_v0, %v228_v11 }
  0xad   : > { %v230_v13 = vmul.f32 %v229_v12, %v229_v12 }
  0xaf   : > { %v231_v14 = vsel %vm223_vm0, %v230_v13, 0.0 }
  0xb0   : > { %232 = vadd.xlane.f32.xlu0 %v231_v14 }
 0x13d   : > { %v233_v22 = vpop.xlane.xlu0 %232 }
 0x13e   : > { %v234_v23 = vmul.f32 0.03125, %v233_v22 }
 0x140   : > { %v235_v24 = vadd.f32 1e-05, %v234_v23 }
 0x142   : > { %547 = vrsqrt.f32 %v235_v24 }
 0x14c   : > { %v548_v25 = vpop.eup %547 }
 0x14d   : > { %v237_v27 = vmul.f32 %v548_v25, %v229_v12 }
 0x14f   : > { %v244_v29 = vmul.f32 %v445_v26, %v237_v27 }
 0x151   : > { %v251_v30 = vadd.f32 %v446_v28, %v244_v29 }
 0x153   : > { %487 = vmatmul.mubr.msk.f32.vlgmr.msra.gmra.mrb[0].mxu0 %vm223_vm0, %v251_v30 }
 0x226   : > { %v360_v32 = vpop.f32.mrb[0].mxu0 }
 0x227   : > { %v361_v33 = vadd.f32 %v447_v31, %v360_v32  ;;  %v488_v34 = vpop.f32.mrb[1].mxu0 }
 0x229   : > { %365 = vst.msk [vmem:[%s215_s25] sm:$0xff] %vm364_vm3, %v361_v33 }
 0x22a   : > { %562 = shalt.err (!%p559_p3)
}
 0x22b   : > { %s563_s12 = scalar_lea.hbm %s755_s7, 128  ;;  %s567_s15 = scalar_lea.hbm %s802_s5, 256 }
 0x22c   : > { %p564_p4 = scmp.ne.s32.totalorder %s755_s7, %s563_s12  ;;  %p568_p9 = scmp.lt.u32.totalorder %s755_s7, %s802_s5 }
 0x22d   : > { %p569_p10 = scmp.lt.u32.totalorder %s567_s15, %s563_s12  ;;  %p571_p12 = scmp.lt.u32.totalorder %s563_s12, %s755_s7 }
 0x22e   : > { %p565_p7 = pnand %p564_p4, %p685_p5 }
 0x22f   : > { %p570_p11 = por %p569_p10, %p568_p9 }
 0x230   : > { %p566_p8 = pneg %p565_p7 }
 0x231   : > { %p572_p13 = por %p571_p12, %p570_p11 }
 0x233   : > { %p573_p0 = pnand %p572_p13, %p566_p8 }
 0x235   : > { %576 = shalt.err (!%p573_p0)
}
 0x236   : > { %505 = dma.vmem_to_hbm [thread:$0]  (%p685_p5), %s757_s26, 128, %s755_s7, %s367_s8  }
 0x237 PF: > { %p511_p1 = scmp.ge.s32.totalorder %s611_s21, 2  ;;  %s392_s23 = sand.u32 1, %s599_s18  }
 0x238   : > { %s393_s25 = scalar_lea.sflag [#allocation3], %s392_s23 }
 0x239   : > { %p508_p2 = pnand %p511_p1, %p689_p6 }
 0x23b   : > { %594 = dma.done.wait (!%p508_p2), %s393_s25, 128  }
 0x23c   : > { %596 = vsyncadd (!%p508_p2), %s393_s25, 4294967168  ;;  %p15_p3 = scmp.ge.s32.totalorder %s672_s24, 4   ;;  %s807_s18 = smov %s603_s19 }
 0x23d   : > { %s808_s19 = smov %s607_s20  ;;  %s809_s20 = smov %s683_s27 }
 0x23e   : > { %s810_s21 = smov %s672_s24  ;;  %17 = sbr.rel (!%p15_p3) target bundleno = 3 (0x3), region = 75 }
 0x245   :  { %398 = vsyncpa [#allocation3], 1 }
 0x246   :  { %400 = vsyncpa [#allocation3 + $0x1], 1 }

// kernel: bialinguanet_forward.6
= control target key start
LH: loop header
LB: loop body
LE: loop exit
PB: predicated region body
PF: predicated region fallthrough
CT: control target
= control target key end

     0   :  { %s2454_s0 = inlined_call_operand.vmem [shape: s32[2], index: 0, kind: input, shape index: {}]   ;;  %s2455_s1 = inlined_call_operand.vmem [shape: f32[2,8,32], index: 1, kind: input, shape index: {}]   ;;  %s2456_s2 = inlined_call_operand.vmem [shape: f32[1,32], index: 2, kind: input, shape index: {}, may-alias: {2,8}]   ;;  %s2457_s3 = inlined_call_operand.vmem [shape: f32[1,32], index: 3, kind: input, shape index: {}, may-alias: {3,7,9,13}]   ;;  %s2458_s4 = inlined_call_operand.vmem [shape: f32[32,96], index: 4, kind: input, shape index: {}]   ;;  %s2459_s5 = inlined_call_operand.vmem [shape: f32[1,96], index: 5, kind: input, shape index: {}]   ;;  %s2460_s6 = inlined_call_operand.vmem [shape: f32[32,32], index: 6, kind: input, shape index: {}]   ;;  %s2461_s7 = inlined_call_operand.vmem [shape: f32[1,32], index: 7, kind: input, shape index: {}, may-alias: {3,7,9,13}]   ;;  %s2462_s8 = inlined_call_operand.vmem [shape: f32[1,32], index: 8, kind: input, shape index: {}, may-alias: {2,8}]   ;;  %s2463_s9 = inlined_call_operand.vmem [shape: f32[1,32], index: 9, kind: input, shape index: {}, may-alias: {3,7,9,13}]   ;;  %s2464_s10 = inlined_call_operand.vmem [shape: f32[32,128], index: 10, kind: input, shape index: {}]   ;;  %s2465_s11 = inlined_call_operand.vmem [shape: f32[1,128], index: 11, kind: input, shape index: {}]   ;;  %s2466_s12 = inlined_call_operand.vmem [shape: f32[128,32], index: 12, kind: input, shape index: {}]   ;;  %s2467_s13 = inlined_call_operand.vmem [shape: f32[1,32], index: 13, kind: input, shape index: {}, may-alias: {3,7,9,13}]   ;;  %s2468_s14 = inlined_call_operand.vmem [shape: f32[2,8,32], index: 14, kind: output, shape index: {}]  }
   0x1   :  { %s19_s15 = sshll.u32 %s2454_s0, 4  ;;  %s20_s15 = int_to_ptr.vmem [resolvable:$true] %s19_s15 }
   0x2   :  { %s2086_s16 = scalar_lea.vmem %s20_s15, 16  ;;  %p2091_p1 = scmp.lt.s32.totalorder %s20_s15, %s20_s15 }
   0x3   :  { %p2087_p0 = scmp.ne.s32.totalorder %s20_s15, %s2086_s16  ;;  %p2092_p2 = scmp.lt.s32.totalorder %s2086_s16, %s2086_s16 }
   0x5   :  { %p2093_p3 = por %p2092_p2, %p2091_p1 }
   0x7   :  { %p2094_p4 = pnand %p2093_p3, %p2087_p0 }
   0x9   :  { %2097 = shalt.err (!%p2094_p4)  }
   0xa   :  { %s2108_s17 = smov [#allocation3]  }
   0xb   :  { %22 = dma.vmem_to_smem %s20_s15, 16, %s2108_s17, [#allocation2] }
   0xc   :  { %2102 = dma.done.wait [#allocation2], 16 }
   0xd   :  { %2103 = vsyncadd [#allocation2], 4294967280 }
   0xe   :  { %24 = sfence }
   0xf   :  { %s2202_s18 = smov 0  }
  0x10 LB: > { %s2208_s0 = sadd.s32 4294967295, %s2106_s18   ;;  %p1807_p5 = scmp.ge.s32.totalorder %s2106_s18, 1  ;;  %s2106_s18 = sphi %s2202_s18, %s30_s18  }
  0x11   : > { %p393_p6 = scmp.lt.s32.totalorder %s2106_s18, 3 }
  0x13   : > { %p394_p7 = pnand %p1807_p5, %p393_p6 }
  0x14   : > { %p435_p8 = scmp.lt.s32.totalorder (!%p394_p7), %s2208_s0, 1  ;;  %vm452_vm0 = vcmask (!%p394_p7), 261120   ;;  %v481_v7 = vld [vmem:[%s2458_s4] sm:$0xff] (!%p394_p7)  ;;  %v482_v8 = vld [vmem:[%s2458_s4 + $0x8] sm:$0xff] (!%p394_p7)  ;;  %v483_v9 = vld [vmem:[%s2458_s4 + $0x10] sm:$0xff] (!%p394_p7)  ;;  %v2109_v10 = vmov (!%p394_p7), 0.0|0.0   ;;  %v445_v30 = vlaneseq (!%p394_p7) }
  0x15   : > { %397 = sbr.rel (%p394_p7) target bundleno = 4198 (0x1066), region = 72  ;;  %2006 = vmatprep.subr.bf16.mxu0 (!%p394_p7), %v2109_v10  ;;  %v2007_v11 = vpack.c.bf16 (!%p394_p7), %v482_v8, %v481_v7  ;;  %v484_v12 = vld [vmem:[%s2458_s4 + $0x18] sm:$0xff] (!%p394_p7)  ;;  %vm2110_vm1 = vmmov (!%p394_p7), 0   ;;  %v2111_v13 = vmov (!%p394_p7), 0.0   ;;  %v1810_v19 = vld [vmem:[%s2456_s2] ss:$0 sm:$0xff] (!%p394_p7) }
  0x16   : > { %1897 = vmatprep.mubr.msk.f32.mxu0 (!%p394_p7), %vm2110_vm1, %v2111_v13  ;;  %1925 = vmatprep.subr.mxu1 (!%p394_p7), %v2111_v13  ;;  %v2010_v14 = vpack.c.bf16 (!%p394_p7), %v484_v12, %v483_v9  ;;  %v1811_v21 = vld [vmem:[%s2457_s3] ss:$0 sm:$0xff] (!%p394_p7)  ;;  %s2112_s25 = smov (!%p394_p7), 64   ;;  %s2113_s26 = smov (!%p394_p7), 96   ;;  %vm572_vm2 = vcmask (!%p394_p7), 64512   ;;  %v446_v31 = vand.u32 (!%p394_p7), 127, %v445_v30 }
  0x17   : > { %1927 = vmatprep.mubr.msk.f32.mxu1 (!%p394_p7), %vm2110_vm1, %v2111_v13  ;;  %2008 = vmatpush3.bf16.msra.mxu0 (!%p394_p7), %v2007_v11  ;;  %v1812_v24 = vld [vmem:[%s2459_s5] ss:$0 sm:$0xff] (!%p394_p7)  ;;  %s2114_s27 = smov (!%p394_p7), 88   ;;  %s444_s28 = sld [smem:[#allocation3 + %s2208_s0]] (!%p394_p7)  ;;  %v2115_v34 = vmov (!%p394_p7), -1e+09  }
  0x18   : > { %2009 = vmatprep.subr.bf16.mxu0 (!%p394_p7), %v2109_v10  ;;  %v565_v50 = vld [vmem:[%s2460_s6] sm:$0xff] (!%p394_p7)  ;;  %s2117_s15 = smov (!%p394_p7), 56   ;;  %s2118_s16 = smov (!%p394_p7), 80   ;;  %v566_v7 = vld [vmem:[%s2460_s6 + $0x8] sm:$0xff] (!%p394_p7) }
  0x19   : > { %1926 = vmatpush3.msra.mxu1 (!%p394_p7), %v565_v50  ;;  %s2119_s17 = smov (!%p394_p7), 112   ;;  %s2120_s21 = smov (!%p394_p7), 48  }
  0x1a   : > { %1935 = vmatprep.subr.mxu1 (!%p394_p7), %v2111_v13  ;;  %s2121_s22 = smov (!%p394_p7), 72  }
  0x1b   : > { %2011 = vmatpush3.bf16.msra.mxu0 (!%p394_p7), %v2010_v14 }
  0x1c   : > { %s2214_s19 = scalar_select %p435_p8, %s2208_s0, 1  ;;  %1900 = vmatprep.subr.mxu0 %v2111_v13 }
  0x1d   : > { %v447_v32 = vstv %s444_s28  ;;  %s2116_s0 = smov 120   ;;  %s2123_s28 = smov 40  }
  0x1e   : > { %s1808_s20 = sshll.u32 %s2214_s19, 3  ;;  %vm448_vm3 = vcmp.lt.s32.totalorder %v446_v31, %v447_v32 }
  0x1f   : > { %s438_s23 = scalar_lea.vmem %s2455_s1, %s1808_s20  ;;  %v2273_v35 = vsel %vm448_vm3, 0.0, %v2115_v34 }
  0x20   : > { %v2222_v0 = vld [vmem:[%s438_s23] sm:$0xff] }
  0x21   : > { %v453_v1 = vsel %vm452_vm0, %v2222_v0, 0.0 }
  0x22   : > { %454 = vadd.xlane.f32.xlu0 %v453_v1 }
  0xaf   : > { %v455_v2 = vpop.xlane.xlu0 %454 }
  0xb0   : > { %v457_v3 = vmul.f32 0.03125, %v455_v2 }
  0xb2   : > { %v458_v4 = vsub.f32 %v2222_v0, %v457_v3 }
  0xb4   : > { %v459_v5 = vmul.f32 %v458_v4, %v458_v4 }
  0xb6   : > { %v460_v6 = vsel %vm452_vm0, %v459_v5, 0.0 }
  0xb7   : > { %461 = vadd.xlane.f32.xlu0 %v460_v6 }
 0x144   : > { %v462_v15 = vpop.xlane.xlu0 %461 }
 0x145   : > { %v463_v16 = vmul.f32 0.03125, %v462_v15 }
 0x147   : > { %v464_v17 = vadd.f32 1e-05, %v463_v16 }
 0x149   : > { %2066 = vrsqrt.f32 %v464_v17 }
 0x153   : > { %v2067_v18 = vpop.eup %2066 }
 0x154   : > { %v466_v20 = vmul.f32 %v2067_v18, %v458_v4 }
 0x156   : > { %v473_v22 = vmul.f32 %v1810_v19, %v466_v20 }
 0x158   : > { %v480_v23 = vadd.f32 %v1811_v21, %v473_v22 }
 0x15a   : > { %1898 = vmatmul.mubr.msk.f32.vlgmr.msra.gmra.mrb[0].mxu0 %vm452_vm0, %v480_v23 }
 0x15b   : > { %1902 = vmatprep.mubr.msk.f32.mxu0 %vm2110_vm1, %v2111_v13 }
 0x22d   : > { %v561_v25 = vpop.f32.mrb[0].mxu0 }
 0x22e   : > { %v2260_v26 = vadd.f32 %v1812_v24, %v561_v25  ;;  %v1899_v27 = vpop.f32.mrb[1].mxu0 }
 0x230   : > { %660 = vrot.lane.b32.xlu0 %v2260_v26, %s2112_s25  ;;  %570 = vrot.lane.b32.xlu1 %v2260_v26, %s2113_s26  ;;  %s2122_s25 = smov 104  }
 0x234   : > { %738 = vrot.lane.b32.xlu0 %v2260_v26, %s2114_s27  ;;  %s442_s27 = scalar_lea.vmem %s2468_s14, %s1808_s20 }
 0x2a2   : > { %v571_v28 = vpop.permute.xlu1 %570  ;;  %v661_v29 = vpop.permute.xlu0 %660 }
 0x2a3   : > { %1901 = vmatpush3.xpose.msk.msra.mxu0 %vm572_vm2, %v571_v28 }
 0x2a4   : > { %1905 = vmatprep.subr.mxu0 %v2111_v13 }
 0x2a6   : > { %1903 = vmatmul.mubr.msk.f32.vlgmr.msra.gmra.mrb[2].mxu0 %vm572_vm2, %v2260_v26  ;;  %v739_v45 = vpop.permute.xlu0 %738 }
 0x2a7   : > { %1906 = vmatpush3.msra.mxu0 %v661_v29  ;;  %1907 = vmatprep.mubr.msk.f32.mxu0 %vm2110_vm1, %v2111_v13 }
 0x2a8   : > { %1910 = vmatprep.subr.mxu0 %v2111_v13 }
 0x379   : > { %v643_v33 = vpop.f32.mrb[2].mxu0 }
 0x37a   : > { %v647_v36 = vmul.f32 0.35355338, %v643_v33  ;;  %v1904_v37 = vpop.f32.mrb[3].mxu0  ;;  %v567_v33 = vld [vmem:[%s2460_s6 + $0x10] sm:$0xff] }
 0x37c   : > { %v648_v38 = vadd.f32 %v647_v36, %v2273_v35 }
 0x37e   : > { %v649_v39 = vsel %vm572_vm2, %v648_v38, -inf }
 0x37f   : > { %650 = vmax.xlane.f32.xlu1 %v649_v39 }
 0x40c   : > { %v651_v40 = vpop.xlane.xlu1 %650 }
 0x40d   : > { %v652_v41 = vsub.f32 %v648_v38, %v651_v40 }
 0x40f   : > { %v653_v42 = vmul.f32 1.442695, %v652_v41 }
 0x411   : > { %2068 = vpow2.f32 %v653_v42 }
 0x41b   : > { %v2069_v43 = vpop.eup %2068 }
 0x41c   : > { %v655_v44 = vsel %vm572_vm2, %v2069_v43, 0.0 }
 0x41d   : > { %656 = vadd.xlane.f32.xlu0 %v655_v44 }
 0x433   : > { %736 = vrot.lane.b32.xlu0 %v2260_v26, %s2116_s0 }
 0x4aa   : > { %v657_v46 = vpop.xlane.xlu0 %656 }
 0x4ab   : > { %2070 = vrcp.f32 %v657_v46 }
 0x4ae   : > { %v737_v49 = vpop.permute.xlu0 %736 }
 0x4b5   : > { %v2071_v47 = vpop.eup %2070 }
 0x4b6   : > { %v659_v48 = vmul.f32 %v2071_v47, %v2069_v43 }
 0x4b8   : > { %1908 = vmatmul.mubr.msk.f32.vlgmr.msra.gmra.mrb[4].mxu0 %vm572_vm2, %v659_v48 }
 0x4b9   : > { %1911 = vmatpush3.xpose.msk.msra.mxu0 %vm572_vm2, %v739_v45  ;;  %1912 = vmatprep.mubr.msk.f32.mxu0 %vm2110_vm1, %v2111_v13 }
 0x4ba   : > { %1915 = vmatprep.subr.mxu0 %v2111_v13 }
 0x4bc   : > { %1913 = vmatmul.mubr.msk.f32.vlgmr.msra.gmra.mrb[6].mxu0 %vm572_vm2, %v737_v49 }
 0x4bd   : > { %1917 = vmatprep.mubr.msk.f32.mxu0 %vm2110_vm1, %v2111_v13 }
 0x58b   : > { %v732_v51 = vpop.f32.mrb[4].mxu0 }
 0x58c   : > { %v1909_v52 = vpop.f32.mrb[5].mxu0  ;;  %1928 = vmatmul.mubr.msk.f32.vlgmr.msra.gmra.mrb[0].mxu1 %vm572_vm2, %v732_v51 }
 0x58d   : > { %1937 = vmatprep.mubr.msk.f32.mxu1 %vm2110_vm1, %v2111_v13 }
 0x58f   : > { %v810_v53 = vpop.f32.mrb[6].mxu0 }
 0x590   : > { %v814_v54 = vmul.f32 0.35355338, %v810_v53  ;;  %v1914_v55 = vpop.f32.mrb[7].mxu0 }
 0x592   : > { %v815_v56 = vadd.f32 %v814_v54, %v2273_v35 }
 0x594   : > { %v816_v57 = vsel %vm572_vm2, %v815_v56, -inf }
 0x595   : > { %817 = vmax.xlane.f32.xlu1 %v816_v57 }
 0x5a6   : > { %827 = vrot.lane.b32.xlu1 %v2260_v26, %s2117_s15 }
 0x5aa   : > { %1051 = vrot.lane.b32.xlu1 %v2260_v26, %s2118_s16 }
 0x5ae   : > { %1049 = vrot.lane.b32.xlu1 %v2260_v26, %s2119_s17 }
 0x622   : > { %v818_v58 = vpop.xlane.xlu1 %817 }
 0x623   : > { %v819_v59 = vsub.f32 %v815_v56, %v818_v58  ;;  %v1830_v58 = vld [vmem:[%s2461_s7] ss:$0 sm:$0xff] }
 0x625   : > { %v820_v60 = vmul.f32 1.442695, %v819_v59 }
 0x626   : > { %v828_v61 = vpop.permute.xlu1 %827 }
 0x627   : > { %2072 = vpow2.f32 %v820_v60  ;;  %1916 = vmatpush3.msra.mxu0 %v828_v61 }
 0x628   : > { %1920 = vmatprep.subr.mxu0 %v2111_v13 }
 0x62a   : > { %v1052_v8 = vpop.permute.xlu1 %1051 }
 0x62e   : > { %v1050_v12 = vpop.permute.xlu1 %1049 }
 0x631   : > { %v2073_v62 = vpop.eup %2072 }
 0x632   : > { %v822_v63 = vsel %vm572_vm2, %v2073_v62, 0.0 }
 0x633   : > { %823 = vadd.xlane.f32.xlu0 %v822_v63 }
 0x649   : > { %1140 = vrot.lane.b32.xlu0 %v2260_v26, %s2120_s21 }
 0x64d   : > { %1292 = vrot.lane.b32.xlu0 %v2260_v26, %s2121_s22 }
 0x65f   : > { %v1045_v1 = vpop.f32.mrb[0].mxu1 }
 0x660   : > { %v1929_v2 = vpop.f32.mrb[1].mxu1 }
 0x6c0   : > { %v824_v3 = vpop.xlane.xlu0 %823 }
 0x6c1   : > { %2074 = vrcp.f32 %v824_v3  ;;  %v1569_v3 = vld [vmem:[%s2464_s10] sm:$0xff] }
 0x6c4   : > { %v1141_v4 = vpop.permute.xlu0 %1140 }
 0x6c5   : > { %1936 = vmatpush3.msra.mxu1 %v1141_v4 }
 0x6c6   : > { %1945 = vmatprep.subr.mxu1 %v2111_v13 }
 0x6c8   : > { %v1293_v28 = vpop.permute.xlu0 %1292 }
 0x6cb   : > { %v2075_v5 = vpop.eup %2074 }
 0x6cc   : > { %v826_v6 = vmul.f32 %v2075_v5, %v2073_v62  ;;  %v1571_v5 = vld [vmem:[%s2464_s10 + $0x10] sm:$0xff] }
 0x6ce   : > { %1918 = vmatmul.mubr.msk.f32.vlgmr.msra.gmra.mrb[8].mxu0 %vm572_vm2, %v826_v6  ;;  %v1572_v6 = vld [vmem:[%s2464_s10 + $0x18] sm:$0xff] }
 0x6cf   : > { %1921 = vmatpush3.msra.mxu0 %v566_v7  ;;  %1922 = vmatprep.mubr.msk.f32.mxu0 %vm2110_vm1, %v2111_v13  ;;  %v2016_v7 = vpack.c.bf16 %v1572_v6, %v1571_v5 }
 0x6d0   : > { %1930 = vmatprep.subr.mxu0 %v2111_v13 }
 0x7a1   : > { %v899_v9 = vpop.f32.mrb[8].mxu0 }
 0x7a2   : > { %v1919_v11 = vpop.f32.mrb[9].mxu0  ;;  %1923 = vmatmul.mubr.msk.f32.vlgmr.msra.gmra.mrb[10].mxu0 %vm572_vm2, %v899_v9  ;;  %v1655_v9 = vld [vmem:[%s2466_s12 + $0x8] sm:$0xff] }
 0x7a3   : > { %1931 = vmatpush3.xpose.msk.msra.mxu0 %vm572_vm2, %v1052_v8  ;;  %1932 = vmatprep.mubr.msk.f32.mxu0 %vm2110_vm1, %v2111_v13  ;;  %v1654_v8 = vld [vmem:[%s2466_s12] sm:$0xff]  ;;  %v1656_v11 = vld [vmem:[%s2466_s12 + $0x10] sm:$0xff] }
 0x7a4   : > { %1940 = vmatprep.subr.mxu0 %v2111_v13 }
 0x7a6   : > { %1933 = vmatmul.mubr.msk.f32.vlgmr.msra.gmra.mrb[12].mxu0 %vm572_vm2, %v1050_v12  ;;  %v2019_v12 = vpack.c.bf16 %v1655_v9, %v1654_v8 }
 0x7a7   : > { %1942 = vmatprep.mubr.msk.f32.mxu0 %vm2110_vm1, %v2111_v13  ;;  %1941 = vmatpush3.msra.mxu0 %v567_v33 }
 0x7a8   : > { %1950 = vmatprep.subr.mxu0 %v2111_v13 }
 0x875   : > { %v972_v14 = vpop.f32.mrb[10].mxu0 }
 0x876   : > { %v1046_v15 = vadd.f32 %v1045_v1, %v972_v14  ;;  %v1924_v16 = vpop.f32.mrb[11].mxu0  ;;  %v1657_v14 = vld [vmem:[%s2466_s12 + $0x18] sm:$0xff] }
 0x877   : > { %v1658_v16 = vld [vmem:[%s2466_s12 + $0x20] sm:$0xff] }
 0x879   : > { %v1123_v17 = vpop.f32.mrb[12].mxu0 }
 0x87a   : > { %v1127_v18 = vmul.f32 0.35355338, %v1123_v17  ;;  %v1934_v19 = vpop.f32.mrb[13].mxu0  ;;  %v1659_v17 = vld [vmem:[%s2466_s12 + $0x28] sm:$0xff] }
 0x87b   : > { %v1660_v19 = vld [vmem:[%s2466_s12 + $0x30] sm:$0xff] }
 0x87c   : > { %v1128_v20 = vadd.f32 %v1127_v18, %v2273_v35  ;;  %v2025_v18 = vpack.c.bf16 %v1659_v17, %v1658_v16 }
 0x87e   : > { %v1129_v21 = vsel %vm572_vm2, %v1128_v20, -inf }
 0x87f   : > { %1130 = vmax.xlane.f32.xlu1 %v1129_v21 }
 0x90c   : > { %v1131_v22 = vpop.xlane.xlu1 %1130 }
 0x90d   : > { %v1132_v23 = vsub.f32 %v1128_v20, %v1131_v22  ;;  %v1661_v20 = vld [vmem:[%s2466_s12 + $0x38] sm:$0xff]  ;;  %v1662_v22 = vld [vmem:[%s2466_s12 + $0x40] sm:$0xff] }
 0x90e   : > { %v2028_v21 = vpack.c.bf16 %v1661_v20, %v1660_v19 }
 0x90f   : > { %v1133_v24 = vmul.f32 1.442695, %v1132_v23  ;;  %v1663_v23 = vld [vmem:[%s2466_s12 + $0x48] sm:$0xff] }
 0x911   : > { %2076 = vpow2.f32 %v1133_v24  ;;  %v2031_v24 = vpack.c.bf16 %v1663_v23, %v1662_v22 }
 0x91b   : > { %v2077_v25 = vpop.eup %2076 }
 0x91c   : > { %v1135_v27 = vsel %vm572_vm2, %v2077_v25, 0.0 }
 0x91d   : > { %1136 = vadd.xlane.f32.xlu0 %v1135_v27  ;;  %v1665_v27 = vld [vmem:[%s2466_s12 + $0x58] sm:$0xff] }
 0x933   : > { %1290 = vrot.lane.b32.xlu0 %v2260_v26, %s2122_s25 }
 0x9aa   : > { %v1137_v29 = vpop.xlane.xlu0 %1136 }
 0x9ab   : > { %2078 = vrcp.f32 %v1137_v29  ;;  %v1666_v29 = vld [vmem:[%s2466_s12 + $0x60] sm:$0xff] }
 0x9ae   : > { %v1291_v32 = vpop.permute.xlu0 %1290 }
 0x9b5   : > { %v2079_v30 = vpop.eup %2078 }
 0x9b6   : > { %v1139_v31 = vmul.f32 %v2079_v30, %v2077_v25  ;;  %v1664_v25 = vld [vmem:[%s2466_s12 + $0x50] sm:$0xff]  ;;  %v1667_v30 = vld [vmem:[%s2466_s12 + $0x68] sm:$0xff] }
 0x9b8   : > { %1938 = vmatmul.mubr.msk.f32.vlgmr.msra.gmra.mrb[2].mxu1 %vm572_vm2, %v1139_v31  ;;  %v2037_v31 = vpack.c.bf16 %v1667_v30, %v1666_v29 }
 0x9b9   : > { %1946 = vmatpush3.xpose.msk.msra.mxu1 %vm572_vm2, %v1293_v28  ;;  %1947 = vmatprep.mubr.msk.f32.mxu1 %vm2110_vm1, %v2111_v13  ;;  %v2034_v28 = vpack.c.bf16 %v1665_v27, %v1664_v25 }
 0x9ba   : > { %1955 = vmatprep.subr.mxu1 %v2111_v13 }
 0x9bc   : > { %1948 = vmatmul.mubr.msk.f32.vlgmr.msra.gmra.mrb[4].mxu1 %vm572_vm2, %v1291_v32 }
 0x9bd   : > { %1957 = vmatprep.mubr.msk.f32.mxu1 %vm2110_vm1, %v2111_v13 }
 0xa8b   : > { %v1212_v34 = vpop.f32.mrb[2].mxu1 }
 0xa8c   : > { %v1939_v36 = vpop.f32.mrb[3].mxu1  ;;  %1943 = vmatmul.mubr.msk.f32.vlgmr.msra.gmra.mrb[14].mxu0 %vm572_vm2, %v1212_v34 }
 0xa8d   : > { %1952 = vmatprep.mubr.msk.f32.mxu0 %vm2110_vm1, %v2111_v13 }
 0xa8f   : > { %v1364_v37 = vpop.f32.mrb[4].mxu1 }
 0xa90   : > { %v1368_v38 = vmul.f32 0.35355338, %v1364_v37  ;;  %v1949_v39 = vpop.f32.mrb[5].mxu1  ;;  %v1831_v37 = vld [vmem:[%s2462_s8] ss:$0 sm:$0xff] }
 0xa91   : > { %v1832_v39 = vld [vmem:[%s2463_s9] ss:$0 sm:$0xff] }
 0xa92   : > { %v1369_v40 = vadd.f32 %v1368_v38, %v2273_v35  ;;  %v568_v35 = vld [vmem:[%s2460_s6 + $0x18] sm:$0xff] }
 0xa93   : > { %1956 = vmatpush3.msra.mxu1 %v568_v35 }
 0xa94   : > { %v1370_v41 = vsel %vm572_vm2, %v1369_v40, -inf  ;;  %2018 = vmatprep.subr.bf16.mxu1 %v2109_v10 }
 0xa95   : > { %1371 = vmax.xlane.f32.xlu1 %v1370_v41 }
 0xaa6   : > { %1381 = vrot.lane.b32.xlu1 %v2260_v26, %s2123_s28 }
 0xb22   : > { %v1372_v42 = vpop.xlane.xlu1 %1371 }
 0xb23   : > { %v1373_v43 = vsub.f32 %v1369_v40, %v1372_v42  ;;  %v1669_v42 = vld [vmem:[%s2466_s12 + $0x78] sm:$0xff] }
 0xb25   : > { %v1374_v44 = vmul.f32 1.442695, %v1373_v43 }
 0xb26   : > { %v1382_v45 = vpop.permute.xlu1 %1381 }
 0xb27   : > { %2080 = vpow2.f32 %v1374_v44  ;;  %1951 = vmatpush3.msra.mxu0 %v1382_v45  ;;  %v1833_v44 = vld [vmem:[%s2465_s11] ss:$0 sm:$0xff] }
 0xb28   : > { %2012 = vmatprep.subr.bf16.mxu0 %v2109_v10 }
 0xb31   : > { %v2081_v46 = vpop.eup %2080 }
 0xb32   : > { %v1376_v47 = vsel %vm572_vm2, %v2081_v46, 0.0 }
 0xb33   : > { %1377 = vadd.xlane.f32.xlu0 %v1376_v47 }
 0xb5f   : > { %v1285_v26 = vpop.f32.mrb[14].mxu0 }
 0xb60   : > { %v1289_v48 = vadd.f32 %v1285_v26, %v1046_v15  ;;  %v1944_v49 = vpop.f32.mrb[15].mxu0  ;;  %v2022_v15 = vpack.c.bf16 %v1657_v14, %v1656_v11 }
 0xbc0   : > { %v1378_v50 = vpop.xlane.xlu0 %1377 }
 0xbc1   : > { %2082 = vrcp.f32 %v1378_v50 }
 0xbcb   : > { %v2083_v51 = vpop.eup %2082 }
 0xbcc   : > { %v1380_v52 = vmul.f32 %v2083_v51, %v2081_v46 }
 0xbce   : > { %1953 = vmatmul.mubr.msk.f32.vlgmr.msra.gmra.mrb[16].mxu0 %vm572_vm2, %v1380_v52 }
 0xbcf   : > { %1968 = vmatprep.mubr.msk.f32.mxu0 %vm2110_vm1, %v2111_v13 }
 0xca1   : > { %v1453_v53 = vpop.f32.mrb[16].mxu0 }
 0xca2   : > { %v1954_v54 = vpop.f32.mrb[17].mxu0  ;;  %1958 = vmatmul.mubr.msk.f32.vlgmr.msra.gmra.mrb[6].mxu1 %vm572_vm2, %v1453_v53 }
 0xca3   : > { %2003 = vmatprep.mubr.msk.f32.mxu1 %vm2110_vm1, %v2111_v13  ;;  %2020 = vmatpush3.bf16.msra.mxu1 %v2019_v12 }
 0xca4   : > { %2021 = vmatprep.subr.bf16.mxu1 %v2109_v10 }
 0xca7   : > { %2023 = vmatpush3.bf16.msra.mxu1 %v2022_v15 }
 0xca8   : > { %2024 = vmatprep.subr.bf16.mxu1 %v2109_v10 }
 0xcab   : > { %2026 = vmatpush3.bf16.msra.mxu1 %v2025_v18 }
 0xcac   : > { %2027 = vmatprep.subr.bf16.mxu1 %v2109_v10 }
 0xcaf   : > { %2029 = vmatpush3.bf16.msra.mxu1 %v2028_v21 }
 0xcb0   : > { %2030 = vmatprep.subr.bf16.mxu1 %v2109_v10 }
 0xcb3   : > { %2032 = vmatpush3.bf16.msra.mxu1 %v2031_v24 }
 0xcb4   : > { %2033 = vmatprep.subr.bf16.mxu1 %v2109_v10 }
 0xcb7   : > { %2035 = vmatpush3.bf16.msra.mxu1 %v2034_v28 }
 0xcb8   : > { %2036 = vmatprep.subr.bf16.mxu1 %v2109_v10 }
 0xcbb   : > { %2038 = vmatpush3.bf16.msra.mxu1 %v2037_v31 }
 0xcbc   : > { %2039 = vmatprep.subr.bf16.mxu1 %v2109_v10 }
 0xd75   : > { %v1526_v55 = vpop.f32.mrb[6].mxu1 }
 0xd76   : > { %v1530_v56 = vadd.f32 %v1526_v55, %v1289_v48  ;;  %v1959_v57 = vpop.f32.mrb[7].mxu1  ;;  %v1835_v48 = vld [vmem:[%s2467_s13] ss:$0 sm:$0xff] }
 0xd78   : > { %v1531_v59 = vadd.f32 %v1530_v56, %v2222_v0  ;;  %v1570_v0 = vld [vmem:[%s2464_s10 + $0x8] sm:$0xff] }
 0xd79   : > { %v2013_v4 = vpack.c.bf16 %v1570_v0, %v1569_v3 }
 0xd7a   : > { %v2357_v60 = vadd.f32 %v1830_v58, %v1531_v59 }
 0xd7b   : > { %2014 = vmatpush3.bf16.msra.mxu0 %v2013_v4 }
 0xd7c   : > { %v1542_v61 = vsel %vm452_vm0, %v2357_v60, 0.0  ;;  %2015 = vmatprep.subr.bf16.mxu0 %v2109_v10  ;;  %v1668_v10 = vld [vmem:[%s2466_s12 + $0x70] sm:$0xff] }
 0xd7d   : > { %1543 = vadd.xlane.f32.xlu1 %v1542_v61  ;;  %v2040_v43 = vpack.c.bf16 %v1669_v42, %v1668_v10 }
 0xd7f   : > { %2017 = vmatpush3.bf16.msra.mxu0 %v2016_v7  ;;  %2041 = vmatpush3.bf16.msra.mxu1 %v2040_v43 }
 0xe0a   : > { %v1544_v62 = vpop.xlane.xlu1 %1543 }
 0xe0b   : > { %v1545_v63 = vmul.f32 0.03125, %v1544_v62 }
 0xe0d   : > { %v1546_v1 = vsub.f32 %v2357_v60, %v1545_v63 }
 0xe0f   : > { %v1547_v13 = vmul.f32 %v1546_v1, %v1546_v1 }
 0xe11   : > { %v1548_v2 = vsel %vm452_vm0, %v1547_v13, 0.0 }
 0xe12   : > { %1549 = vadd.xlane.f32.xlu0 %v1548_v2 }
 0xe9f   : > { %v1550_v32 = vpop.xlane.xlu0 %1549 }
 0xea0   : > { %v1551_v33 = vmul.f32 0.03125, %v1550_v32 }
 0xea2   : > { %v1552_v34 = vadd.f32 1e-05, %v1551_v33 }
 0xea4   : > { %2084 = vrsqrt.f32 %v1552_v34 }
 0xeae   : > { %v2085_v36 = vpop.eup %2084 }
 0xeaf   : > { %v1554_v38 = vmul.f32 %v2085_v36, %v1546_v1 }
 0xeb1   : > { %v1561_v40 = vmul.f32 %v1831_v37, %v1554_v38 }
 0xeb3   : > { %v1568_v41 = vadd.f32 %v1832_v39, %v1561_v40 }
 0xeb5   : > { %1969 = vmatmul.mubr.msk.f32.vlgmr.msra.gmra.mrb[18].mxu0 %vm452_vm0, %v1568_v41 }
 0xf88   : > { %v1649_v45 = vpop.f32.mrb[18].mxu0 }
 0xf89   : > { %v1650_v46 = vadd.f32 %v1833_v44, %v1649_v45  ;;  %v1970_v47 = vpop.f32.mrb[19].mxu0 }
 0xf8b   : > { %v1653_v35 = vmax.f32 %v1650_v46, 0.0 }
 0xf8d   : > { %2004 = vmatmul.mubr.f32.vlgmr.msra.gmra.mrb[8].mxu1 %v1653_v35 }
0x1060   : > { %v1736_v26 = vpop.f32.mrb[8].mxu1 }
0x1061   : > { %v1740_v49 = vadd.f32 %v1736_v26, %v2357_v60  ;;  %v2005_v50 = vpop.f32.mrb[9].mxu1 }
0x1063   : > { %v1748_v51 = vadd.f32 %v1835_v48, %v1740_v49 }
0x1065   : > { %1749 = vst.msk [vmem:[%s442_s27] sm:$0xff] %vm452_vm0, %v1748_v51 }
0x1066 PF: > { %s30_s18 = sadd.s32 1, %s2106_s18  }
0x1067   : > { %p27_p9 = scmp.ge.s32.totalorder %s30_s18, 4  }
0x1069   :  { %29 = sbr.rel (!%p27_p9) target bundleno = 16 (0x10), region = 102 }

// kernel: bialinguanet_forward.9
= control target key start
LH: loop header
LB: loop body
LE: loop exit
PB: predicated region body
PF: predicated region fallthrough
CT: control target
= control target key end

     0   :  { %s4323_s0 = inlined_call_operand.vmem [shape: s32[2], index: 0, kind: input, shape index: {}]   ;;  %s4324_s2 = inlined_call_operand.vmem [shape: f32[2,8,32], index: 2, kind: input, shape index: {}]   ;;  %s4325_s3 = inlined_call_operand.vmem [shape: f32[2,8,32], index: 3, kind: input, shape index: {}]   ;;  %s4326_s4 = inlined_call_operand.vmem [shape: f32[1,32], index: 4, kind: input, shape index: {}, may-alias: {4,10,18}]   ;;  %s4327_s5 = inlined_call_operand.vmem [shape: f32[1,32], index: 5, kind: input, shape index: {}, may-alias: {5,9,11,13,17,19,23}]   ;;  %s4328_s6 = inlined_call_operand.vmem [shape: f32[32,96], index: 6, kind: input, shape index: {}]   ;;  %s4329_s7 = inlined_call_operand.vmem [shape: f32[1,96], index: 7, kind: input, shape index: {}]   ;;  %s4330_s8 = inlined_call_operand.vmem [shape: f32[32,32], index: 8, kind: input, shape index: {}]   ;;  %s4331_s9 = inlined_call_operand.vmem [shape: f32[1,32], index: 9, kind: input, shape index: {}, may-alias: {5,9,11,13,17,19,23}]   ;;  %s4332_s10 = inlined_call_operand.vmem [shape: f32[1,32], index: 10, kind: input, shape index: {}, may-alias: {4,10,18}]   ;;  %s4333_s11 = inlined_call_operand.vmem [shape: f32[1,32], index: 11, kind: input, shape index: {}, may-alias: {5,9,11,13,17,19,23}]   ;;  %s4334_s12 = inlined_call_operand.vmem [shape: f32[32,32], index: 12, kind: input, shape index: {}]   ;;  %s4335_s13 = inlined_call_operand.vmem [shape: f32[1,32], index: 13, kind: input, shape index: {}, may-alias: {5,9,11,13,17,19,23}]   ;;  %s4336_s14 = inlined_call_operand.vmem [shape: f32[32,64], index: 14, kind: input, shape index: {}]   ;;  %s4337_s15 = inlined_call_operand.vmem [shape: f32[1,64], index: 15, kind: input, shape index: {}]   ;;  %s4338_s16 = inlined_call_operand.vmem [shape: f32[32,32], index: 16, kind: input, shape index: {}]   ;;  %s4339_s17 = inlined_call_operand.vmem [shape: f32[1,32], index: 17, kind: input, shape index: {}, may-alias: {5,9,11,13,17,19,23}]   ;;  %s4340_s18 = inlined_call_operand.vmem [shape: f32[1,32], index: 18, kind: input, shape index: {}, may-alias: {4,10,18}]   ;;  %s4341_s19 = inlined_call_operand.vmem [shape: f32[1,32], index: 19, kind: input, shape index: {}, may-alias: {5,9,11,13,17,19,23}]   ;;  %s4342_s20 = inlined_call_operand.vmem [shape: f32[32,128], index: 20, kind: input, shape index: {}]   ;;  %s4343_s21 = inlined_call_operand.vmem [shape: f32[1,128], index: 21, kind: input, shape index: {}]   ;;  %s4344_s22 = inlined_call_operand.vmem [shape: f32[128,32], index: 22, kind: input, shape index: {}]   ;;  %s4345_s23 = inlined_call_operand.vmem [shape: f32[1,32], index: 23, kind: input, shape index: {}, may-alias: {5,9,11,13,17,19,23}]   ;;  %s4346_s24 = inlined_call_operand.vmem [shape: f32[2,8,32], index: 24, kind: output, shape index: {}]   ;;  %s4347_s1 = inlined_call_operand.vmem [shape: s32[2], index: 1, kind: input, shape index: {}]  }
   0x1   :  { %4357 = sst [smem:[#allocation6_spill]] %s4323_s0 }
   0x2   :  { %4358 = sst [smem:[#allocation7_spill]] %s4324_s2  ;;  %s4367_s27 = sld [smem:[#allocation6_spill]] }
   0x3   :  { %4359 = sst [smem:[#allocation8_spill]] %s4325_s3  ;;  %s33_s3 = sshll.u32 %s4347_s1, 4  ;;  %s34_s3 = int_to_ptr.vmem [resolvable:$true] %s33_s3 }
   0x4   :  { %4360 = sst [smem:[#allocation9_spill]] %s4326_s4 }
   0x5   :  { %4361 = sst [smem:[#allocation10_spill]] %s4327_s5 }
   0x6   :  { %4362 = sst [smem:[#allocation11_spill]] %s4328_s6 }
   0x7   :  { %4363 = sst [smem:[#allocation12_spill]] %s4329_s7 }
   0x8   :  { %4364 = sst [smem:[#allocation13_spill]] %s4330_s8 }
   0x9   :  { %4365 = sst [smem:[#allocation14_spill]] %s4331_s9 }
   0xa   :  { %4366 = sst [smem:[#allocation15_spill]] %s4341_s19  ;;  %s29_s19 = sshll.u32 %s4367_s27, 4  ;;  %s30_s19 = int_to_ptr.vmem [resolvable:$true] %s29_s19 }
   0xb   :  { %s3713_s29 = scalar_lea.vmem %s30_s19, 16  ;;  %p3718_p1 = scmp.lt.s32.totalorder %s30_s19, %s30_s19 }
   0xc   :  { %p3714_p0 = scmp.ne.s32.totalorder %s30_s19, %s3713_s29  ;;  %p3719_p2 = scmp.lt.s32.totalorder %s3713_s29, %s3713_s29 }
   0xe   :  { %p3720_p3 = por %p3719_p2, %p3718_p1 }
  0x10   :  { %p3721_p4 = pnand %p3720_p3, %p3714_p0 }
  0x12   :  { %3724 = shalt.err (!%p3721_p4)  }
  0x13   :  { %s3747_s0 = smov [#allocation3]   ;;  %s3725_s8 = scalar_lea.vmem %s34_s3, 16 }
  0x14   :  { %32 = dma.vmem_to_smem %s30_s19, 16, %s3747_s0, [#allocation2] }
  0x15   :  { %p3726_p5 = scmp.ne.s32.totalorder %s34_s3, %s3725_s8  ;;  %p3730_p6 = scmp.lt.s32.totalorder %s34_s3, %s34_s3 }
  0x16   :  { %p3731_p7 = scmp.lt.s32.totalorder %s3725_s8, %s3725_s8 }
  0x18   :  { %p3732_p8 = por %p3731_p7, %p3730_p6 }
  0x1a   :  { %p3733_p9 = pnand %p3732_p8, %p3726_p5 }
  0x1c   :  { %3736 = shalt.err (!%p3733_p9)  }
  0x1d   :  { %s3748_s30 = smov [#allocation4]  }
  0x1e   :  { %36 = dma.vmem_to_smem %s34_s3, 16, %s3748_s30, [#allocation2] }
  0x1f   :  { %3741 = dma.done.wait [#allocation2], 32 }
  0x20   :  { %3742 = vsyncadd [#allocation2], 4294967264 }
  0x21   :  { %38 = sfence }
  0x22   :  { %s3895_s1 = smov 0  }
  0x23 LB: > { %s3901_s19 = sadd.s32 4294967295, %s3745_s1   ;;  %p3263_p10 = scmp.ge.s32.totalorder %s3745_s1, 1  ;;  %s3745_s1 = sphi %s3895_s1, %s44_s1  }
  0x24   : > { %p632_p11 = scmp.lt.s32.totalorder %s3745_s1, 3 }
  0x26   : > { %p633_p12 = pnand %p3263_p10, %p632_p11 }
  0x27   : > { %p696_p13 = scmp.lt.s32.totalorder (!%p633_p12), %s3901_s19, 1  ;;  %vm726_vm0 = vcmask (!%p633_p12), 261120   ;;  %s4368_s2 = sld [smem:[#allocation7_spill]] (!%p633_p12)  ;;  %v3749_v10 = vmov (!%p633_p12), 0.0|0.0   ;;  %vm3750_vm1 = vmmov (!%p633_p12), 0   ;;  %v3751_v13 = vmov (!%p633_p12), 0.0  }
  0x28   : > { %636 = sbr.rel (%p633_p12) target bundleno = 6580 (0x19b4), region = 108  ;;  %s4369_s28 = sld [smem:[#allocation11_spill]] (!%p633_p12)  ;;  %3602 = vmatprep.subr.bf16.mxu0 (!%p633_p12), %v3749_v10  ;;  %3411 = vmatprep.mubr.msk.f32.mxu0 (!%p633_p12), %vm3750_vm1, %v3751_v13  ;;  %vm846_vm2 = vcmask (!%p633_p12), 64512   ;;  %v711_v31 = vlaneseq (!%p633_p12)  ;;  %v3755_v36 = vmov (!%p633_p12), -1e+09  }
  0x29   : > { %3419 = vmatprep.subr.mxu1 (!%p633_p12), %v3751_v13  ;;  %3421 = vmatprep.mubr.msk.f32.mxu1 (!%p633_p12), %vm3750_vm1, %v3751_v13  ;;  %s4370_s5 = sld [smem:[#allocation9_spill]] (!%p633_p12)  ;;  %s4371_s26 = sld [smem:[#allocation10_spill]] (!%p633_p12) }
  0x2a   : > { %s4372_s3 = sld [smem:[#allocation12_spill]] (!%p633_p12)  ;;  %s3752_s29 = smov (!%p633_p12), 120   ;;  %v3971_v32 = vand.u32 (!%p633_p12), 127, %v711_v31  ;;  %v714_v33 = vshrl.u32 (!%p633_p12), %v711_v31, 7 }
  0x2b   : > { %s3753_s0 = smov (!%p633_p12), 96   ;;  %s4354_s8 = smov (!%p633_p12), 88  }
  0x2c   : > { %s710_s30 = sld [smem:[#allocation3 + %s3901_s19]] (!%p633_p12)  ;;  %vm717_vm4 = vcmp.le.s32.totalorder (!%p633_p12), %v3971_v32, %v714_v33  ;;  %s3757_s9 = smov (!%p633_p12), 64  }
  0x2d   : > { %s4373_s27 = sld [smem:[#allocation13_spill]] (!%p633_p12)  ;;  %s3763_s7 = smov (!%p633_p12), 40  }
  0x2e   : > { %v755_v7 = vld [vmem:[%s4369_s28] sm:$0xff] (!%p633_p12)  ;;  %v756_v8 = vld [vmem:[%s4369_s28 + $0x8] sm:$0xff] (!%p633_p12)  ;;  %v757_v9 = vld [vmem:[%s4369_s28 + $0x10] sm:$0xff] (!%p633_p12) }
  0x2f   : > { %s697_s4 = scalar_select %p696_p13, %s3901_s19, 1  ;;  %v3603_v11 = vpack.c.bf16 %v756_v8, %v755_v7  ;;  %v758_v12 = vld [vmem:[%s4369_s28 + $0x18] sm:$0xff]  ;;  %v3267_v19 = vld [vmem:[%s4370_s5] ss:$0 sm:$0xff] }
  0x30   : > { %v3606_v14 = vpack.c.bf16 %v758_v12, %v757_v9  ;;  %v3268_v21 = vld [vmem:[%s4371_s26] ss:$0 sm:$0xff]  ;;  %s4353_s5 = smov 80   ;;  %s4380_s26 = smov 72  }
  0x31   : > { %s3907_s25 = sshll.u32 %s697_s4, 3  ;;  %3604 = vmatpush3.bf16.msra.mxu0 %v3603_v11  ;;  %v3269_v24 = vld [vmem:[%s4372_s3] ss:$0 sm:$0xff]  ;;  %s3756_s4 = smov 56  }
  0x32   : > { %s699_s6 = scalar_lea.vmem %s4368_s2, %s3907_s25  ;;  %3605 = vmatprep.subr.bf16.mxu0 %v3749_v10  ;;  %v715_v34 = vstv %s710_s30  ;;  %s4355_s2 = smov 112  }
  0x33   : > { %v3913_v0 = vld [vmem:[%s699_s6] sm:$0xff]  ;;  %vm716_vm3 = vcmp.lt.s32.totalorder %v3971_v32, %v715_v34  ;;  %v840_v57 = vld [vmem:[%s4373_s27 + $0x8] sm:$0xff]  ;;  %s3760_s30 = smov 48  }
  0x34   : > { %v727_v1 = vsel %vm726_vm0, %v3913_v0, 0.0  ;;  %vm718_vm5 = vmand %vm716_vm3, %vm717_vm4 }
  0x35   : > { %728 = vadd.xlane.f32.xlu0 %v727_v1  ;;  %3607 = vmatpush3.bf16.msra.mxu0 %v3606_v14  ;;  %v3976_v37 = vsel %vm718_vm5, 0.0, %v3755_v36 }
  0x36   : > { %3414 = vmatprep.subr.mxu0 %v3751_v13 }
  0xc2   : > { %v729_v2 = vpop.xlane.xlu0 %728 }
  0xc3   : > { %v731_v3 = vmul.f32 0.03125, %v729_v2 }
  0xc5   : > { %v732_v4 = vsub.f32 %v3913_v0, %v731_v3  ;;  %v839_v3 = vld [vmem:[%s4373_s27] sm:$0xff] }
  0xc7   : > { %v733_v5 = vmul.f32 %v732_v4, %v732_v4 }
  0xc9   : > { %v734_v6 = vsel %vm726_vm0, %v733_v5, 0.0 }
  0xca   : > { %735 = vadd.xlane.f32.xlu0 %v734_v6 }
 0x157   : > { %v736_v15 = vpop.xlane.xlu0 %735 }
 0x158   : > { %v737_v16 = vmul.f32 0.03125, %v736_v15 }
 0x15a   : > { %v738_v17 = vadd.f32 1e-05, %v737_v16 }
 0x15c   : > { %3675 = vrsqrt.f32 %v738_v17 }
 0x166   : > { %v3676_v18 = vpop.eup %3675 }
 0x167   : > { %v740_v20 = vmul.f32 %v3676_v18, %v732_v4 }
 0x169   : > { %v747_v22 = vmul.f32 %v3267_v19, %v740_v20 }
 0x16b   : > { %v754_v23 = vadd.f32 %v3268_v21, %v747_v22 }
 0x16d   : > { %3412 = vmatmul.mubr.msk.f32.vlgmr.msra.gmra.mrb[0].mxu0 %vm726_vm0, %v754_v23 }
 0x16e   : > { %3416 = vmatprep.mubr.msk.f32.mxu0 %vm3750_vm1, %v3751_v13 }
 0x240   : > { %v835_v25 = vpop.f32.mrb[0].mxu0 }
 0x241   : > { %v3951_v26 = vadd.f32 %v3269_v24, %v835_v25  ;;  %v3413_v27 = vpop.f32.mrb[1].mxu0 }
 0x243   : > { %1010 = vrot.lane.b32.xlu0 %v3951_v26, %s3752_s29  ;;  %844 = vrot.lane.b32.xlu1 %v3951_v26, %s3753_s0 }
 0x247   : > { %1012 = vrot.lane.b32.xlu1 %v3951_v26, %s4354_s8 }
 0x2b5   : > { %v845_v28 = vpop.permute.xlu1 %844  ;;  %v1011_v30 = vpop.permute.xlu0 %1010 }
 0x2b6   : > { %3415 = vmatpush3.xpose.msk.msra.mxu0 %vm846_vm2, %v845_v28 }
 0x2b7   : > { %3424 = vmatprep.subr.mxu0 %v3751_v13 }
 0x2b9   : > { %3417 = vmatmul.mubr.msk.f32.vlgmr.msra.gmra.mrb[2].mxu0 %vm846_vm2, %v3951_v26  ;;  %v1013_v29 = vpop.permute.xlu1 %1012 }
 0x2ba   : > { %3425 = vmatpush3.xpose.msk.msra.mxu0 %vm846_vm2, %v1013_v29  ;;  %3426 = vmatprep.mubr.msk.f32.mxu0 %vm3750_vm1, %v3751_v13 }
 0x2bb   : > { %3434 = vmatprep.subr.mxu0 %v3751_v13 }
 0x2bd   : > { %3427 = vmatmul.mubr.msk.f32.vlgmr.msra.gmra.mrb[4].mxu0 %vm846_vm2, %v1011_v30 }
 0x2be   : > { %3436 = vmatprep.mubr.msk.f32.mxu0 %vm3750_vm1, %v3751_v13  ;;  %3435 = vmatpush3.msra.mxu0 %v840_v57 }
 0x2bf   : > { %3444 = vmatprep.subr.mxu0 %v3751_v13 }
 0x38c   : > { %v917_v35 = vpop.f32.mrb[2].mxu0 }
 0x38d   : > { %v921_v38 = vmul.f32 0.35355338, %v917_v35  ;;  %v3418_v39 = vpop.f32.mrb[3].mxu0  ;;  %v841_v35 = vld [vmem:[%s4373_s27 + $0x10] sm:$0xff] }
 0x38f   : > { %v922_v40 = vadd.f32 %v921_v38, %v3976_v37 }
 0x390   : > { %v1084_v41 = vpop.f32.mrb[4].mxu0 }
 0x391   : > { %v1088_v42 = vmul.f32 0.35355338, %v1084_v41  ;;  %v3428_v43 = vpop.f32.mrb[5].mxu0  ;;  %v923_v44 = vsel %vm846_vm2, %v922_v40, -inf }
 0x392   : > { %924 = vmax.xlane.f32.xlu1 %v923_v44 }
 0x393   : > { %v1089_v45 = vadd.f32 %v1088_v42, %v3976_v37 }
 0x395   : > { %v1090_v46 = vsel %vm846_vm2, %v1089_v45, -inf }
 0x396   : > { %1091 = vmax.xlane.f32.xlu0 %v1090_v46 }
 0x3ac   : > { %1101 = vrot.lane.b32.xlu0 %v3951_v26, %s3756_s4  ;;  %s4351_s4 = smov 104  }
 0x41f   : > { %v925_v47 = vpop.xlane.xlu1 %924 }
 0x420   : > { %v926_v48 = vsub.f32 %v922_v40, %v925_v47 }
 0x422   : > { %v927_v49 = vmul.f32 1.442695, %v926_v48 }
 0x423   : > { %v1092_v50 = vpop.xlane.xlu0 %1091 }
 0x424   : > { %3677 = vpow2.f32 %v927_v49  ;;  %v1093_v51 = vsub.f32 %v1089_v45, %v1092_v50  ;;  %v842_v50 = vld [vmem:[%s4373_s27 + $0x18] sm:$0xff] }
 0x426   : > { %v1094_v52 = vmul.f32 1.442695, %v1093_v51 }
 0x427   : > { %v1102_v63 = vpop.permute.xlu0 %1101 }
 0x428   : > { %3679 = vpow2.f32 %v1094_v52 }
 0x42e   : > { %v3678_v53 = vpop.eup %3677 }
 0x42f   : > { %v929_v54 = vsel %vm846_vm2, %v3678_v53, 0.0 }
 0x430   : > { %930 = vadd.xlane.f32.xlu1 %v929_v54 }
 0x432   : > { %v3680_v55 = vpop.eup %3679 }
 0x433   : > { %v1096_v56 = vsel %vm846_vm2, %v3680_v55, 0.0 }
 0x434   : > { %1097 = vadd.xlane.f32.xlu1 %v1096_v56 }
 0x445   : > { %934 = vrot.lane.b32.xlu1 %v3951_v26, %s3757_s9  ;;  %s4350_s9 = smov 72  }
 0x449   : > { %1325 = vrot.lane.b32.xlu1 %v3951_v26, %s4353_s5  ;;  %s4375_s5 = sld [smem:[#allocation8_spill]] }
 0x44d   : > { %1323 = vrot.lane.b32.xlu1 %v3951_v26, %s4355_s2 }
 0x4bd   : > { %v931_v58 = vpop.xlane.xlu1 %930 }
 0x4be   : > { %3681 = vrcp.f32 %v931_v58 }
 0x4c1   : > { %v1098_v59 = vpop.xlane.xlu1 %1097 }
 0x4c2   : > { %3683 = vrcp.f32 %v1098_v59 }
 0x4c5   : > { %v935_v60 = vpop.permute.xlu1 %934 }
 0x4c6   : > { %3420 = vmatpush3.msra.mxu1 %v935_v60 }
 0x4c7   : > { %3429 = vmatprep.subr.mxu1 %v3751_v13 }
 0x4c8   : > { %v3682_v61 = vpop.eup %3681 }
 0x4c9   : > { %v933_v62 = vmul.f32 %v3682_v61, %v3678_v53  ;;  %v1326_v6 = vpop.permute.xlu1 %1325 }
 0x4cb   : > { %3422 = vmatmul.mubr.msk.f32.vlgmr.msra.gmra.mrb[0].mxu1 %vm846_vm2, %v933_v62 }
 0x4cc   : > { %v3684_v1 = vpop.eup %3683  ;;  %3430 = vmatpush3.msra.mxu1 %v1102_v63  ;;  %3431 = vmatprep.mubr.msk.f32.mxu1 %vm3750_vm1, %v3751_v13 }
 0x4cd   : > { %v1100_v2 = vmul.f32 %v3684_v1, %v3680_v55  ;;  %3439 = vmatprep.subr.mxu1 %v3751_v13  ;;  %v1324_v9 = vpop.permute.xlu1 %1323 }
 0x4cf   : > { %3432 = vmatmul.mubr.msk.f32.vlgmr.msra.gmra.mrb[2].mxu1 %vm846_vm2, %v1100_v2 }
 0x4d0   : > { %3441 = vmatprep.mubr.msk.f32.mxu1 %vm3750_vm1, %v3751_v13  ;;  %3440 = vmatpush3.msra.mxu1 %v839_v3 }
 0x4d1   : > { %3449 = vmatprep.subr.mxu1 %v3751_v13 }
 0x59e   : > { %v1006_v4 = vpop.f32.mrb[0].mxu1 }
 0x59f   : > { %v3423_v5 = vpop.f32.mrb[1].mxu1  ;;  %3442 = vmatmul.mubr.msk.f32.vlgmr.msra.gmra.mrb[4].mxu1 %vm846_vm2, %v1006_v4 }
 0x5a0   : > { %3451 = vmatprep.mubr.msk.f32.mxu1 %vm3750_vm1, %v3751_v13 }
 0x5a2   : > { %v1173_v7 = vpop.f32.mrb[2].mxu1 }
 0x5a3   : > { %v3433_v8 = vpop.f32.mrb[3].mxu1  ;;  %3437 = vmatmul.mubr.msk.f32.vlgmr.msra.gmra.mrb[6].mxu0 %vm846_vm2, %v1173_v7  ;;  %v1843_v7 = vld [vmem:[%s4334_s12] sm:$0xff] }
 0x5a4   : > { %3445 = vmatpush3.xpose.msk.msra.mxu0 %vm846_vm2, %v1326_v6  ;;  %3446 = vmatprep.mubr.msk.f32.mxu0 %vm3750_vm1, %v3751_v13 }
 0x5a5   : > { %3454 = vmatprep.subr.mxu0 %v3751_v13 }
 0x5a7   : > { %3447 = vmatmul.mubr.msk.f32.vlgmr.msra.gmra.mrb[8].mxu0 %vm846_vm2, %v1324_v9  ;;  %v1845_v9 = vld [vmem:[%s4334_s12 + $0x10] sm:$0xff] }
 0x5a8   : > { %3456 = vmatprep.mubr.msk.f32.mxu0 %vm3750_vm1, %v3751_v13  ;;  %3455 = vmatpush3.msra.mxu0 %v841_v35 }
 0x5a9   : > { %3464 = vmatprep.subr.mxu0 %v3751_v13 }
 0x672   : > { %v1319_v11 = vpop.f32.mrb[4].mxu1 }
 0x673   : > { %v3443_v12 = vpop.f32.mrb[5].mxu1 }
 0x676   : > { %v1246_v14 = vpop.f32.mrb[6].mxu0 }
 0x677   : > { %v1320_v15 = vadd.f32 %v1319_v11, %v1246_v14  ;;  %v3438_v16 = vpop.f32.mrb[7].mxu0  ;;  %v1846_v11 = vld [vmem:[%s4334_s12 + $0x18] sm:$0xff] }
 0x678   : > { %v3612_v12 = vpack.c.bf16 %v1846_v11, %v1845_v9 }
 0x67a   : > { %v1397_v17 = vpop.f32.mrb[8].mxu0 }
 0x67b   : > { %v1401_v18 = vmul.f32 0.35355338, %v1397_v17  ;;  %v3448_v19 = vpop.f32.mrb[9].mxu0 }
 0x67d   : > { %v1402_v20 = vadd.f32 %v1401_v18, %v3976_v37  ;;  %v3288_v18 = vld [vmem:[%s4332_s10] ss:$0 sm:$0xff] }
 0x67f   : > { %v1403_v21 = vsel %vm846_vm2, %v1402_v20, -inf }
 0x680   : > { %1404 = vmax.xlane.f32.xlu1 %v1403_v21  ;;  %v1928_v21 = vld [vmem:[%s4336_s14 + $0x8] sm:$0xff] }
 0x691   : > { %1414 = vrot.lane.b32.xlu1 %v3951_v26, %s3760_s30  ;;  %s4381_s30 = sld [smem:[#allocation15_spill]] }
 0x695   : > { %1564 = vrot.lane.b32.xlu1 %v3951_v26, %s4351_s4  ;;  %s703_s4 = scalar_lea.vmem %s4375_s5, %s3907_s25  ;;  %s4378_s5 = smov 80  }
 0x70d   : > { %v1405_v22 = vpop.xlane.xlu1 %1404 }
 0x70e   : > { %v1406_v23 = vsub.f32 %v1402_v20, %v1405_v22  ;;  %v1927_v20 = vld [vmem:[%s4336_s14] sm:$0xff] }
 0x70f   : > { %v3289_v22 = vld [vmem:[%s4333_s11] ss:$0 sm:$0xff] }
 0x710   : > { %v1407_v24 = vmul.f32 1.442695, %v1406_v23 }
 0x711   : > { %v1415_v25 = vpop.permute.xlu1 %1414 }
 0x712   : > { %3685 = vpow2.f32 %v1407_v24  ;;  %3450 = vmatpush3.msra.mxu1 %v1415_v25  ;;  %v3615_v24 = vpack.c.bf16 %v1928_v21, %v1927_v20 }
 0x713   : > { %3459 = vmatprep.subr.mxu1 %v3751_v13 }
 0x715   : > { %v1565_v34 = vpop.permute.xlu1 %1564 }
 0x71c   : > { %v3686_v27 = vpop.eup %3685 }
 0x71d   : > { %v1409_v28 = vsel %vm846_vm2, %v3686_v27, 0.0 }
 0x71e   : > { %1410 = vadd.xlane.f32.xlu0 %v1409_v28  ;;  %v1930_v28 = vld [vmem:[%s4336_s14 + $0x18] sm:$0xff] }
 0x734   : > { %1566 = vrot.lane.b32.xlu0 %v3951_v26, %s4350_s9 }
 0x7ab   : > { %v1411_v29 = vpop.xlane.xlu0 %1410 }
 0x7ac   : > { %3687 = vrcp.f32 %v1411_v29 }
 0x7af   : > { %v1567_v33 = vpop.permute.xlu0 %1566 }
 0x7b6   : > { %v3688_v30 = vpop.eup %3687 }
 0x7b7   : > { %v1413_v31 = vmul.f32 %v3688_v30, %v3686_v27  ;;  %v1929_v27 = vld [vmem:[%s4336_s14 + $0x10] sm:$0xff]  ;;  %v709_v30 = vld [vmem:[%s703_s4] sm:$0xff]  ;;  %s4379_s4 = smov 104  }
 0x7b8   : > { %v3618_v29 = vpack.c.bf16 %v1930_v28, %v1929_v27 }
 0x7b9   : > { %3452 = vmatmul.mubr.msk.f32.vlgmr.msra.gmra.mrb[6].mxu1 %vm846_vm2, %v1413_v31  ;;  %v3290_v31 = vld [vmem:[%s4335_s13] ss:$0 sm:$0xff] }
 0x7ba   : > { %3460 = vmatpush3.xpose.msk.msra.mxu1 %vm846_vm2, %v1567_v33  ;;  %3461 = vmatprep.mubr.msk.f32.mxu1 %vm3750_vm1, %v3751_v13 }
 0x7bb   : > { %3469 = vmatprep.subr.mxu1 %v3751_v13 }
 0x7bd   : > { %3462 = vmatmul.mubr.msk.f32.vlgmr.msra.gmra.mrb[8].mxu1 %vm846_vm2, %v1565_v34 }
 0x7be   : > { %3471 = vmatprep.mubr.msk.f32.mxu1 %vm3750_vm1, %v3751_v13  ;;  %3470 = vmatpush3.msra.mxu1 %v842_v50 }
 0x7bf   : > { %3501 = vmatprep.subr.mxu1 %v3751_v13 }
 0x88c   : > { %v1486_v38 = vpop.f32.mrb[6].mxu1 }
 0x88d   : > { %v3453_v39 = vpop.f32.mrb[7].mxu1  ;;  %3457 = vmatmul.mubr.msk.f32.vlgmr.msra.gmra.mrb[10].mxu0 %vm846_vm2, %v1486_v38  ;;  %v3292_v38 = vld [vmem:[%s4337_s15] ss:$0 sm:$0xff] }
 0x88e   : > { %3466 = vmatprep.mubr.msk.f32.mxu0 %vm3750_vm1, %v3751_v13 }
 0x890   : > { %v1638_v40 = vpop.f32.mrb[8].mxu1 }
 0x891   : > { %v1642_v41 = vmul.f32 0.35355338, %v1638_v40  ;;  %v3463_v42 = vpop.f32.mrb[9].mxu1 }
 0x893   : > { %v1643_v43 = vadd.f32 %v1642_v41, %v3976_v37 }
 0x895   : > { %v1644_v44 = vsel %vm846_vm2, %v1643_v43, -inf }
 0x896   : > { %1645 = vmax.xlane.f32.xlu1 %v1644_v44 }
 0x923   : > { %v1646_v45 = vpop.xlane.xlu1 %1645 }
 0x924   : > { %v1647_v46 = vsub.f32 %v1643_v43, %v1646_v45 }
 0x926   : > { %v1648_v47 = vmul.f32 1.442695, %v1647_v46 }
 0x928   : > { %3689 = vpow2.f32 %v1648_v47 }
 0x932   : > { %v3690_v48 = vpop.eup %3689 }
 0x933   : > { %v1650_v49 = vsel %vm846_vm2, %v3690_v48, 0.0 }
 0x934   : > { %1651 = vadd.xlane.f32.xlu0 %v1650_v49 }
 0x94a   : > { %1655 = vrot.lane.b32.xlu0 %v3951_v26, %s3763_s7  ;;  %s4374_s7 = sld [smem:[#allocation14_spill]] }
 0x950   : > { %v3287_v61 = vld [vmem:[%s4374_s7] ss:$0 sm:$0xff] }
 0x960   : > { %v1559_v37 = vpop.f32.mrb[10].mxu0 }
 0x961   : > { %v1563_v51 = vadd.f32 %v1559_v37, %v1320_v15  ;;  %v3458_v52 = vpop.f32.mrb[11].mxu0 }
 0x9c1   : > { %v1652_v53 = vpop.xlane.xlu0 %1651 }
 0x9c2   : > { %3691 = vrcp.f32 %v1652_v53 }
 0x9c5   : > { %v1656_v54 = vpop.permute.xlu0 %1655 }
 0x9c6   : > { %3465 = vmatpush3.msra.mxu0 %v1656_v54 }
 0x9c7   : > { %3608 = vmatprep.subr.bf16.mxu0 %v3749_v10 }
 0x9cc   : > { %v3692_v55 = vpop.eup %3691 }
 0x9cd   : > { %v1654_v56 = vmul.f32 %v3692_v55, %v3690_v48 }
 0x9cf   : > { %3467 = vmatmul.mubr.msk.f32.vlgmr.msra.gmra.mrb[12].mxu0 %vm846_vm2, %v1654_v56 }
 0x9d0   : > { %3482 = vmatprep.mubr.msk.f32.mxu0 %vm3750_vm1, %v3751_v13 }
 0xaa2   : > { %v1727_v26 = vpop.f32.mrb[12].mxu0 }
 0xaa3   : > { %v3468_v57 = vpop.f32.mrb[13].mxu0  ;;  %3472 = vmatmul.mubr.msk.f32.vlgmr.msra.gmra.mrb[10].mxu1 %vm846_vm2, %v1727_v26 }
 0xaa4   : > { %3503 = vmatprep.mubr.msk.f32.mxu1 %vm3750_vm1, %v3751_v13 }
 0xb76   : > { %v1800_v58 = vpop.f32.mrb[10].mxu1 }
 0xb77   : > { %v1804_v59 = vadd.f32 %v1800_v58, %v1563_v51  ;;  %v3473_v60 = vpop.f32.mrb[11].mxu1 }
 0xb79   : > { %v1805_v62 = vadd.f32 %v1804_v59, %v3913_v0  ;;  %v1844_v0 = vld [vmem:[%s4334_s12 + $0x8] sm:$0xff] }
 0xb7a   : > { %v3609_v8 = vpack.c.bf16 %v1844_v0, %v1843_v7 }
 0xb7b   : > { %v4060_v63 = vadd.f32 %v3287_v61, %v1805_v62 }
 0xb7c   : > { %3610 = vmatpush3.bf16.msra.mxu0 %v3609_v8  ;;  %v2011_v8 = vld [vmem:[%s4338_s16] sm:$0xff] }
 0xb7d   : > { %v1816_v1 = vsel %vm726_vm0, %v4060_v63, 0.0  ;;  %3611 = vmatprep.subr.bf16.mxu0 %v3749_v10 }
 0xb7e   : > { %1817 = vadd.xlane.f32.xlu1 %v1816_v1 }
 0xb80   : > { %3613 = vmatpush3.bf16.msra.mxu0 %v3612_v12 }
 0xb81   : > { %3614 = vmatprep.subr.bf16.mxu0 %v3749_v10 }
 0xc0b   : > { %v1818_v2 = vpop.xlane.xlu1 %1817 }
 0xc0c   : > { %v1819_v3 = vmul.f32 0.03125, %v1818_v2 }
 0xc0e   : > { %v1820_v4 = vsub.f32 %v4060_v63, %v1819_v3 }
 0xc10   : > { %v1821_v5 = vmul.f32 %v1820_v4, %v1820_v4 }
 0xc12   : > { %v1822_v6 = vsel %vm726_vm0, %v1821_v5, 0.0 }
 0xc13   : > { %1823 = vadd.xlane.f32.xlu1 %v1822_v6 }
 0xca0   : > { %v1824_v14 = vpop.xlane.xlu1 %1823 }
 0xca1   : > { %v1825_v15 = vmul.f32 0.03125, %v1824_v14 }
 0xca3   : > { %v1826_v16 = vadd.f32 1e-05, %v1825_v15 }
 0xca5   : > { %3693 = vrsqrt.f32 %v1826_v16 }
 0xcaf   : > { %v3694_v17 = vpop.eup %3693 }
 0xcb0   : > { %v1828_v19 = vmul.f32 %v3694_v17, %v1820_v4  ;;  %v2012_v4 = vld [vmem:[%s4338_s16 + $0x8] sm:$0xff] }
 0xcb2   : > { %v1835_v23 = vmul.f32 %v3288_v18, %v1828_v19 }
 0xcb4   : > { %v1842_v25 = vadd.f32 %v3289_v22, %v1835_v23 }
 0xcb6   : > { %3483 = vmatmul.mubr.msk.f32.vlgmr.msra.gmra.mrb[14].mxu0 %vm726_vm0, %v1842_v25 }
 0xcb7   : > { %3616 = vmatpush3.bf16.msra.mxu0 %v3615_v24  ;;  %3493 = vmatprep.mubr.msk.f32.mxu0 %vm3750_vm1, %v3751_v13 }
 0xcb8   : > { %3617 = vmatprep.subr.bf16.mxu0 %v3749_v10 }
 0xcbb   : > { %3619 = vmatpush3.bf16.msra.mxu0 %v3618_v29 }
 0xcbc   : > { %3496 = vmatprep.subr.mxu0 %v3751_v13 }
 0xcbe   : > { %3494 = vmatmul.mubr.msk.f32.vlgmr.msra.gmra.mrb[16].mxu0 %vm726_vm0, %v709_v30 }
 0xcbf   : > { %3498 = vmatprep.mubr.msk.f32.mxu0 %vm3750_vm1, %v3751_v13 }
 0xd89   : > { %v1923_v33 = vpop.f32.mrb[14].mxu0 }
 0xd8a   : > { %v4113_v34 = vadd.f32 %v3290_v31, %v1923_v33  ;;  %v3484_v35 = vpop.f32.mrb[15].mxu0 }
 0xd8c   : > { %2180 = vrot.lane.b32.xlu0 %v4113_v34, %s3752_s29 }
 0xd91   : > { %v2007_v39 = vpop.f32.mrb[16].mxu0 }
 0xd92   : > { %v4120_v40 = vadd.f32 %v3292_v38, %v2007_v39  ;;  %v3495_v41 = vpop.f32.mrb[17].mxu0 }
 0xd94   : > { %2182 = vrot.lane.b32.xlu1 %v4120_v40, %s3752_s29  ;;  %3497 = vmatpush3.xpose.msk.msra.mxu0 %vm846_vm2, %v4120_v40  ;;  %s720_s29 = sld [smem:[#allocation4 + %s3901_s19]]  ;;  %s4376_s19 = smov 112  }
 0xd95   : > { %3506 = vmatprep.subr.mxu0 %v3751_v13 }
 0xd97   : > { %3499 = vmatmul.mubr.msk.f32.vlgmr.msra.gmra.mrb[18].mxu0 %vm846_vm2, %v4113_v34 }
 0xd98   : > { %3508 = vmatprep.mubr.msk.f32.mxu0 %vm3750_vm1, %v3751_v13 }
 0xd9a   : > { %v721_v44 = vstv %s720_s29 }
 0xd9b   : > { %vm722_vm6 = vcmp.lt.s32.totalorder %v3971_v32, %v721_v44 }
 0xd9c   : > { %v4139_v46 = vsel %vm722_vm6, 0.0, %v3755_v36 }
 0xdfe   : > { %v2181_v43 = vpop.permute.xlu0 %2180 }
 0xe06   : > { %v2183_v42 = vpop.permute.xlu1 %2182 }
 0xe07   : > { %3507 = vmatpush3.xpose.msk.msra.mxu0 %vm846_vm2, %v2183_v42 }
 0xe08   : > { %3516 = vmatprep.subr.mxu0 %v3751_v13 }
 0xe0a   : > { %3509 = vmatmul.mubr.msk.f32.vlgmr.msra.gmra.mrb[20].mxu0 %vm846_vm2, %v2181_v43  ;;  %v2013_v43 = vld [vmem:[%s4338_s16 + $0x10] sm:$0xff] }
 0xe0b   : > { %3518 = vmatprep.mubr.msk.f32.mxu0 %vm3750_vm1, %v3751_v13  ;;  %3517 = vmatpush3.msra.mxu0 %v2012_v4 }
 0xe0c   : > { %3526 = vmatprep.subr.mxu0 %v3751_v13 }
 0xe6a   : > { %v2087_v45 = vpop.f32.mrb[18].mxu0 }
 0xe6b   : > { %v2091_v47 = vmul.f32 0.35355338, %v2087_v45  ;;  %v3500_v48 = vpop.f32.mrb[19].mxu0 }
 0xe6d   : > { %v2092_v49 = vadd.f32 %v2091_v47, %v4139_v46 }
 0xe6f   : > { %v2093_v50 = vsel %vm846_vm2, %v2092_v49, -inf }
 0xe70   : > { %2094 = vmax.xlane.f32.xlu0 %v2093_v50 }
 0xedd   : > { %v2254_v37 = vpop.f32.mrb[20].mxu0 }
 0xede   : > { %v2258_v51 = vmul.f32 0.35355338, %v2254_v37  ;;  %v3510_v52 = vpop.f32.mrb[21].mxu0 }
 0xee0   : > { %v2259_v53 = vadd.f32 %v2258_v51, %v4139_v46 }
 0xee2   : > { %v2260_v54 = vsel %vm846_vm2, %v2259_v53, -inf }
 0xee3   : > { %2261 = vmax.xlane.f32.xlu1 %v2260_v54 }
 0xef4   : > { %2104 = vrot.lane.b32.xlu1 %v4120_v40, %s3753_s0  ;;  %s4377_s0 = smov 88  }
 0xef8   : > { %2495 = vrot.lane.b32.xlu1 %v4120_v40, %s4376_s19 }
 0xefc   : > { %2493 = vrot.lane.b32.xlu1 %v4113_v34, %s4376_s19 }
 0xefd   : > { %v2095_v32 = vpop.xlane.xlu0 %2094 }
 0xefe   : > { %v2096_v36 = vsub.f32 %v2092_v49, %v2095_v32 }
 0xf00   : > { %v2097_v55 = vmul.f32 1.442695, %v2096_v36  ;;  %v2014_v36 = vld [vmem:[%s4338_s16 + $0x18] sm:$0xff] }
 0xf02   : > { %3695 = vpow2.f32 %v2097_v55 }
 0xf0c   : > { %v3696_v56 = vpop.eup %3695 }
 0xf0d   : > { %v2099_v26 = vsel %vm846_vm2, %v3696_v56, 0.0 }
 0xf0e   : > { %2100 = vadd.xlane.f32.xlu0 %v2099_v26 }
 0xf70   : > { %v2262_v57 = vpop.xlane.xlu1 %2261 }
 0xf71   : > { %v2263_v58 = vsub.f32 %v2259_v53, %v2262_v57 }
 0xf73   : > { %v2264_v59 = vmul.f32 1.442695, %v2263_v58 }
 0xf74   : > { %v2105_v60 = vpop.permute.xlu1 %2104 }
 0xf75   : > { %3697 = vpow2.f32 %v2264_v59  ;;  %3502 = vmatpush3.msra.mxu1 %v2105_v60 }
 0xf76   : > { %3511 = vmatprep.subr.mxu1 %v3751_v13 }
 0xf78   : > { %v2496_v12 = vpop.permute.xlu1 %2495 }
 0xf7c   : > { %v2494_v16 = vpop.permute.xlu1 %2493 }
 0xf7f   : > { %v3698_v61 = vpop.eup %3697 }
 0xf80   : > { %v2266_v62 = vsel %vm846_vm2, %v3698_v61, 0.0 }
 0xf81   : > { %2267 = vadd.xlane.f32.xlu0 %v2266_v62 }
 0xf97   : > { %2271 = vrot.lane.b32.xlu0 %v4120_v40, %s4377_s0  ;;  %s707_s0 = scalar_lea.vmem %s4346_s24, %s3907_s25 }
 0xf9b   : > { %v2101_v1 = vpop.xlane.xlu0 %2100 }
 0xf9c   : > { %3699 = vrcp.f32 %v2101_v1 }
 0xfa6   : > { %v3700_v2 = vpop.eup %3699 }
 0xfa7   : > { %v2103_v3 = vmul.f32 %v3700_v2, %v3696_v56  ;;  %v3310_v2 = vld [vmem:[%s4339_s17] ss:$0 sm:$0xff] }
 0xfa9   : > { %3504 = vmatmul.mubr.msk.f32.vlgmr.msra.gmra.mrb[12].mxu1 %vm846_vm2, %v2103_v3 }
 0xfaa   : > { %3513 = vmatprep.mubr.msk.f32.mxu1 %vm3750_vm1, %v3751_v13 }
0x100e   : > { %v2268_v5 = vpop.xlane.xlu0 %2267 }
0x100f   : > { %3701 = vrcp.f32 %v2268_v5 }
0x1012   : > { %v2272_v6 = vpop.permute.xlu0 %2271 }
0x1013   : > { %3512 = vmatpush3.msra.mxu1 %v2272_v6 }
0x1014   : > { %3521 = vmatprep.subr.mxu1 %v3751_v13 }
0x1019   : > { %v3702_v7 = vpop.eup %3701 }
0x101a   : > { %v2270_v0 = vmul.f32 %v3702_v7, %v3698_v61 }
0x101c   : > { %3514 = vmatmul.mubr.msk.f32.vlgmr.msra.gmra.mrb[14].mxu1 %vm846_vm2, %v2270_v0 }
0x101d   : > { %3522 = vmatpush3.msra.mxu1 %v2011_v8  ;;  %3523 = vmatprep.mubr.msk.f32.mxu1 %vm3750_vm1, %v3751_v13 }
0x101e   : > { %3531 = vmatprep.subr.mxu1 %v3751_v13 }
0x107c   : > { %v2176_v9 = vpop.f32.mrb[12].mxu1 }
0x107d   : > { %v3505_v11 = vpop.f32.mrb[13].mxu1  ;;  %3524 = vmatmul.mubr.msk.f32.vlgmr.msra.gmra.mrb[16].mxu1 %vm846_vm2, %v2176_v9  ;;  %v3013_v9 = vld [vmem:[%s4342_s20] sm:$0xff] }
0x107e   : > { %3533 = vmatprep.mubr.msk.f32.mxu1 %vm3750_vm1, %v3751_v13 }
0x10ef   : > { %v2343_v14 = vpop.f32.mrb[14].mxu1 }
0x10f0   : > { %v3515_v15 = vpop.f32.mrb[15].mxu1  ;;  %3519 = vmatmul.mubr.msk.f32.vlgmr.msra.gmra.mrb[22].mxu0 %vm846_vm2, %v2343_v14  ;;  %v3016_v14 = vld [vmem:[%s4342_s20 + $0x18] sm:$0xff] }
0x10f1   : > { %3527 = vmatpush3.xpose.msk.msra.mxu0 %vm846_vm2, %v2496_v12  ;;  %3528 = vmatprep.mubr.msk.f32.mxu0 %vm3750_vm1, %v3751_v13  ;;  %v3015_v12 = vld [vmem:[%s4342_s20 + $0x10] sm:$0xff] }
0x10f2   : > { %3536 = vmatprep.subr.mxu0 %v3751_v13  ;;  %v3624_v15 = vpack.c.bf16 %v3016_v14, %v3015_v12 }
0x10f4   : > { %3529 = vmatmul.mubr.msk.f32.vlgmr.msra.gmra.mrb[24].mxu0 %vm846_vm2, %v2494_v16  ;;  %v3098_v16 = vld [vmem:[%s4344_s22] sm:$0xff] }
0x10f5   : > { %3538 = vmatprep.mubr.msk.f32.mxu0 %vm3750_vm1, %v3751_v13  ;;  %3537 = vmatpush3.msra.mxu0 %v2013_v43 }
0x10f6   : > { %3546 = vmatprep.subr.mxu0 %v3751_v13 }
0x1150   : > { %v2489_v17 = vpop.f32.mrb[16].mxu1 }
0x1151   : > { %v3525_v18 = vpop.f32.mrb[17].mxu1 }
0x1152   : > { %v3100_v18 = vld [vmem:[%s4344_s22 + $0x10] sm:$0xff] }
0x11c3   : > { %v2416_v19 = vpop.f32.mrb[22].mxu0 }
0x11c4   : > { %v2490_v20 = vadd.f32 %v2489_v17, %v2416_v19  ;;  %v3520_v21 = vpop.f32.mrb[23].mxu0  ;;  %v3099_v17 = vld [vmem:[%s4344_s22 + $0x8] sm:$0xff] }
0x11c5   : > { %v3627_v19 = vpack.c.bf16 %v3099_v17, %v3098_v16 }
0x11c7   : > { %v2567_v22 = vpop.f32.mrb[24].mxu0 }
0x11c8   : > { %v2571_v23 = vmul.f32 0.35355338, %v2567_v22  ;;  %v3530_v24 = vpop.f32.mrb[25].mxu0  ;;  %v3102_v22 = vld [vmem:[%s4344_s22 + $0x20] sm:$0xff] }
0x11ca   : > { %v2572_v25 = vadd.f32 %v2571_v23, %v4139_v46  ;;  %v3103_v23 = vld [vmem:[%s4344_s22 + $0x28] sm:$0xff] }
0x11cb   : > { %v3633_v24 = vpack.c.bf16 %v3103_v23, %v3102_v22 }
0x11cc   : > { %v2573_v27 = vsel %vm846_vm2, %v2572_v25, -inf }
0x11cd   : > { %2574 = vmax.xlane.f32.xlu0 %v2573_v27  ;;  %v3105_v27 = vld [vmem:[%s4344_s22 + $0x38] sm:$0xff] }
0x11e3   : > { %2584 = vrot.lane.b32.xlu0 %v4120_v40, %s4378_s5 }
0x11e7   : > { %2734 = vrot.lane.b32.xlu0 %v4113_v34, %s4379_s4 }
0x125a   : > { %v2575_v28 = vpop.xlane.xlu0 %2574 }
0x125b   : > { %v2576_v29 = vsub.f32 %v2572_v25, %v2575_v28  ;;  %v3104_v25 = vld [vmem:[%s4344_s22 + $0x30] sm:$0xff] }
0x125c   : > { %v3636_v28 = vpack.c.bf16 %v3105_v27, %v3104_v25 }
0x125d   : > { %v2577_v30 = vmul.f32 1.442695, %v2576_v29  ;;  %v3106_v29 = vld [vmem:[%s4344_s22 + $0x40] sm:$0xff] }
0x125e   : > { %v2585_v31 = vpop.permute.xlu0 %2584 }
0x125f   : > { %3703 = vpow2.f32 %v2577_v30  ;;  %3532 = vmatpush3.msra.mxu1 %v2585_v31  ;;  %v3107_v30 = vld [vmem:[%s4344_s22 + $0x48] sm:$0xff] }
0x1260   : > { %3541 = vmatprep.subr.mxu1 %v3751_v13  ;;  %v3639_v31 = vpack.c.bf16 %v3107_v30, %v3106_v29 }
0x1262   : > { %v2735_v42 = vpop.permute.xlu0 %2734 }
0x1269   : > { %v3704_v33 = vpop.eup %3703 }
0x126a   : > { %v2579_v35 = vsel %vm846_vm2, %v3704_v33, 0.0 }
0x126b   : > { %2580 = vadd.xlane.f32.xlu1 %v2579_v35  ;;  %v3109_v35 = vld [vmem:[%s4344_s22 + $0x58] sm:$0xff] }
0x127c   : > { %2736 = vrot.lane.b32.xlu1 %v4120_v40, %s4379_s4 }
0x12f8   : > { %v2581_v38 = vpop.xlane.xlu1 %2580 }
0x12f9   : > { %3705 = vrcp.f32 %v2581_v38 }
0x12fc   : > { %v2737_v34 = vpop.permute.xlu1 %2736 }
0x1303   : > { %v3706_v39 = vpop.eup %3705 }
0x1304   : > { %v2583_v41 = vmul.f32 %v3706_v39, %v3704_v33  ;;  %v3108_v33 = vld [vmem:[%s4344_s22 + $0x50] sm:$0xff]  ;;  %v3110_v39 = vld [vmem:[%s4344_s22 + $0x60] sm:$0xff] }
0x1305   : > { %v3642_v38 = vpack.c.bf16 %v3109_v35, %v3108_v33 }
0x1306   : > { %3534 = vmatmul.mubr.msk.f32.vlgmr.msra.gmra.mrb[18].mxu1 %vm846_vm2, %v2583_v41  ;;  %v3111_v41 = vld [vmem:[%s4344_s22 + $0x68] sm:$0xff] }
0x1307   : > { %3542 = vmatpush3.xpose.msk.msra.mxu1 %vm846_vm2, %v2737_v34  ;;  %3543 = vmatprep.mubr.msk.f32.mxu1 %vm3750_vm1, %v3751_v13  ;;  %v3645_v34 = vpack.c.bf16 %v3111_v41, %v3110_v39 }
0x1308   : > { %3551 = vmatprep.subr.mxu1 %v3751_v13 }
0x130a   : > { %3544 = vmatmul.mubr.msk.f32.vlgmr.msra.gmra.mrb[20].mxu1 %vm846_vm2, %v2735_v42 }
0x130b   : > { %3553 = vmatprep.mubr.msk.f32.mxu1 %vm3750_vm1, %v3751_v13  ;;  %3552 = vmatpush3.msra.mxu1 %v2014_v36 }
0x130c   : > { %3626 = vmatprep.subr.bf16.mxu1 %v3749_v10 }
0x13d9   : > { %v2656_v44 = vpop.f32.mrb[18].mxu1 }
0x13da   : > { %v3535_v45 = vpop.f32.mrb[19].mxu1  ;;  %3539 = vmatmul.mubr.msk.f32.vlgmr.msra.gmra.mrb[26].mxu0 %vm846_vm2, %v2656_v44 }
0x13db   : > { %3548 = vmatprep.mubr.msk.f32.mxu0 %vm3750_vm1, %v3751_v13 }
0x13dd   : > { %v2808_v47 = vpop.f32.mrb[20].mxu1 }
0x13de   : > { %v2812_v48 = vmul.f32 0.35355338, %v2808_v47  ;;  %v3545_v49 = vpop.f32.mrb[21].mxu1  ;;  %v3311_v47 = vld [vmem:[%s4340_s18] ss:$0 sm:$0xff] }
0x13df   : > { %v3312_v49 = vld [vmem:[%s4381_s30] ss:$0 sm:$0xff] }
0x13e0   : > { %v2813_v50 = vadd.f32 %v2812_v48, %v4139_v46 }
0x13e2   : > { %v2814_v37 = vsel %vm846_vm2, %v2813_v50, -inf }
0x13e3   : > { %2815 = vmax.xlane.f32.xlu1 %v2814_v37 }
0x1470   : > { %v2816_v51 = vpop.xlane.xlu1 %2815 }
0x1471   : > { %v2817_v52 = vsub.f32 %v2813_v50, %v2816_v51  ;;  %v3113_v51 = vld [vmem:[%s4344_s22 + $0x78] sm:$0xff] }
0x1473   : > { %v2818_v53 = vmul.f32 1.442695, %v2817_v52 }
0x1475   : > { %3707 = vpow2.f32 %v2818_v53  ;;  %v3313_v53 = vld [vmem:[%s4343_s21] ss:$0 sm:$0xff] }
0x147f   : > { %v3708_v54 = vpop.eup %3707 }
0x1480   : > { %v2820_v32 = vsel %vm846_vm2, %v3708_v54, 0.0 }
0x1481   : > { %2821 = vadd.xlane.f32.xlu0 %v2820_v32 }
0x1497   : > { %2825 = vrot.lane.b32.xlu0 %v4120_v40, %s4380_s26 }
0x14ad   : > { %v2729_v46 = vpop.f32.mrb[26].mxu0 }
0x14ae   : > { %v2733_v55 = vadd.f32 %v2729_v46, %v2490_v20  ;;  %v3540_v56 = vpop.f32.mrb[27].mxu0  ;;  %v3101_v20 = vld [vmem:[%s4344_s22 + $0x18] sm:$0xff] }
0x14af   : > { %v3630_v21 = vpack.c.bf16 %v3101_v20, %v3100_v18  ;;  %v3315_v56 = vld [vmem:[%s4345_s23] ss:$0 sm:$0xff] }
0x150e   : > { %v2822_v26 = vpop.xlane.xlu0 %2821 }
0x150f   : > { %3709 = vrcp.f32 %v2822_v26 }
0x1512   : > { %v2826_v57 = vpop.permute.xlu0 %2825 }
0x1513   : > { %3547 = vmatpush3.msra.mxu0 %v2826_v57 }
0x1514   : > { %3620 = vmatprep.subr.bf16.mxu0 %v3749_v10 }
0x1519   : > { %v3710_v58 = vpop.eup %3709 }
0x151a   : > { %v2824_v59 = vmul.f32 %v3710_v58, %v3708_v54 }
0x151c   : > { %3549 = vmatmul.mubr.msk.f32.vlgmr.msra.gmra.mrb[28].mxu0 %vm846_vm2, %v2824_v59 }
0x151d   : > { %3564 = vmatprep.mubr.msk.f32.mxu0 %vm3750_vm1, %v3751_v13 }
0x15ef   : > { %v2897_v40 = vpop.f32.mrb[28].mxu0 }
0x15f0   : > { %v3550_v60 = vpop.f32.mrb[29].mxu0  ;;  %3554 = vmatmul.mubr.msk.f32.vlgmr.msra.gmra.mrb[22].mxu1 %vm846_vm2, %v2897_v40 }
0x15f1   : > { %3599 = vmatprep.mubr.msk.f32.mxu1 %vm3750_vm1, %v3751_v13  ;;  %3628 = vmatpush3.bf16.msra.mxu1 %v3627_v19 }
0x15f2   : > { %3629 = vmatprep.subr.bf16.mxu1 %v3749_v10 }
0x15f5   : > { %3631 = vmatpush3.bf16.msra.mxu1 %v3630_v21 }
0x15f6   : > { %3632 = vmatprep.subr.bf16.mxu1 %v3749_v10 }
0x15f9   : > { %3634 = vmatpush3.bf16.msra.mxu1 %v3633_v24 }
0x15fa   : > { %3635 = vmatprep.subr.bf16.mxu1 %v3749_v10 }
0x15fd   : > { %3637 = vmatpush3.bf16.msra.mxu1 %v3636_v28 }
0x15fe   : > { %3638 = vmatprep.subr.bf16.mxu1 %v3749_v10 }
0x1601   : > { %3640 = vmatpush3.bf16.msra.mxu1 %v3639_v31 }
0x1602   : > { %3641 = vmatprep.subr.bf16.mxu1 %v3749_v10 }
0x1605   : > { %3643 = vmatpush3.bf16.msra.mxu1 %v3642_v38 }
0x1606   : > { %3644 = vmatprep.subr.bf16.mxu1 %v3749_v10 }
0x1609   : > { %3646 = vmatpush3.bf16.msra.mxu1 %v3645_v34 }
0x160a   : > { %3647 = vmatprep.subr.bf16.mxu1 %v3749_v10 }
0x16c3   : > { %v2970_v61 = vpop.f32.mrb[22].mxu1 }
0x16c4   : > { %v2974_v62 = vadd.f32 %v2970_v61, %v2733_v55  ;;  %v3555_v1 = vpop.f32.mrb[23].mxu1 }
0x16c6   : > { %v2975_v3 = vadd.f32 %v2974_v62, %v4060_v63  ;;  %v3014_v63 = vld [vmem:[%s4342_s20 + $0x8] sm:$0xff] }
0x16c7   : > { %v3621_v11 = vpack.c.bf16 %v3014_v63, %v3013_v9 }
0x16c8   : > { %v4227_v4 = vadd.f32 %v3310_v2, %v2975_v3 }
0x16c9   : > { %3622 = vmatpush3.bf16.msra.mxu0 %v3621_v11 }
0x16ca   : > { %v2986_v5 = vsel %vm726_vm0, %v4227_v4, 0.0  ;;  %3623 = vmatprep.subr.bf16.mxu0 %v3749_v10  ;;  %v3112_v10 = vld [vmem:[%s4344_s22 + $0x70] sm:$0xff] }
0x16cb   : > { %2987 = vadd.xlane.f32.xlu1 %v2986_v5  ;;  %v3648_v52 = vpack.c.bf16 %v3113_v51, %v3112_v10 }
0x16cd   : > { %3625 = vmatpush3.bf16.msra.mxu0 %v3624_v15  ;;  %3649 = vmatpush3.bf16.msra.mxu1 %v3648_v52 }
0x1758   : > { %v2988_v6 = vpop.xlane.xlu1 %2987 }
0x1759   : > { %v2989_v7 = vmul.f32 0.03125, %v2988_v6 }
0x175b   : > { %v2990_v0 = vsub.f32 %v4227_v4, %v2989_v7 }
0x175d   : > { %v2991_v13 = vmul.f32 %v2990_v0, %v2990_v0 }
0x175f   : > { %v2992_v8 = vsel %vm726_vm0, %v2991_v13, 0.0 }
0x1760   : > { %2993 = vadd.xlane.f32.xlu1 %v2992_v8 }
0x17ed   : > { %v2994_v42 = vpop.xlane.xlu1 %2993 }
0x17ee   : > { %v2995_v43 = vmul.f32 0.03125, %v2994_v42 }
0x17f0   : > { %v2996_v44 = vadd.f32 1e-05, %v2995_v43 }
0x17f2   : > { %3711 = vrsqrt.f32 %v2996_v44 }
0x17fc   : > { %v3712_v45 = vpop.eup %3711 }
0x17fd   : > { %v2998_v48 = vmul.f32 %v3712_v45, %v2990_v0 }
0x17ff   : > { %v3005_v50 = vmul.f32 %v3311_v47, %v2998_v48 }
0x1801   : > { %v3012_v37 = vadd.f32 %v3312_v49, %v3005_v50 }
0x1803   : > { %3565 = vmatmul.mubr.msk.f32.vlgmr.msra.gmra.mrb[30].mxu0 %vm726_vm0, %v3012_v37 }
0x18d6   : > { %v3093_v54 = vpop.f32.mrb[30].mxu0 }
0x18d7   : > { %v3094_v32 = vadd.f32 %v3313_v53, %v3093_v54  ;;  %v3566_v36 = vpop.f32.mrb[31].mxu0 }
0x18d9   : > { %v3097_v46 = vmax.f32 %v3094_v32, 0.0 }
0x18db   : > { %3600 = vmatmul.mubr.f32.vlgmr.msra.gmra.mrb[24].mxu1 %v3097_v46 }
0x19ae   : > { %v3180_v55 = vpop.f32.mrb[24].mxu1 }
0x19af   : > { %v3184_v26 = vadd.f32 %v3180_v55, %v4227_v4  ;;  %v3601_v57 = vpop.f32.mrb[25].mxu1 }
0x19b1   : > { %v3192_v58 = vadd.f32 %v3315_v56, %v3184_v26 }
0x19b3   : > { %3193 = vst.msk [vmem:[%s707_s0] sm:$0xff] %vm726_vm0, %v3192_v58 }
0x19b4 PF: > { %s44_s1 = sadd.s32 1, %s3745_s1  }
0x19b5   : > { %p41_p0 = scmp.ge.s32.totalorder %s44_s1, 4  }
0x19b7   :  { %43 = sbr.rel (!%p41_p0) target bundleno = 35 (0x23), region = 141 }

</bundles_post_ra>
